<compile_context>
chip_gen: v5e
topology: v5e:2x2
jax: 0.10.0
libtpu: 0.0.40
codegen_flags: <defaults>
</compile_context>

<pallas_src>
import functools

import jax
import jax.numpy as jnp
from jax import lax
from jax.experimental import pallas as pl
from jax.experimental.pallas import tpu as pltpu


# --------------------------------------------------------------------------
# VMEM budgeting helpers
# --------------------------------------------------------------------------
def _round_up(x, m):
    return ((x + m - 1) // m) * m


def _vmem_limit_bytes():
    """Scoped-VMEM limit: ~85% of physical, capped at 100 MiB (v5e/v6e); ~54 MiB on v7x."""
    try:
        cap = int(pltpu.get_tpu_info().vmem_capacity_bytes)
    except Exception:
        cap = 64 * 2**20                       # conservative fallback (v7x per-TC VMEM)
    return int(min(cap * 0.85, 100 * 2**20))


def _pick_time_block(T, Bp, Din, Hp, in_bytes, out_bytes):
    """Largest time block (<=128) whose pipelined blocks + scratch fit the VMEM budget."""
    limit = _vmem_limit_bytes()
    fixed = 2 * ((Din + Hp) * 3 * Hp * 2       # resident bf16 W_ih + W_hh (single buffer)
                 + 3 * Bp * Hp * 4             # h0 block + hN block + h scratch (f32)
                 + 4 * Hp * 4)                 # biases
    budget = max(limit - fixed - (8 << 20), 4 << 20)
    per_t = 2 * (2 * Bp * Din * in_bytes       # double-buffered input blocks (2 dirs)
                 + 2 * Bp * Hp * out_bytes     # double-buffered output blocks (2 dirs)
                 + Bp * 3 * Hp * 4)            # f32 gin scratch (2 dirs)
    tt = int(max(1, min(T, budget // max(per_t, 1), 128)))
    while T % tt:                              # divisor fallback (see TODO above)
        tt -= 1
    return tt


# --------------------------------------------------------------------------
# Pallas kernel: one bidirectional GRU layer over a block of timesteps.
# Grid axis = time blocks (sequential / "arbitrary").  Hidden states for both
# directions live in VMEM scratch across grid steps.
# Per-step math (torch.nn.GRUCell, with input-side gates computed per block):
#   gin = x W_ih^T + b_ih + [b_hr, b_hz, 0]     (fused block GEMM, VMEM scratch)
#   gh  = h W_hh^T
#   r = sig(gin_r + gh_r); z = sig(gin_z + gh_z)
#   n = tanh(gin_n + r * (gh_n + b_hn));  h' = n + z * (h - n)
# --------------------------------------------------------------------------
def _bidir_gru_seq_kernel(Hp, TT, nTb,
                          xf_ref, xb_ref, h0f_ref, h0b_ref,
                          wihf_ref, wihb_ref, whhf_ref, whhb_ref,
                          binf_ref, binb_ref, bhnf_ref, bhnb_ref,
                          outf_ref, outb_ref, hNf_ref, hNb_ref,
                          hf_s, hb_s, ginf_s, ginb_s):
    tb = pl.program_id(0)
    Bp = hf_s.shape[0]
    Din = xf_ref.shape[-1]

    @pl.when(tb == 0)
    def _():
        hf_s[...] = h0f_ref[...].astype(jnp.float32)
        hb_s[...] = h0b_ref[...].astype(jnp.float32)

    # ---- Fused input projection for the whole block: one big bf16 MXU GEMM per
    #      direction, f32 accumulate, parked in VMEM scratch (no HBM gin traffic).
    xf = xf_ref[...].astype(jnp.bfloat16).reshape(TT * Bp, Din)
    xb = xb_ref[...].astype(jnp.bfloat16).reshape(TT * Bp, Din)
    ginf_s[...] = (jnp.dot(xf, wihf_ref[...], preferred_element_type=jnp.float32)
                   + binf_ref[...])
    ginb_s[...] = (jnp.dot(xb, wihb_ref[...], preferred_element_type=jnp.float32)
                   + binb_ref[...])

    wf = whhf_ref[...]                                  # (Hp, 3Hp) bf16, resident
    wb = whhb_ref[...]
    bnf = jnp.broadcast_to(bhnf_ref[...], (Bp, Hp))     # (B,H) bias broadcast, hoisted
    bnb = jnp.broadcast_to(bhnb_ref[...], (Bp, Hp))

    def gru_step(gin, h, whh, bn):
        gh = jnp.dot(h.astype(jnp.bfloat16), whh, preferred_element_type=jnp.float32)
        r = jax.nn.sigmoid(gin[:, :Hp] + gh[:, :Hp])
        z = jax.nn.sigmoid(gin[:, Hp:2 * Hp] + gh[:, Hp:2 * Hp])
        n = jnp.tanh(gin[:, 2 * Hp:] + r * (gh[:, 2 * Hp:] + bn))
        return n + z * (h - n)                          # == (1-z)*n + z*h

    h_f = hf_s[...]
    h_b = hb_s[...]

    if TT <= 16:
        # Fully unrolled, static slices (best LLO scheduling for short blocks).
        for i in range(TT):
            h_f = gru_step(ginf_s[i * Bp:(i + 1) * Bp, :], h_f, wf, bnf)
            outf_ref[i] = h_f.astype(outf_ref.dtype)
            j = TT - 1 - i                              # backward scans source time down
            h_b = gru_step(ginb_s[j * Bp:(j + 1) * Bp, :], h_b, wb, bnb)
            outb_ref[j] = h_b.astype(outb_ref.dtype)
    else:
        def body(i, carry):
            h_f, h_b = carry
            rf = pl.multiple_of(i * Bp, Bp)
            h_f = gru_step(ginf_s[pl.ds(rf, Bp), :], h_f, wf, bnf)
            outf_ref[i] = h_f.astype(outf_ref.dtype)
            j = TT - 1 - i
            rb = pl.multiple_of(j * Bp, Bp)
            h_b = gru_step(ginb_s[pl.ds(rb, Bp), :], h_b, wb, bnb)
            outb_ref[j] = h_b.astype(outb_ref.dtype)
            return (h_f, h_b)
        h_f, h_b = lax.fori_loop(0, TT, body, (h_f, h_b), unroll=4)

    hf_s[...] = h_f
    hb_s[...] = h_b

    @pl.when(tb == nTb - 1)
    def _():
        hNf_ref[...] = h_f
        hNb_ref[...] = h_b


def gru_bidir_layer(x_f, x_b, h0_f, h0_b, wih_f, wih_b, whh_f, whh_b,
                    b_in_f, b_in_b, b_hn_f, b_hn_b,
                    out_dtype=jnp.float32, time_block=None):
    """One bidirectional GRU layer.

    x_f / x_b : (T, Bp, Din) time-major layer inputs (bf16), both stored in natural
    source-time order; the backward stream reads x_b through a reversed-block
    index_map.  Returns out_f, out_b (T, Bp, Hp) in source-time order plus the
    final hidden states (Bp, Hp) of each direction (f32).
    """
    T, Bp, Din = x_f.shape
    Hp = h0_f.shape[-1]

    if time_block is None:
        time_block = _pick_time_block(T, Bp, Din, Hp,
                                      in_bytes=x_f.dtype.itemsize,
                                      out_bytes=jnp.dtype(out_dtype).itemsize)
    TT = time_block
    assert T % TT == 0, "time_block must divide the sequence length"
    nTb = T // TT

    kernel = functools.partial(_bidir_gru_seq_kernel, Hp, TT, nTb)
    resident = dict(pipeline_mode=pl.Buffered(1))   # constant blocks: no double-buffer

    out_f, out_b, hN_f, hN_b = pl.pallas_call(
        kernel,
        out_shape=(
            jax.ShapeDtypeStruct((T, Bp, Hp), out_dtype),
            jax.ShapeDtypeStruct((T, Bp, Hp), out_dtype),
            jax.ShapeDtypeStruct((Bp, Hp), jnp.float32),
            jax.ShapeDtypeStruct((Bp, Hp), jnp.float32),
        ),
        grid_spec=pltpu.PrefetchScalarGridSpec(
            num_scalar_prefetch=0,
            grid=(nTb,),
            in_specs=[
                # layer input, forward: natural time-block order
                pl.BlockSpec((TT, Bp, Din), lambda tb: (tb, 0, 0)),
                # layer input, backward: reversed block order (no jnp.flip anywhere)
                pl.BlockSpec((TT, Bp, Din), lambda tb: (nTb - 1 - tb, 0, 0)),
                pl.BlockSpec((Bp, Hp), lambda tb: (0, 0), **resident),        # h0_f
                pl.BlockSpec((Bp, Hp), lambda tb: (0, 0), **resident),        # h0_b
                pl.BlockSpec((Din, 3 * Hp), lambda tb: (0, 0), **resident),   # W_ih_f
                pl.BlockSpec((Din, 3 * Hp), lambda tb: (0, 0), **resident),   # W_ih_b
                pl.BlockSpec((Hp, 3 * Hp), lambda tb: (0, 0), **resident),    # W_hh_f
                pl.BlockSpec((Hp, 3 * Hp), lambda tb: (0, 0), **resident),    # W_hh_b
                pl.BlockSpec((1, 3 * Hp), lambda tb: (0, 0), **resident),     # b_in_f
                pl.BlockSpec((1, 3 * Hp), lambda tb: (0, 0), **resident),     # b_in_b
                pl.BlockSpec((1, Hp), lambda tb: (0, 0), **resident),         # b_hn_f
                pl.BlockSpec((1, Hp), lambda tb: (0, 0), **resident),         # b_hn_b
            ],
            out_specs=[
                pl.BlockSpec((TT, Bp, Hp), lambda tb: (tb, 0, 0)),            # out_f
                pl.BlockSpec((TT, Bp, Hp), lambda tb: (nTb - 1 - tb, 0, 0)),  # out_b
                pl.BlockSpec((Bp, Hp), lambda tb: (0, 0)),                    # hN_f
                pl.BlockSpec((Bp, Hp), lambda tb: (0, 0)),                    # hN_b
            ],
            scratch_shapes=[
                pltpu.VMEM((Bp, Hp), jnp.float32),             # h_f carry
                pltpu.VMEM((Bp, Hp), jnp.float32),             # h_b carry
                pltpu.VMEM((TT * Bp, 3 * Hp), jnp.float32),    # gin_f block
                pltpu.VMEM((TT * Bp, 3 * Hp), jnp.float32),    # gin_b block
            ],
        ),
        compiler_params=pltpu.CompilerParams(
            dimension_semantics=("arbitrary",),
            vmem_limit_bytes=_vmem_limit_bytes()),
    )(x_f, x_b, h0_f, h0_b, wih_f, wih_b, whh_f, whh_b,
      b_in_f, b_in_b, b_hn_f, b_hn_b)
    return out_f, out_b, hN_f, hN_b


# --------------------------------------------------------------------------
# Wrapper: weight prep (pad + transpose + gate-block layout), layer stacking.
# --------------------------------------------------------------------------
def _prep_cell(w_ih, w_hh, b_ih, b_hh, H, Hp, Din, Dp):
    """Torch GRUCell params -> padded, transposed, gate-blocked bf16 kernel params.

    Gate blocks laid out [r | z | n], each Hp lanes wide.  b_ih and the r/z parts of
    b_hh fold into the input-projection bias; only b_hn stays on the recurrent side.
    Zero padding keeps padded hidden columns exactly zero through the recurrence.
    """
    wih_t = jnp.zeros((Dp, 3 * Hp), jnp.float32)
    whh_t = jnp.zeros((Hp, 3 * Hp), jnp.float32)
    b_in = jnp.zeros((1, 3 * Hp), jnp.float32)
    for g in range(3):
        wih_t = wih_t.at[:Din, g * Hp:g * Hp + H].set(w_ih[g * H:(g + 1) * H, :].T)
        whh_t = whh_t.at[:H, g * Hp:g * Hp + H].set(w_hh[g * H:(g + 1) * H, :].T)
        hb = b_hh[g * H:(g + 1) * H] if g < 2 else 0.0      # fold b_hr / b_hz only
        b_in = b_in.at[0, g * Hp:g * Hp + H].set(b_ih[g * H:(g + 1) * H] + hb)
    b_hn = jnp.zeros((1, Hp), jnp.float32).at[0, :H].set(b_hh[2 * H:])
    return (wih_t.astype(jnp.bfloat16), whh_t.astype(jnp.bfloat16), b_in, b_hn)


def bidirectional_gru_decoder(x, encoder_h, params, hidden_size, num_layers,
                              time_block=None):
    """x: (B, T, input_size); encoder_h: (num_layers, B, 2*hidden_size).
    Returns out (B, T, 2*hidden_size) f32, h (num_layers, B, 2*hidden_size) f32."""
    B, T, D0 = x.shape
    H = hidden_size
    Bp = _round_up(B, 16)     # sublane-align batch (bf16 activations)
    Hp = _round_up(H, 128)    # lane-align hidden -> unmasked per-step stores

    # Time-major, batch-padded, bf16 layer-0 input (one cheap XLA transpose+pad).
    x_tm = jnp.transpose(x, (1, 0, 2))
    x_tm = jnp.pad(x_tm, ((0, 0), (0, Bp - B), (0, 0))).astype(jnp.bfloat16)

    in_f = in_b = x_tm
    h_f_list, h_b_list = [], []
    out_f = out_b = None
    for j in range(num_layers):
        Din, Dp = (D0, D0) if j == 0 else (H, Hp)
        wf_ih, wf_hh, bf_ih, bf_hh = params["f"][j]
        wb_ih, wb_hh, bb_ih, bb_hh = params["b"][j]
        wihf, whhf, binf, bhnf = _prep_cell(wf_ih, wf_hh, bf_ih, bf_hh, H, Hp, Din, Dp)
        wihb, whhb, binb, bhnb = _prep_cell(wb_ih, wb_hh, bb_ih, bb_hh, H, Hp, Din, Dp)

        h0_f = jnp.pad(encoder_h[j, :, :H], ((0, Bp - B), (0, Hp - H)))
        h0_b = jnp.pad(encoder_h[j, :, H:], ((0, Bp - B), (0, Hp - H)))

        last = j == num_layers - 1
        out_f, out_b, hN_f, hN_b = gru_bidir_layer(
            in_f, in_b, h0_f, h0_b, wihf, wihb, whhf, whhb,
            binf, binb, bhnf, bhnb,
            out_dtype=jnp.float32 if last else jnp.bfloat16,
            time_block=time_block)
        h_f_list.append(hN_f[:B, :H])
        h_b_list.append(hN_b[:B, :H])
        in_f, in_b = out_f, out_b

    out = jnp.concatenate([out_f[:, :B, :H], out_b[:, :B, :H]], axis=-1)  # (T, B, 2H)
    out = jnp.transpose(out, (1, 0, 2))                                   # (B, T, 2H)
    h = jnp.concatenate([jnp.stack(h_f_list, axis=0),
                         jnp.stack(h_b_list, axis=0)], axis=2)            # (L, B, 2H)
    return out, h


# --------------------------------------------------------------------------
# Deterministic parameter init (torch GRUCell layout: w_ih (3H,D) in [r,z,n] order)
# --------------------------------------------------------------------------
def init_params(key, input_size, hidden_size, num_layers):
    params = {"f": [], "b": []}
    bound = 1.0 / float(hidden_size) ** 0.5
    for j in range(num_layers):
        d = input_size if j == 0 else hidden_size
        for direction in ("f", "b"):
            key, k1, k2, k3, k4 = jax.random.split(key, 5)
            w_ih = jax.random.uniform(k1, (3 * hidden_size, d),
                                      minval=-bound, maxval=bound, dtype=jnp.float32)
            w_hh = jax.random.uniform(k2, (3 * hidden_size, hidden_size),
                                      minval=-bound, maxval=bound, dtype=jnp.float32)
            b_ih = jax.random.uniform(k3, (3 * hidden_size,),
                                      minval=-bound, maxval=bound, dtype=jnp.float32)
            b_hh = jax.random.uniform(k4, (3 * hidden_size,),
                                      minval=-bound, maxval=bound, dtype=jnp.float32)
            params[direction].append((w_ih, w_hh, b_ih, b_hh))
    return params


# --------------------------------------------------------------------------
# Pure-JAX reference that mirrors the PyTorch forward loop exactly (f32).
# --------------------------------------------------------------------------
def _gru_cell_ref(x, h, w_ih, w_hh, b_ih, b_hh):
    H = h.shape[-1]
    gi = x @ w_ih.T + b_ih
    gh = h @ w_hh.T + b_hh
    r = jax.nn.sigmoid(gi[:, :H] + gh[:, :H])
    z = jax.nn.sigmoid(gi[:, H:2 * H] + gh[:, H:2 * H])
    n = jnp.tanh(gi[:, 2 * H:] + r * gh[:, 2 * H:])
    return (1.0 - z) * n + z * h


def reference_decoder(x, encoder_h, params, hidden_size, num_layers):
    B, T, _ = x.shape
    h_f = [encoder_h[j, :, :hidden_size] for j in range(num_layers)]
    h_b = [encoder_h[j, :, hidden_size:] for j in range(num_layers)]
    rev_x = jnp.flip(x, axis=1)
    out_f, out_b = [], []
    for i in range(T):
        x_f_i = x[:, i, :]
        x_b_i = rev_x[:, i, :]
        for j in range(num_layers):
            x_f_i = _gru_cell_ref(x_f_i, h_f[j], *params["f"][j])
            x_b_i = _gru_cell_ref(x_b_i, h_b[j], *params["b"][j])
            h_f[j] = x_f_i
            h_b[j] = x_b_i
        out_f.append(x_f_i)
        out_b.append(x_b_i)
    out_f = jnp.stack(out_f, axis=1)
    out_b = jnp.flip(jnp.stack(out_b, axis=1), axis=1)
    out = jnp.concatenate([out_f, out_b], axis=2)
    h = jnp.concatenate([jnp.stack(h_f, axis=0), jnp.stack(h_b, axis=0)], axis=2)
    return out, h


if __name__ == "__main__":
    INPUT_SIZE, HIDDEN, LAYERS = 16, 32, 2

    key = jax.random.PRNGKey(0)
    k_x, k_h, k_p = jax.random.split(key, 3)
    params = init_params(k_p, INPUT_SIZE, HIDDEN, LAYERS)

    def check(B, T, time_block):
        kx, kh = jax.random.split(jax.random.fold_in(k_x, T), 2)
        x = jax.random.normal(kx, (B, T, INPUT_SIZE), dtype=jnp.float32)
        encoder_h = jax.random.normal(kh, (LAYERS, B, 2 * HIDDEN), dtype=jnp.float32)

        out, h = bidirectional_gru_decoder(x, encoder_h, params, HIDDEN, LAYERS,
                                           time_block=time_block)
        out = jax.block_until_ready(out)
        h = jax.block_until_ready(h)

        out_ref, h_ref = reference_decoder(x, encoder_h, params, HIDDEN, LAYERS)
        assert out.shape == (B, T, 2 * HIDDEN)
        assert h.shape == (LAYERS, B, 2 * HIDDEN)
        # bf16 MXU operands (f32 accumulate) -> relaxed tolerances vs the f32 reference.
        assert jnp.allclose(out, out_ref, atol=7.5e-2, rtol=5e-2), \
            float(jnp.max(jnp.abs(out - out_ref)))
        assert jnp.allclose(h, h_ref, atol=7.5e-2, rtol=5e-2), \
            float(jnp.max(jnp.abs(h - h_ref)))

    # grid=(2,), TT=4: exercises reversed-block index maps + fully unrolled path.
    check(B=2, T=8, time_block=4)
    # auto (VMEM-budget) time_block -> TT=24, single block, fori_loop(unroll=4) path.
    check(B=2, T=24, time_block=None)

    print("KERNEL_OK")
</pallas_src>

<mosaic_0001>
module attributes {stable_mosaic.version = 11 : i64} {
  func.func @_bidir_gru_seq_kernel(%arg0: i32, %arg1: memref<4x16x16xbf16, #tpu.memory_space<vmem>>, %arg2: memref<4x16x16xbf16, #tpu.memory_space<vmem>>, %arg3: memref<16x128xf32, #tpu.memory_space<vmem>>, %arg4: memref<16x128xf32, #tpu.memory_space<vmem>>, %arg5: memref<16x384xbf16, #tpu.memory_space<vmem>>, %arg6: memref<16x384xbf16, #tpu.memory_space<vmem>>, %arg7: memref<128x384xbf16, #tpu.memory_space<vmem>>, %arg8: memref<128x384xbf16, #tpu.memory_space<vmem>>, %arg9: memref<1x384xf32, #tpu.memory_space<vmem>>, %arg10: memref<1x384xf32, #tpu.memory_space<vmem>>, %arg11: memref<1x128xf32, #tpu.memory_space<vmem>>, %arg12: memref<1x128xf32, #tpu.memory_space<vmem>>, %arg13: memref<4x16x128xbf16, #tpu.memory_space<vmem>>, %arg14: memref<4x16x128xbf16, #tpu.memory_space<vmem>>, %arg15: memref<16x128xf32, #tpu.memory_space<vmem>>, %arg16: memref<16x128xf32, #tpu.memory_space<vmem>>, %arg17: memref<16x128xf32, #tpu.memory_space<vmem>>, %arg18: memref<16x128xf32, #tpu.memory_space<vmem>>, %arg19: memref<64x384xf32, #tpu.memory_space<vmem>>, %arg20: memref<64x384xf32, #tpu.memory_space<vmem>>) attributes {dimension_semantics = [#tpu.dimension_semantics<arbitrary>], iteration_bounds = array<i64: 2>, scalar_prefetch = 0 : i64, scratch_operands = 4 : i64, tpu.core_type = #tpu.core_type<tc>, window_params = [{transform_indices = @transform_0, window_bounds = array<i64: 4, 16, 16>}, {transform_indices = @transform_1, window_bounds = array<i64: 4, 16, 16>}, {pipeline_mode = #tpu.pipeline_mode<synchronous>, transform_indices = @transform_2, window_bounds = array<i64: 16, 128>}, {pipeline_mode = #tpu.pipeline_mode<synchronous>, transform_indices = @transform_3, window_bounds = array<i64: 16, 128>}, {pipeline_mode = #tpu.pipeline_mode<synchronous>, transform_indices = @transform_4, window_bounds = array<i64: 16, 384>}, {pipeline_mode = #tpu.pipeline_mode<synchronous>, transform_indices = @transform_5, window_bounds = array<i64: 16, 384>}, {pipeline_mode = #tpu.pipeline_mode<synchronous>, transform_indices = @transform_6, window_bounds = array<i64: 128, 384>}, {pipeline_mode = #tpu.pipeline_mode<synchronous>, transform_indices = @transform_7, window_bounds = array<i64: 128, 384>}, {pipeline_mode = #tpu.pipeline_mode<synchronous>, transform_indices = @transform_8, window_bounds = array<i64: 1, 384>}, {pipeline_mode = #tpu.pipeline_mode<synchronous>, transform_indices = @transform_9, window_bounds = array<i64: 1, 384>}, {pipeline_mode = #tpu.pipeline_mode<synchronous>, transform_indices = @transform_10, window_bounds = array<i64: 1, 128>}, {pipeline_mode = #tpu.pipeline_mode<synchronous>, transform_indices = @transform_11, window_bounds = array<i64: 1, 128>}, {transform_indices = @transform_12, window_bounds = array<i64: 4, 16, 128>}, {transform_indices = @transform_13, window_bounds = array<i64: 4, 16, 128>}, {pipeline_mode = #tpu.pipeline_mode<synchronous>, transform_indices = @transform_14, window_bounds = array<i64: 16, 128>}, {pipeline_mode = #tpu.pipeline_mode<synchronous>, transform_indices = @transform_15, window_bounds = array<i64: 16, 128>}]} {
    %c0_i32 = arith.constant 0 : i32
    %0 = arith.cmpi eq, %arg0, %c0_i32 : i32
    %1 = arith.extui %0 : i1 to i32
    %c0_i32_0 = arith.constant 0 : i32
    %2 = arith.cmpi ne, %1, %c0_i32_0 : i32
    scf.if %2 {
      %c0_94 = arith.constant 0 : index
      %c0_95 = arith.constant 0 : index
      %290 = vector.load %arg3[%c0_94, %c0_95] : memref<16x128xf32, #tpu.memory_space<vmem>>, vector<16x128xf32>
      %c0_96 = arith.constant 0 : index
      %c0_97 = arith.constant 0 : index
      %291 = vector.load %arg17[%c0_96, %c0_97] : memref<16x128xf32, #tpu.memory_space<vmem>>, vector<16x128xf32>
      tpu.vector_store %arg17[%c0_96, %c0_97], %290 {strides = array<i32>} : memref<16x128xf32, #tpu.memory_space<vmem>>, vector<16x128xf32>,
      %c0_98 = arith.constant 0 : index
      %c0_99 = arith.constant 0 : index
      %292 = vector.load %arg4[%c0_98, %c0_99] : memref<16x128xf32, #tpu.memory_space<vmem>>, vector<16x128xf32>
      %c0_100 = arith.constant 0 : index
      %c0_101 = arith.constant 0 : index
      %293 = vector.load %arg18[%c0_100, %c0_101] : memref<16x128xf32, #tpu.memory_space<vmem>>, vector<16x128xf32>
      tpu.vector_store %arg18[%c0_100, %c0_101], %292 {strides = array<i32>} : memref<16x128xf32, #tpu.memory_space<vmem>>, vector<16x128xf32>,
    } else {
    }
    %c0 = arith.constant 0 : index
    %c0_1 = arith.constant 0 : index
    %c0_2 = arith.constant 0 : index
    %3 = vector.load %arg1[%c0, %c0_1, %c0_2] : memref<4x16x16xbf16, #tpu.memory_space<vmem>>, vector<4x16x16xbf16>
    %4 = vector.shape_cast %3 : vector<4x16x16xbf16> to vector<64x16xbf16>
    %c0_3 = arith.constant 0 : index
    %c0_4 = arith.constant 0 : index
    %c0_5 = arith.constant 0 : index
    %5 = vector.load %arg2[%c0_3, %c0_4, %c0_5] : memref<4x16x16xbf16, #tpu.memory_space<vmem>>, vector<4x16x16xbf16>
    %6 = vector.shape_cast %5 : vector<4x16x16xbf16> to vector<64x16xbf16>
    %c0_6 = arith.constant 0 : index
    %c0_7 = arith.constant 0 : index
    %7 = vector.load %arg5[%c0_6, %c0_7] : memref<16x384xbf16, #tpu.memory_space<vmem>>, vector<16x384xbf16>
    %cst = arith.constant dense<0.000000e+00> : vector<64x384xf32>
    %8 = tpu.matmul %4, %7, %cst {dimension_numbers = #tpu.dot_dimension_numbers<[1], [0], [0], [1], [0, 0, 1, 1], [], []>} : vector<64x16xbf16>, vector<16x384xbf16>, vector<64x384xf32> -> vector<64x384xf32>
    %c0_8 = arith.constant 0 : index
    %c0_9 = arith.constant 0 : index
    %9 = vector.load %arg9[%c0_8, %c0_9] : memref<1x384xf32, #tpu.memory_space<vmem>>, vector<1x384xf32>
    %10 = vector.broadcast %9 : vector<1x384xf32> to vector<64x384xf32>
    %11 = arith.addf %8, %10 : vector<64x384xf32>
    %c0_10 = arith.constant 0 : index
    %c0_11 = arith.constant 0 : index
    %12 = vector.load %arg19[%c0_10, %c0_11] : memref<64x384xf32, #tpu.memory_space<vmem>>, vector<64x384xf32>
    tpu.vector_store %arg19[%c0_10, %c0_11], %11 {strides = array<i32>} : memref<64x384xf32, #tpu.memory_space<vmem>>, vector<64x384xf32>,
    %c0_12 = arith.constant 0 : index
    %c0_13 = arith.constant 0 : index
    %13 = vector.load %arg6[%c0_12, %c0_13] : memref<16x384xbf16, #tpu.memory_space<vmem>>, vector<16x384xbf16>
    %cst_14 = arith.constant dense<0.000000e+00> : vector<64x384xf32>
    %14 = tpu.matmul %6, %13, %cst_14 {dimension_numbers = #tpu.dot_dimension_numbers<[1], [0], [0], [1], [0, 0, 1, 1], [], []>} : vector<64x16xbf16>, vector<16x384xbf16>, vector<64x384xf32> -> vector<64x384xf32>
    %c0_15 = arith.constant 0 : index
    %c0_16 = arith.constant 0 : index
    %15 = vector.load %arg10[%c0_15, %c0_16] : memref<1x384xf32, #tpu.memory_space<vmem>>, vector<1x384xf32>
    %16 = vector.broadcast %15 : vector<1x384xf32> to vector<64x384xf32>
    %17 = arith.addf %14, %16 : vector<64x384xf32>
    %c0_17 = arith.constant 0 : index
    %c0_18 = arith.constant 0 : index
    %18 = vector.load %arg20[%c0_17, %c0_18] : memref<64x384xf32, #tpu.memory_space<vmem>>, vector<64x384xf32>
    tpu.vector_store %arg20[%c0_17, %c0_18], %17 {strides = array<i32>} : memref<64x384xf32, #tpu.memory_space<vmem>>, vector<64x384xf32>,
    %c0_19 = arith.constant 0 : index
    %c0_20 = arith.constant 0 : index
    %19 = vector.load %arg7[%c0_19, %c0_20] : memref<128x384xbf16, #tpu.memory_space<vmem>>, vector<128x384xbf16>
    %c0_21 = arith.constant 0 : index
    %c0_22 = arith.constant 0 : index
    %20 = vector.load %arg8[%c0_21, %c0_22] : memref<128x384xbf16, #tpu.memory_space<vmem>>, vector<128x384xbf16>
    %c0_23 = arith.constant 0 : index
    %c0_24 = arith.constant 0 : index
    %21 = vector.load %arg11[%c0_23, %c0_24] : memref<1x128xf32, #tpu.memory_space<vmem>>, vector<1x128xf32>
    %22 = vector.shape_cast %21 : vector<1x128xf32> to vector<1x128xf32>
    %23 = vector.broadcast %22 : vector<1x128xf32> to vector<16x128xf32>
    %c0_25 = arith.constant 0 : index
    %c0_26 = arith.constant 0 : index
    %24 = vector.load %arg12[%c0_25, %c0_26] : memref<1x128xf32, #tpu.memory_space<vmem>>, vector<1x128xf32>
    %25 = vector.shape_cast %24 : vector<1x128xf32> to vector<1x128xf32>
    %26 = vector.broadcast %25 : vector<1x128xf32> to vector<16x128xf32>
    %c0_27 = arith.constant 0 : index
    %c0_28 = arith.constant 0 : index
    %27 = vector.load %arg17[%c0_27, %c0_28] : memref<16x128xf32, #tpu.memory_space<vmem>>, vector<16x128xf32>
    %c0_29 = arith.constant 0 : index
    %c0_30 = arith.constant 0 : index
    %28 = vector.load %arg18[%c0_29, %c0_30] : memref<16x128xf32, #tpu.memory_space<vmem>>, vector<16x128xf32>
    %c0_31 = arith.constant 0 : index
    %c0_32 = arith.constant 0 : index
    %29 = vector.load %arg19[%c0_31, %c0_32] : memref<64x384xf32, #tpu.memory_space<vmem>>, vector<16x384xf32>
    %30 = arith.truncf %27 : vector<16x128xf32> to vector<16x128xbf16>
    %cst_33 = arith.constant dense<0.000000e+00> : vector<16x384xf32>
    %31 = tpu.matmul %30, %19, %cst_33 {dimension_numbers = #tpu.dot_dimension_numbers<[1], [0], [0], [1], [0, 0, 1, 1], [], []>} : vector<16x128xbf16>, vector<128x384xbf16>, vector<16x384xf32> -> vector<16x384xf32>
    %32 = vector.extract_strided_slice %29 {offsets = [0, 0], sizes = [16, 128], strides = [1, 1]} : vector<16x384xf32> to vector<16x128xf32>
    %33 = vector.extract_strided_slice %31 {offsets = [0, 0], sizes = [16, 128], strides = [1, 1]} : vector<16x384xf32> to vector<16x128xf32>
    %34 = arith.addf %32, %33 : vector<16x128xf32>
    %35 = arith.negf %34 : vector<16x128xf32>
    %36 = math.exp %35 : vector<16x128xf32>
    %cst_34 = arith.constant 1.000000e+00 : f32
    %37 = vector.broadcast %cst_34 : f32 to vector<16x128xf32>
    %38 = arith.addf %37, %36 : vector<16x128xf32>
    %39 = arith.divf %37, %38 : vector<16x128xf32>
    %40 = vector.extract_strided_slice %29 {offsets = [0, 128], sizes = [16, 128], strides = [1, 1]} : vector<16x384xf32> to vector<16x128xf32>
    %41 = vector.extract_strided_slice %31 {offsets = [0, 128], sizes = [16, 128], strides = [1, 1]} : vector<16x384xf32> to vector<16x128xf32>
    %42 = arith.addf %40, %41 : vector<16x128xf32>
    %43 = arith.negf %42 : vector<16x128xf32>
    %44 = math.exp %43 : vector<16x128xf32>
    %cst_35 = arith.constant 1.000000e+00 : f32
    %45 = vector.broadcast %cst_35 : f32 to vector<16x128xf32>
    %46 = arith.addf %45, %44 : vector<16x128xf32>
    %47 = arith.divf %45, %46 : vector<16x128xf32>
    %48 = vector.extract_strided_slice %29 {offsets = [0, 256], sizes = [16, 128], strides = [1, 1]} : vector<16x384xf32> to vector<16x128xf32>
    %49 = vector.extract_strided_slice %31 {offsets = [0, 256], sizes = [16, 128], strides = [1, 1]} : vector<16x384xf32> to vector<16x128xf32>
    %50 = arith.addf %49, %23 : vector<16x128xf32>
    %51 = arith.mulf %39, %50 : vector<16x128xf32>
    %52 = arith.addf %48, %51 : vector<16x128xf32>
    %53 = math.tanh %52 : vector<16x128xf32>
    %54 = arith.subf %27, %53 : vector<16x128xf32>
    %55 = arith.mulf %47, %54 : vector<16x128xf32>
    %56 = arith.addf %53, %55 : vector<16x128xf32>
    %57 = arith.truncf %56 : vector<16x128xf32> to vector<16x128xbf16>
    %c0_36 = arith.constant 0 : index
    %c0_37 = arith.constant 0 : index
    %c0_38 = arith.constant 0 : index
    %58 = vector.load %arg13[%c0_36, %c0_37, %c0_38] : memref<4x16x128xbf16, #tpu.memory_space<vmem>>, vector<1x16x128xbf16>
    %59 = vector.shape_cast %58 : vector<1x16x128xbf16> to vector<16x128xbf16>
    %60 = vector.shape_cast %57 : vector<16x128xbf16> to vector<1x16x128xbf16>
    tpu.vector_store %arg13[%c0_36, %c0_37, %c0_38], %60 {strides = array<i32>} : memref<4x16x128xbf16, #tpu.memory_space<vmem>>, vector<1x16x128xbf16>,
    %c48 = arith.constant 48 : index
    %c0_39 = arith.constant 0 : index
    %61 = vector.load %arg20[%c48, %c0_39] : memref<64x384xf32, #tpu.memory_space<vmem>>, vector<16x384xf32>
    %62 = arith.truncf %28 : vector<16x128xf32> to vector<16x128xbf16>
    %cst_40 = arith.constant dense<0.000000e+00> : vector<16x384xf32>
    %63 = tpu.matmul %62, %20, %cst_40 {dimension_numbers = #tpu.dot_dimension_numbers<[1], [0], [0], [1], [0, 0, 1, 1], [], []>} : vector<16x128xbf16>, vector<128x384xbf16>, vector<16x384xf32> -> vector<16x384xf32>
    %64 = vector.extract_strided_slice %61 {offsets = [0, 0], sizes = [16, 128], strides = [1, 1]} : vector<16x384xf32> to vector<16x128xf32>
    %65 = vector.extract_strided_slice %63 {offsets = [0, 0], sizes = [16, 128], strides = [1, 1]} : vector<16x384xf32> to vector<16x128xf32>
    %66 = arith.addf %64, %65 : vector<16x128xf32>
    %67 = arith.negf %66 : vector<16x128xf32>
    %68 = math.exp %67 : vector<16x128xf32>
    %cst_41 = arith.constant 1.000000e+00 : f32
    %69 = vector.broadcast %cst_41 : f32 to vector<16x128xf32>
    %70 = arith.addf %69, %68 : vector<16x128xf32>
    %71 = arith.divf %69, %70 : vector<16x128xf32>
    %72 = vector.extract_strided_slice %61 {offsets = [0, 128], sizes = [16, 128], strides = [1, 1]} : vector<16x384xf32> to vector<16x128xf32>
    %73 = vector.extract_strided_slice %63 {offsets = [0, 128], sizes = [16, 128], strides = [1, 1]} : vector<16x384xf32> to vector<16x128xf32>
    %74 = arith.addf %72, %73 : vector<16x128xf32>
    %75 = arith.negf %74 : vector<16x128xf32>
    %76 = math.exp %75 : vector<16x128xf32>
    %cst_42 = arith.constant 1.000000e+00 : f32
    %77 = vector.broadcast %cst_42 : f32 to vector<16x128xf32>
    %78 = arith.addf %77, %76 : vector<16x128xf32>
    %79 = arith.divf %77, %78 : vector<16x128xf32>
    %80 = vector.extract_strided_slice %61 {offsets = [0, 256], sizes = [16, 128], strides = [1, 1]} : vector<16x384xf32> to vector<16x128xf32>
    %81 = vector.extract_strided_slice %63 {offsets = [0, 256], sizes = [16, 128], strides = [1, 1]} : vector<16x384xf32> to vector<16x128xf32>
    %82 = arith.addf %81, %26 : vector<16x128xf32>
    %83 = arith.mulf %71, %82 : vector<16x128xf32>
    %84 = arith.addf %80, %83 : vector<16x128xf32>
    %85 = math.tanh %84 : vector<16x128xf32>
    %86 = arith.subf %28, %85 : vector<16x128xf32>
    %87 = arith.mulf %79, %86 : vector<16x128xf32>
    %88 = arith.addf %85, %87 : vector<16x128xf32>
    %89 = arith.truncf %88 : vector<16x128xf32> to vector<16x128xbf16>
    %c3 = arith.constant 3 : index
    %c0_43 = arith.constant 0 : index
    %c0_44 = arith.constant 0 : index
    %90 = vector.load %arg14[%c3, %c0_43, %c0_44] : memref<4x16x128xbf16, #tpu.memory_space<vmem>>, vector<1x16x128xbf16>
    %91 = vector.shape_cast %90 : vector<1x16x128xbf16> to vector<16x128xbf16>
    %92 = vector.shape_cast %89 : vector<16x128xbf16> to vector<1x16x128xbf16>
    tpu.vector_store %arg14[%c3, %c0_43, %c0_44], %92 {strides = array<i32>} : memref<4x16x128xbf16, #tpu.memory_space<vmem>>, vector<1x16x128xbf16>,
    %c16 = arith.constant 16 : index
    %c0_45 = arith.constant 0 : index
    %93 = vector.load %arg19[%c16, %c0_45] : memref<64x384xf32, #tpu.memory_space<vmem>>, vector<16x384xf32>
    %94 = arith.truncf %56 : vector<16x128xf32> to vector<16x128xbf16>
    %cst_46 = arith.constant dense<0.000000e+00> : vector<16x384xf32>
    %95 = tpu.matmul %94, %19, %cst_46 {dimension_numbers = #tpu.dot_dimension_numbers<[1], [0], [0], [1], [0, 0, 1, 1], [], []>} : vector<16x128xbf16>, vector<128x384xbf16>, vector<16x384xf32> -> vector<16x384xf32>
    %96 = vector.extract_strided_slice %93 {offsets = [0, 0], sizes = [16, 128], strides = [1, 1]} : vector<16x384xf32> to vector<16x128xf32>
    %97 = vector.extract_strided_slice %95 {offsets = [0, 0], sizes = [16, 128], strides = [1, 1]} : vector<16x384xf32> to vector<16x128xf32>
    %98 = arith.addf %96, %97 : vector<16x128xf32>
    %99 = arith.negf %98 : vector<16x128xf32>
    %100 = math.exp %99 : vector<16x128xf32>
    %cst_47 = arith.constant 1.000000e+00 : f32
    %101 = vector.broadcast %cst_47 : f32 to vector<16x128xf32>
    %102 = arith.addf %101, %100 : vector<16x128xf32>
    %103 = arith.divf %101, %102 : vector<16x128xf32>
    %104 = vector.extract_strided_slice %93 {offsets = [0, 128], sizes = [16, 128], strides = [1, 1]} : vector<16x384xf32> to vector<16x128xf32>
    %105 = vector.extract_strided_slice %95 {offsets = [0, 128], sizes = [16, 128], strides = [1, 1]} : vector<16x384xf32> to vector<16x128xf32>
    %106 = arith.addf %104, %105 : vector<16x128xf32>
    %107 = arith.negf %106 : vector<16x128xf32>
    %108 = math.exp %107 : vector<16x128xf32>
    %cst_48 = arith.constant 1.000000e+00 : f32
    %109 = vector.broadcast %cst_48 : f32 to vector<16x128xf32>
    %110 = arith.addf %109, %108 : vector<16x128xf32>
    %111 = arith.divf %109, %110 : vector<16x128xf32>
    %112 = vector.extract_strided_slice %93 {offsets = [0, 256], sizes = [16, 128], strides = [1, 1]} : vector<16x384xf32> to vector<16x128xf32>
    %113 = vector.extract_strided_slice %95 {offsets = [0, 256], sizes = [16, 128], strides = [1, 1]} : vector<16x384xf32> to vector<16x128xf32>
    %114 = arith.addf %113, %23 : vector<16x128xf32>
    %115 = arith.mulf %103, %114 : vector<16x128xf32>
    %116 = arith.addf %112, %115 : vector<16x128xf32>
    %117 = math.tanh %116 : vector<16x128xf32>
    %118 = arith.subf %56, %117 : vector<16x128xf32>
    %119 = arith.mulf %111, %118 : vector<16x128xf32>
    %120 = arith.addf %117, %119 : vector<16x128xf32>
    %121 = arith.truncf %120 : vector<16x128xf32> to vector<16x128xbf16>
    %c1 = arith.constant 1 : index
    %c0_49 = arith.constant 0 : index
    %c0_50 = arith.constant 0 : index
    %122 = vector.load %arg13[%c1, %c0_49, %c0_50] : memref<4x16x128xbf16, #tpu.memory_space<vmem>>, vector<1x16x128xbf16>
    %123 = vector.shape_cast %122 : vector<1x16x128xbf16> to vector<16x128xbf16>
    %124 = vector.shape_cast %121 : vector<16x128xbf16> to vector<1x16x128xbf16>
    tpu.vector_store %arg13[%c1, %c0_49, %c0_50], %124 {strides = array<i32>} : memref<4x16x128xbf16, #tpu.memory_space<vmem>>, vector<1x16x128xbf16>,
    %c32 = arith.constant 32 : index
    %c0_51 = arith.constant 0 : index
    %125 = vector.load %arg20[%c32, %c0_51] : memref<64x384xf32, #tpu.memory_space<vmem>>, vector<16x384xf32>
    %126 = arith.truncf %88 : vector<16x128xf32> to vector<16x128xbf16>
    %cst_52 = arith.constant dense<0.000000e+00> : vector<16x384xf32>
    %127 = tpu.matmul %126, %20, %cst_52 {dimension_numbers = #tpu.dot_dimension_numbers<[1], [0], [0], [1], [0, 0, 1, 1], [], []>} : vector<16x128xbf16>, vector<128x384xbf16>, vector<16x384xf32> -> vector<16x384xf32>
    %128 = vector.extract_strided_slice %125 {offsets = [0, 0], sizes = [16, 128], strides = [1, 1]} : vector<16x384xf32> to vector<16x128xf32>
    %129 = vector.extract_strided_slice %127 {offsets = [0, 0], sizes = [16, 128], strides = [1, 1]} : vector<16x384xf32> to vector<16x128xf32>
    %130 = arith.addf %128, %129 : vector<16x128xf32>
    %131 = arith.negf %130 : vector<16x128xf32>
    %132 = math.exp %131 : vector<16x128xf32>
    %cst_53 = arith.constant 1.000000e+00 : f32
    %133 = vector.broadcast %cst_53 : f32 to vector<16x128xf32>
    %134 = arith.addf %133, %132 : vector<16x128xf32>
    %135 = arith.divf %133, %134 : vector<16x128xf32>
    %136 = vector.extract_strided_slice %125 {offsets = [0, 128], sizes = [16, 128], strides = [1, 1]} : vector<16x384xf32> to vector<16x128xf32>
    %137 = vector.extract_strided_slice %127 {offsets = [0, 128], sizes = [16, 128], strides = [1, 1]} : vector<16x384xf32> to vector<16x128xf32>
    %138 = arith.addf %136, %137 : vector<16x128xf32>
    %139 = arith.negf %138 : vector<16x128xf32>
    %140 = math.exp %139 : vector<16x128xf32>
    %cst_54 = arith.constant 1.000000e+00 : f32
    %141 = vector.broadcast %cst_54 : f32 to vector<16x128xf32>
    %142 = arith.addf %141, %140 : vector<16x128xf32>
    %143 = arith.divf %141, %142 : vector<16x128xf32>
    %144 = vector.extract_strided_slice %125 {offsets = [0, 256], sizes = [16, 128], strides = [1, 1]} : vector<16x384xf32> to vector<16x128xf32>
    %145 = vector.extract_strided_slice %127 {offsets = [0, 256], sizes = [16, 128], strides = [1, 1]} : vector<16x384xf32> to vector<16x128xf32>
    %146 = arith.addf %145, %26 : vector<16x128xf32>
    %147 = arith.mulf %135, %146 : vector<16x128xf32>
    %148 = arith.addf %144, %147 : vector<16x128xf32>
    %149 = math.tanh %148 : vector<16x128xf32>
    %150 = arith.subf %88, %149 : vector<16x128xf32>
    %151 = arith.mulf %143, %150 : vector<16x128xf32>
    %152 = arith.addf %149, %151 : vector<16x128xf32>
    %153 = arith.truncf %152 : vector<16x128xf32> to vector<16x128xbf16>
    %c2 = arith.constant 2 : index
    %c0_55 = arith.constant 0 : index
    %c0_56 = arith.constant 0 : index
    %154 = vector.load %arg14[%c2, %c0_55, %c0_56] : memref<4x16x128xbf16, #tpu.memory_space<vmem>>, vector<1x16x128xbf16>
    %155 = vector.shape_cast %154 : vector<1x16x128xbf16> to vector<16x128xbf16>
    %156 = vector.shape_cast %153 : vector<16x128xbf16> to vector<1x16x128xbf16>
    tpu.vector_store %arg14[%c2, %c0_55, %c0_56], %156 {strides = array<i32>} : memref<4x16x128xbf16, #tpu.memory_space<vmem>>, vector<1x16x128xbf16>,
    %c32_57 = arith.constant 32 : index
    %c0_58 = arith.constant 0 : index
    %157 = vector.load %arg19[%c32_57, %c0_58] : memref<64x384xf32, #tpu.memory_space<vmem>>, vector<16x384xf32>
    %158 = arith.truncf %120 : vector<16x128xf32> to vector<16x128xbf16>
    %cst_59 = arith.constant dense<0.000000e+00> : vector<16x384xf32>
    %159 = tpu.matmul %158, %19, %cst_59 {dimension_numbers = #tpu.dot_dimension_numbers<[1], [0], [0], [1], [0, 0, 1, 1], [], []>} : vector<16x128xbf16>, vector<128x384xbf16>, vector<16x384xf32> -> vector<16x384xf32>
    %160 = vector.extract_strided_slice %157 {offsets = [0, 0], sizes = [16, 128], strides = [1, 1]} : vector<16x384xf32> to vector<16x128xf32>
    %161 = vector.extract_strided_slice %159 {offsets = [0, 0], sizes = [16, 128], strides = [1, 1]} : vector<16x384xf32> to vector<16x128xf32>
    %162 = arith.addf %160, %161 : vector<16x128xf32>
    %163 = arith.negf %162 : vector<16x128xf32>
    %164 = math.exp %163 : vector<16x128xf32>
    %cst_60 = arith.constant 1.000000e+00 : f32
    %165 = vector.broadcast %cst_60 : f32 to vector<16x128xf32>
    %166 = arith.addf %165, %164 : vector<16x128xf32>
    %167 = arith.divf %165, %166 : vector<16x128xf32>
    %168 = vector.extract_strided_slice %157 {offsets = [0, 128], sizes = [16, 128], strides = [1, 1]} : vector<16x384xf32> to vector<16x128xf32>
    %169 = vector.extract_strided_slice %159 {offsets = [0, 128], sizes = [16, 128], strides = [1, 1]} : vector<16x384xf32> to vector<16x128xf32>
    %170 = arith.addf %168, %169 : vector<16x128xf32>
    %171 = arith.negf %170 : vector<16x128xf32>
    %172 = math.exp %171 : vector<16x128xf32>
    %cst_61 = arith.constant 1.000000e+00 : f32
    %173 = vector.broadcast %cst_61 : f32 to vector<16x128xf32>
    %174 = arith.addf %173, %172 : vector<16x128xf32>
    %175 = arith.divf %173, %174 : vector<16x128xf32>
    %176 = vector.extract_strided_slice %157 {offsets = [0, 256], sizes = [16, 128], strides = [1, 1]} : vector<16x384xf32> to vector<16x128xf32>
    %177 = vector.extract_strided_slice %159 {offsets = [0, 256], sizes = [16, 128], strides = [1, 1]} : vector<16x384xf32> to vector<16x128xf32>
    %178 = arith.addf %177, %23 : vector<16x128xf32>
    %179 = arith.mulf %167, %178 : vector<16x128xf32>
    %180 = arith.addf %176, %179 : vector<16x128xf32>
    %181 = math.tanh %180 : vector<16x128xf32>
    %182 = arith.subf %120, %181 : vector<16x128xf32>
    %183 = arith.mulf %175, %182 : vector<16x128xf32>
    %184 = arith.addf %181, %183 : vector<16x128xf32>
    %185 = arith.truncf %184 : vector<16x128xf32> to vector<16x128xbf16>
    %c2_62 = arith.constant 2 : index
    %c0_63 = arith.constant 0 : index
    %c0_64 = arith.constant 0 : index
    %186 = vector.load %arg13[%c2_62, %c0_63, %c0_64] : memref<4x16x128xbf16, #tpu.memory_space<vmem>>, vector<1x16x128xbf16>
    %187 = vector.shape_cast %186 : vector<1x16x128xbf16> to vector<16x128xbf16>
    %188 = vector.shape_cast %185 : vector<16x128xbf16> to vector<1x16x128xbf16>
    tpu.vector_store %arg13[%c2_62, %c0_63, %c0_64], %188 {strides = array<i32>} : memref<4x16x128xbf16, #tpu.memory_space<vmem>>, vector<1x16x128xbf16>,
    %c16_65 = arith.constant 16 : index
    %c0_66 = arith.constant 0 : index
    %189 = vector.load %arg20[%c16_65, %c0_66] : memref<64x384xf32, #tpu.memory_space<vmem>>, vector<16x384xf32>
    %190 = arith.truncf %152 : vector<16x128xf32> to vector<16x128xbf16>
    %cst_67 = arith.constant dense<0.000000e+00> : vector<16x384xf32>
    %191 = tpu.matmul %190, %20, %cst_67 {dimension_numbers = #tpu.dot_dimension_numbers<[1], [0], [0], [1], [0, 0, 1, 1], [], []>} : vector<16x128xbf16>, vector<128x384xbf16>, vector<16x384xf32> -> vector<16x384xf32>
    %192 = vector.extract_strided_slice %189 {offsets = [0, 0], sizes = [16, 128], strides = [1, 1]} : vector<16x384xf32> to vector<16x128xf32>
    %193 = vector.extract_strided_slice %191 {offsets = [0, 0], sizes = [16, 128], strides = [1, 1]} : vector<16x384xf32> to vector<16x128xf32>
    %194 = arith.addf %192, %193 : vector<16x128xf32>
    %195 = arith.negf %194 : vector<16x128xf32>
    %196 = math.exp %195 : vector<16x128xf32>
    %cst_68 = arith.constant 1.000000e+00 : f32
    %197 = vector.broadcast %cst_68 : f32 to vector<16x128xf32>
    %198 = arith.addf %197, %196 : vector<16x128xf32>
    %199 = arith.divf %197, %198 : vector<16x128xf32>
    %200 = vector.extract_strided_slice %189 {offsets = [0, 128], sizes = [16, 128], strides = [1, 1]} : vector<16x384xf32> to vector<16x128xf32>
    %201 = vector.extract_strided_slice %191 {offsets = [0, 128], sizes = [16, 128], strides = [1, 1]} : vector<16x384xf32> to vector<16x128xf32>
    %202 = arith.addf %200, %201 : vector<16x128xf32>
    %203 = arith.negf %202 : vector<16x128xf32>
    %204 = math.exp %203 : vector<16x128xf32>
    %cst_69 = arith.constant 1.000000e+00 : f32
    %205 = vector.broadcast %cst_69 : f32 to vector<16x128xf32>
    %206 = arith.addf %205, %204 : vector<16x128xf32>
    %207 = arith.divf %205, %206 : vector<16x128xf32>
    %208 = vector.extract_strided_slice %189 {offsets = [0, 256], sizes = [16, 128], strides = [1, 1]} : vector<16x384xf32> to vector<16x128xf32>
    %209 = vector.extract_strided_slice %191 {offsets = [0, 256], sizes = [16, 128], strides = [1, 1]} : vector<16x384xf32> to vector<16x128xf32>
    %210 = arith.addf %209, %26 : vector<16x128xf32>
    %211 = arith.mulf %199, %210 : vector<16x128xf32>
    %212 = arith.addf %208, %211 : vector<16x128xf32>
    %213 = math.tanh %212 : vector<16x128xf32>
    %214 = arith.subf %152, %213 : vector<16x128xf32>
    %215 = arith.mulf %207, %214 : vector<16x128xf32>
    %216 = arith.addf %213, %215 : vector<16x128xf32>
    %217 = arith.truncf %216 : vector<16x128xf32> to vector<16x128xbf16>
    %c1_70 = arith.constant 1 : index
    %c0_71 = arith.constant 0 : index
    %c0_72 = arith.constant 0 : index
    %218 = vector.load %arg14[%c1_70, %c0_71, %c0_72] : memref<4x16x128xbf16, #tpu.memory_space<vmem>>, vector<1x16x128xbf16>
    %219 = vector.shape_cast %218 : vector<1x16x128xbf16> to vector<16x128xbf16>
    %220 = vector.shape_cast %217 : vector<16x128xbf16> to vector<1x16x128xbf16>
    tpu.vector_store %arg14[%c1_70, %c0_71, %c0_72], %220 {strides = array<i32>} : memref<4x16x128xbf16, #tpu.memory_space<vmem>>, vector<1x16x128xbf16>,
    %c48_73 = arith.constant 48 : index
    %c0_74 = arith.constant 0 : index
    %221 = vector.load %arg19[%c48_73, %c0_74] : memref<64x384xf32, #tpu.memory_space<vmem>>, vector<16x384xf32>
    %222 = arith.truncf %184 : vector<16x128xf32> to vector<16x128xbf16>
    %cst_75 = arith.constant dense<0.000000e+00> : vector<16x384xf32>
    %223 = tpu.matmul %222, %19, %cst_75 {dimension_numbers = #tpu.dot_dimension_numbers<[1], [0], [0], [1], [0, 0, 1, 1], [], []>} : vector<16x128xbf16>, vector<128x384xbf16>, vector<16x384xf32> -> vector<16x384xf32>
    %224 = vector.extract_strided_slice %221 {offsets = [0, 0], sizes = [16, 128], strides = [1, 1]} : vector<16x384xf32> to vector<16x128xf32>
    %225 = vector.extract_strided_slice %223 {offsets = [0, 0], sizes = [16, 128], strides = [1, 1]} : vector<16x384xf32> to vector<16x128xf32>
    %226 = arith.addf %224, %225 : vector<16x128xf32>
    %227 = arith.negf %226 : vector<16x128xf32>
    %228 = math.exp %227 : vector<16x128xf32>
    %cst_76 = arith.constant 1.000000e+00 : f32
    %229 = vector.broadcast %cst_76 : f32 to vector<16x128xf32>
    %230 = arith.addf %229, %228 : vector<16x128xf32>
    %231 = arith.divf %229, %230 : vector<16x128xf32>
    %232 = vector.extract_strided_slice %221 {offsets = [0, 128], sizes = [16, 128], strides = [1, 1]} : vector<16x384xf32> to vector<16x128xf32>
    %233 = vector.extract_strided_slice %223 {offsets = [0, 128], sizes = [16, 128], strides = [1, 1]} : vector<16x384xf32> to vector<16x128xf32>
    %234 = arith.addf %232, %233 : vector<16x128xf32>
    %235 = arith.negf %234 : vector<16x128xf32>
    %236 = math.exp %235 : vector<16x128xf32>
    %cst_77 = arith.constant 1.000000e+00 : f32
    %237 = vector.broadcast %cst_77 : f32 to vector<16x128xf32>
    %238 = arith.addf %237, %236 : vector<16x128xf32>
    %239 = arith.divf %237, %238 : vector<16x128xf32>
    %240 = vector.extract_strided_slice %221 {offsets = [0, 256], sizes = [16, 128], strides = [1, 1]} : vector<16x384xf32> to vector<16x128xf32>
    %241 = vector.extract_strided_slice %223 {offsets = [0, 256], sizes = [16, 128], strides = [1, 1]} : vector<16x384xf32> to vector<16x128xf32>
    %242 = arith.addf %241, %23 : vector<16x128xf32>
    %243 = arith.mulf %231, %242 : vector<16x128xf32>
    %244 = arith.addf %240, %243 : vector<16x128xf32>
    %245 = math.tanh %244 : vector<16x128xf32>
    %246 = arith.subf %184, %245 : vector<16x128xf32>
    %247 = arith.mulf %239, %246 : vector<16x128xf32>
    %248 = arith.addf %245, %247 : vector<16x128xf32>
    %249 = arith.truncf %248 : vector<16x128xf32> to vector<16x128xbf16>
    %c3_78 = arith.constant 3 : index
    %c0_79 = arith.constant 0 : index
    %c0_80 = arith.constant 0 : index
    %250 = vector.load %arg13[%c3_78, %c0_79, %c0_80] : memref<4x16x128xbf16, #tpu.memory_space<vmem>>, vector<1x16x128xbf16>
    %251 = vector.shape_cast %250 : vector<1x16x128xbf16> to vector<16x128xbf16>
    %252 = vector.shape_cast %249 : vector<16x128xbf16> to vector<1x16x128xbf16>
    tpu.vector_store %arg13[%c3_78, %c0_79, %c0_80], %252 {strides = array<i32>} : memref<4x16x128xbf16, #tpu.memory_space<vmem>>, vector<1x16x128xbf16>,
    %c0_81 = arith.constant 0 : index
    %c0_82 = arith.constant 0 : index
    %253 = vector.load %arg20[%c0_81, %c0_82] : memref<64x384xf32, #tpu.memory_space<vmem>>, vector<16x384xf32>
    %254 = arith.truncf %216 : vector<16x128xf32> to vector<16x128xbf16>
    %cst_83 = arith.constant dense<0.000000e+00> : vector<16x384xf32>
    %255 = tpu.matmul %254, %20, %cst_83 {dimension_numbers = #tpu.dot_dimension_numbers<[1], [0], [0], [1], [0, 0, 1, 1], [], []>} : vector<16x128xbf16>, vector<128x384xbf16>, vector<16x384xf32> -> vector<16x384xf32>
    %256 = vector.extract_strided_slice %253 {offsets = [0, 0], sizes = [16, 128], strides = [1, 1]} : vector<16x384xf32> to vector<16x128xf32>
    %257 = vector.extract_strided_slice %255 {offsets = [0, 0], sizes = [16, 128], strides = [1, 1]} : vector<16x384xf32> to vector<16x128xf32>
    %258 = arith.addf %256, %257 : vector<16x128xf32>
    %259 = arith.negf %258 : vector<16x128xf32>
    %260 = math.exp %259 : vector<16x128xf32>
    %cst_84 = arith.constant 1.000000e+00 : f32
    %261 = vector.broadcast %cst_84 : f32 to vector<16x128xf32>
    %262 = arith.addf %261, %260 : vector<16x128xf32>
    %263 = arith.divf %261, %262 : vector<16x128xf32>
    %264 = vector.extract_strided_slice %253 {offsets = [0, 128], sizes = [16, 128], strides = [1, 1]} : vector<16x384xf32> to vector<16x128xf32>
    %265 = vector.extract_strided_slice %255 {offsets = [0, 128], sizes = [16, 128], strides = [1, 1]} : vector<16x384xf32> to vector<16x128xf32>
    %266 = arith.addf %264, %265 : vector<16x128xf32>
    %267 = arith.negf %266 : vector<16x128xf32>
    %268 = math.exp %267 : vector<16x128xf32>
    %cst_85 = arith.constant 1.000000e+00 : f32
    %269 = vector.broadcast %cst_85 : f32 to vector<16x128xf32>
    %270 = arith.addf %269, %268 : vector<16x128xf32>
    %271 = arith.divf %269, %270 : vector<16x128xf32>
    %272 = vector.extract_strided_slice %253 {offsets = [0, 256], sizes = [16, 128], strides = [1, 1]} : vector<16x384xf32> to vector<16x128xf32>
    %273 = vector.extract_strided_slice %255 {offsets = [0, 256], sizes = [16, 128], strides = [1, 1]} : vector<16x384xf32> to vector<16x128xf32>
    %274 = arith.addf %273, %26 : vector<16x128xf32>
    %275 = arith.mulf %263, %274 : vector<16x128xf32>
    %276 = arith.addf %272, %275 : vector<16x128xf32>
    %277 = math.tanh %276 : vector<16x128xf32>
    %278 = arith.subf %216, %277 : vector<16x128xf32>
    %279 = arith.mulf %271, %278 : vector<16x128xf32>
    %280 = arith.addf %277, %279 : vector<16x128xf32>
    %281 = arith.truncf %280 : vector<16x128xf32> to vector<16x128xbf16>
    %c0_86 = arith.constant 0 : index
    %c0_87 = arith.constant 0 : index
    %c0_88 = arith.constant 0 : index
    %282 = vector.load %arg14[%c0_86, %c0_87, %c0_88] : memref<4x16x128xbf16, #tpu.memory_space<vmem>>, vector<1x16x128xbf16>
    %283 = vector.shape_cast %282 : vector<1x16x128xbf16> to vector<16x128xbf16>
    %284 = vector.shape_cast %281 : vector<16x128xbf16> to vector<1x16x128xbf16>
    tpu.vector_store %arg14[%c0_86, %c0_87, %c0_88], %284 {strides = array<i32>} : memref<4x16x128xbf16, #tpu.memory_space<vmem>>, vector<1x16x128xbf16>,
    %c0_89 = arith.constant 0 : index
    %c0_90 = arith.constant 0 : index
    %285 = vector.load %arg17[%c0_89, %c0_90] : memref<16x128xf32, #tpu.memory_space<vmem>>, vector<16x128xf32>
    tpu.vector_store %arg17[%c0_89, %c0_90], %248 {strides = array<i32>} : memref<16x128xf32, #tpu.memory_space<vmem>>, vector<16x128xf32>,
    %c0_91 = arith.constant 0 : index
    %c0_92 = arith.constant 0 : index
    %286 = vector.load %arg18[%c0_91, %c0_92] : memref<16x128xf32, #tpu.memory_space<vmem>>, vector<16x128xf32>
    tpu.vector_store %arg18[%c0_91, %c0_92], %280 {strides = array<i32>} : memref<16x128xf32, #tpu.memory_space<vmem>>, vector<16x128xf32>,
    %c1_i32 = arith.constant 1 : i32
    %287 = arith.cmpi eq, %arg0, %c1_i32 : i32
    %288 = arith.extui %287 : i1 to i32
    %c0_i32_93 = arith.constant 0 : i32
    %289 = arith.cmpi ne, %288, %c0_i32_93 : i32
    scf.if %289 {
      %c0_94 = arith.constant 0 : index
      %c0_95 = arith.constant 0 : index
      %290 = vector.load %arg15[%c0_94, %c0_95] : memref<16x128xf32, #tpu.memory_space<vmem>>, vector<16x128xf32>
      tpu.vector_store %arg15[%c0_94, %c0_95], %248 {strides = array<i32>} : memref<16x128xf32, #tpu.memory_space<vmem>>, vector<16x128xf32>,
      %c0_96 = arith.constant 0 : index
      %c0_97 = arith.constant 0 : index
      %291 = vector.load %arg16[%c0_96, %c0_97] : memref<16x128xf32, #tpu.memory_space<vmem>>, vector<16x128xf32>
      tpu.vector_store %arg16[%c0_96, %c0_97], %280 {strides = array<i32>} : memref<16x128xf32, #tpu.memory_space<vmem>>, vector<16x128xf32>,
    } else {
    }
    return
  }
  func.func @transform_0(%arg0: i32) -> (i32, i32, i32) {
    %c0_i32 = arith.constant 0 : i32
    %c0_i32_0 = arith.constant 0 : i32
    %c0_i32_1 = arith.constant 0 : i32
    return %arg0, %c0_i32, %c0_i32_0 : i32, i32, i32
  }
  func.func @transform_1(%arg0: i32) -> (i32, i32, i32) {
    %c1_i32 = arith.constant 1 : i32
    %0 = arith.subi %c1_i32, %arg0 : i32
    %c0_i32 = arith.constant 0 : i32
    %c0_i32_0 = arith.constant 0 : i32
    %c0_i32_1 = arith.constant 0 : i32
    return %0, %c0_i32, %c0_i32_0 : i32, i32, i32
  }
  func.func @transform_2(%arg0: i32) -> (i32, i32) {
    %c0_i32 = arith.constant 0 : i32
    %c0_i32_0 = arith.constant 0 : i32
    %c0_i32_1 = arith.constant 0 : i32
    return %c0_i32, %c0_i32_0 : i32, i32
  }
  func.func @transform_3(%arg0: i32) -> (i32, i32) {
    %c0_i32 = arith.constant 0 : i32
    %c0_i32_0 = arith.constant 0 : i32
    %c0_i32_1 = arith.constant 0 : i32
    return %c0_i32, %c0_i32_0 : i32, i32
  }
  func.func @transform_4(%arg0: i32) -> (i32, i32) {
    %c0_i32 = arith.constant 0 : i32
    %c0_i32_0 = arith.constant 0 : i32
    %c0_i32_1 = arith.constant 0 : i32
    return %c0_i32, %c0_i32_0 : i32, i32
  }
  func.func @transform_5(%arg0: i32) -> (i32, i32) {
    %c0_i32 = arith.constant 0 : i32
    %c0_i32_0 = arith.constant 0 : i32
    %c0_i32_1 = arith.constant 0 : i32
    return %c0_i32, %c0_i32_0 : i32, i32
  }
  func.func @transform_6(%arg0: i32) -> (i32, i32) {
    %c0_i32 = arith.constant 0 : i32
    %c0_i32_0 = arith.constant 0 : i32
    %c0_i32_1 = arith.constant 0 : i32
    return %c0_i32, %c0_i32_0 : i32, i32
  }
  func.func @transform_7(%arg0: i32) -> (i32, i32) {
    %c0_i32 = arith.constant 0 : i32
    %c0_i32_0 = arith.constant 0 : i32
    %c0_i32_1 = arith.constant 0 : i32
    return %c0_i32, %c0_i32_0 : i32, i32
  }
  func.func @transform_8(%arg0: i32) -> (i32, i32) {
    %c0_i32 = arith.constant 0 : i32
    %c0_i32_0 = arith.constant 0 : i32
    %c0_i32_1 = arith.constant 0 : i32
    return %c0_i32, %c0_i32_0 : i32, i32
  }
  func.func @transform_9(%arg0: i32) -> (i32, i32) {
    %c0_i32 = arith.constant 0 : i32
    %c0_i32_0 = arith.constant 0 : i32
    %c0_i32_1 = arith.constant 0 : i32
    return %c0_i32, %c0_i32_0 : i32, i32
  }
  func.func @transform_10(%arg0: i32) -> (i32, i32) {
    %c0_i32 = arith.constant 0 : i32
    %c0_i32_0 = arith.constant 0 : i32
    %c0_i32_1 = arith.constant 0 : i32
    return %c0_i32, %c0_i32_0 : i32, i32
  }
  func.func @transform_11(%arg0: i32) -> (i32, i32) {
    %c0_i32 = arith.constant 0 : i32
    %c0_i32_0 = arith.constant 0 : i32
    %c0_i32_1 = arith.constant 0 : i32
    return %c0_i32, %c0_i32_0 : i32, i32
  }
  func.func @transform_12(%arg0: i32) -> (i32, i32, i32) {
    %c0_i32 = arith.constant 0 : i32
    %c0_i32_0 = arith.constant 0 : i32
    %c0_i32_1 = arith.constant 0 : i32
    return %arg0, %c0_i32, %c0_i32_0 : i32, i32, i32
  }
  func.func @transform_13(%arg0: i32) -> (i32, i32, i32) {
    %c1_i32 = arith.constant 1 : i32
    %0 = arith.subi %c1_i32, %arg0 : i32
    %c0_i32 = arith.constant 0 : i32
    %c0_i32_0 = arith.constant 0 : i32
    %c0_i32_1 = arith.constant 0 : i32
    return %0, %c0_i32, %c0_i32_0 : i32, i32, i32
  }
  func.func @transform_14(%arg0: i32) -> (i32, i32) {
    %c0_i32 = arith.constant 0 : i32
    %c0_i32_0 = arith.constant 0 : i32
    %c0_i32_1 = arith.constant 0 : i32
    return %c0_i32, %c0_i32_0 : i32, i32
  }
  func.func @transform_15(%arg0: i32) -> (i32, i32) {
    %c0_i32 = arith.constant 0 : i32
    %c0_i32_0 = arith.constant 0 : i32
    %c0_i32_1 = arith.constant 0 : i32
    return %c0_i32, %c0_i32_0 : i32, i32
  }
}

</mosaic_0001>

<bundles_post_ra>
// kernel: tpu_custom_call.1
= control target key start
LH: loop header
LB: loop body
LE: loop exit
PB: predicated region body
PF: predicated region fallthrough
CT: control target
= control target key end

     0   :  { %s5470_s0 = inlined_call_operand.hbm [shape: bf16[8,16,16], index: 0, kind: input, shape index: {}]   ;;  %s5471_s1 = inlined_call_operand.hbm [shape: bf16[8,16,16], index: 1, kind: input, shape index: {}]   ;;  %s5472_s2 = inlined_call_operand.hbm [shape: f32[16,128], index: 2, kind: input, shape index: {}]   ;;  %s5473_s3 = inlined_call_operand.hbm [shape: f32[16,128], index: 3, kind: input, shape index: {}]   ;;  %s5474_s4 = inlined_call_operand.hbm [shape: bf16[16,384], index: 4, kind: input, shape index: {}]   ;;  %s5475_s5 = inlined_call_operand.hbm [shape: bf16[16,384], index: 5, kind: input, shape index: {}]   ;;  %s5476_s6 = inlined_call_operand.hbm [shape: bf16[128,384], index: 6, kind: input, shape index: {}]   ;;  %s5477_s7 = inlined_call_operand.hbm [shape: bf16[128,384], index: 7, kind: input, shape index: {}]   ;;  %s5478_s8 = inlined_call_operand.vmem [shape: f32[1,384], index: 8, kind: input, shape index: {}]   ;;  %s5479_s9 = inlined_call_operand.vmem [shape: f32[1,384], index: 9, kind: input, shape index: {}]   ;;  %s5480_s10 = inlined_call_operand.vmem [shape: f32[1,128], index: 10, kind: input, shape index: {}]   ;;  %s5481_s11 = inlined_call_operand.vmem [shape: f32[1,128], index: 11, kind: input, shape index: {}]   ;;  %s5482_s12 = inlined_call_operand.hbm [shape: bf16[8,16,128], index: 12, kind: output, shape index: {0}]   ;;  %s5483_s13 = inlined_call_operand.hbm [shape: bf16[8,16,128], index: 13, kind: output, shape index: {1}]   ;;  %s5484_s14 = inlined_call_operand.hbm [shape: f32[16,128], index: 14, kind: output, shape index: {2}]   ;;  %s5485_s15 = inlined_call_operand.hbm [shape: f32[16,128], index: 15, kind: output, shape index: {3}]  }
   0x1   :  { %5528 = sst [smem:[#allocation92_spill]] %s5470_s0 }
   0x2   :  { %5529 = sst [smem:[#allocation93_spill]] %s5471_s1 }
   0x3   :  { %5530 = sst [smem:[#allocation94_spill]] %s5472_s2 }
   0x4   :  { %5531 = sst [smem:[#allocation95_spill]] %s5473_s3 }
   0x5   :  { %5532 = sst [smem:[#allocation96_spill]] %s5474_s4 }
   0x6   :  { %5533 = sst [smem:[#allocation97_spill]] %s5475_s5 }
   0x7   :  { %5534 = sst [smem:[#allocation98_spill]] %s5476_s6 }
   0x8   :  { %5535 = sst [smem:[#allocation99_spill]] %s5477_s7 }
   0x9   :  { %5536 = sst [smem:[#allocation100_spill]] %s5478_s8 }
   0xa   :  { %5537 = sst [smem:[#allocation101_spill]] %s5479_s9 }
   0xb   :  { %5538 = sst [smem:[#allocation102_spill]] %s5480_s10 }
   0xc   :  { %5539 = sst [smem:[#allocation103_spill]] %s5481_s11 }
   0xd   :  { %5540 = sst [smem:[#allocation104_spill]] %s5482_s12 }
   0xe   :  { %5541 = sst [smem:[#allocation105_spill]] %s5483_s13 }
   0xf   :  { %5542 = sst [smem:[#allocation106_spill]] %s5484_s14 }
  0x10   :  { %5543 = sst [smem:[#allocation107_spill]] %s5485_s15 }
  0x11   :  { %21 = vsyncpa [#allocation7], 0 }
  0x12   :  { %23 = vsyncpa [#allocation7 + $0x1], 0 }
  0x13   :  { %24 = vsyncpa [#allocation10], 0 }
  0x14   :  { %26 = vsyncpa [#allocation10 + $0x1], 0 }
  0x15   :  { %27 = vsyncpa [#allocation13], 0 }
  0x16   :  { %28 = vsyncpa [#allocation16], 0 }
  0x17   :  { %29 = vsyncpa [#allocation19], 0 }
  0x18   :  { %30 = vsyncpa [#allocation8], 0 }
  0x19   :  { %32 = vsyncpa [#allocation8 + $0x1], 0 }
  0x1a   :  { %33 = vsyncpa [#allocation22], 0 }
  0x1b   :  { %35 = vsyncpa [#allocation22 + $0x1], 0 }
  0x1c   :  { %36 = vsyncpa [#allocation25], 0  ;;  %s4232_s18 = smov 0   ;;  %s4234_s19 = smov 0  }
  0x1d   :  { %s4236_s20 = smov 0   ;;  %s4238_s21 = smov 0  }
  0x1e   :  { %s4240_s22 = smov 0   ;;  %s4242_s23 = smov 0  }
  0x1f   :  { %s4244_s24 = smov 0  }
  0x20 LB: > { %5544 = sst [smem:[#allocation36_spill]] %s4128_s23  ;;  %s4271_s28 = sadd.s32 4294967295, %s4132_s24   ;;  %s4132_s24 = sphi %s4244_s24, %s5722_s24   ;;  %s4128_s23 = sphi %s4242_s23, %s5716_s23   ;;  %s4124_s22 = sphi %s4240_s22, %s5721_s22   ;;  %s4120_s21 = sphi %s4238_s21, %s5720_s21   ;;  %s4116_s20 = sphi %s4236_s20, %s5719_s20   ;;  %s4112_s19 = sphi %s4234_s19, %s5718_s19   ;;  %s4108_s18 = sphi %s4232_s18, %s5717_s18  }
  0x21   : > { %s5545_s2 = sld [smem:[#allocation94_spill]]  ;;  %p2882_p0 = scmp.ge.s32.totalorder %s4132_s24, 1 }
  0x22   : > { %p5494_p1 = scmp.eq.s32.totalorder %s4271_s28, 0  ;;  %p407_p2 = scmp.lt.s32.totalorder %s4132_s24, 3 }
  0x23   : > { %s4134_s30 = smov [#allocation11]   ;;  %s5548_s3 = sld [smem:[#allocation95_spill]] }
  0x24   : > { %p4277_p4 = pnand %p2882_p0, %p407_p2  ;;  %s420_s16 = sshll.u32 %s4134_s30, 4  ;;  %s421_s16 = int_to_ptr.vmem [resolvable:$true] %s420_s16 }
  0x25   : > { %s4135_s15 = smov [#allocation12]   ;;  %s4136_s30 = smov 128  }
  0x26   : > { %s5546_s29 = scalar_select %p4277_p4, 1, 0 }
  0x27   : > { %s418_s27 = sshll.u32 %s5545_s2, 4  ;;  %p3397_p5 = pneg %p4277_p4  ;;  %s419_s27 = int_to_ptr.hbm [resolvable:$true] %s418_s27 }
  0x28   : > { %5547 = sst [smem:[#allocation37_spill]] %s5546_s29  ;;  %s434_s14 = sshll.u32 %s4135_s15, 4  ;;  %s435_s14 = int_to_ptr.vmem [resolvable:$true] %s434_s14 }
  0x29   : > { %s432_s26 = sshll.u32 %s5548_s3, 4  ;;  %p4289_p7 = pnand %p3397_p5, %p5494_p1  ;;  %s433_s26 = int_to_ptr.hbm [resolvable:$true] %s432_s26 }
  0x2a   : > { %s4137_s12 = smov 8   ;;  %s5550_s5 = sld [smem:[#allocation97_spill]] }
  0x2b   : > { %3400 = dma.hbm_to_vmem [thread:$0]  (!%p4289_p7), %s419_s27, 256, %s421_s16, [#allocation10], %s4136_s30, %s4136_s30, %s4137_s12  }
  0x2c   : > { %3403 = dma.hbm_to_vmem [thread:$0]  (!%p4289_p7), %s433_s26, 256, %s435_s14, [#allocation13], %s4136_s30, %s4136_s30, %s4137_s12  }
  0x2d   : > { %s4138_s13 = smov [#allocation15]   ;;  %s5551_s4 = sld [smem:[#allocation96_spill]] }
  0x2e   : > { %s462_s11 = sshll.u32 %s4138_s13, 4  ;;  %s4139_s9 = smov 192   ;;  %s463_s11 = int_to_ptr.vmem [resolvable:$true] %s462_s11 }
  0x2f   : > { %s4140_s29 = smov 12   ;;  %s4141_s12 = smov [#allocation14]  }
  0x30   : > { %s460_s3 = sshll.u32 %s5550_s5, 4  ;;  %s448_s14 = sshll.u32 %s4141_s12, 4  ;;  %s461_s3 = int_to_ptr.hbm [resolvable:$true] %s460_s3  ;;  %s449_s14 = int_to_ptr.vmem [resolvable:$true] %s448_s14 }
  0x31   : > { %3409 = dma.hbm_to_vmem [thread:$0]  (!%p4289_p7), %s461_s3, 384, %s463_s11, [#allocation16], %s4139_s9, %s4139_s9, %s4140_s29  }
  0x32   : > { %s5552_s6 = sld [smem:[#allocation98_spill]]  ;;  %s4142_s11 = smov [#allocation17]  }
  0x33   : > { %s446_s15 = sshll.u32 %s5551_s4, 4  ;;  %s5553_s7 = sld [smem:[#allocation99_spill]]  ;;  %s447_s15 = int_to_ptr.hbm [resolvable:$true] %s446_s15 }
  0x34   : > { %3406 = dma.hbm_to_vmem [thread:$0]  (!%p4289_p7), %s447_s15, 384, %s449_s14, [#allocation13], %s4139_s9, %s4139_s9, %s4140_s29  }
  0x35   : > { %s476_s26 = sshll.u32 %s4142_s11, 4  ;;  %s4143_s30 = smov [#allocation18]   ;;  %s477_s26 = int_to_ptr.vmem [resolvable:$true] %s476_s26 }
  0x36   : > { %s490_s17 = sshll.u32 %s4143_s30, 4  ;;  %s5491_s25 = sadd.s32 4294967294, %s4132_s24   ;;  %s491_s17 = int_to_ptr.vmem [resolvable:$true] %s490_s17 }
  0x37   : > { %p56_p8 = scmp.ne.s32.totalorder %s4128_s23, %s4124_s22  ;;  %p5495_p9 = scmp.eq.s32.totalorder %s4132_s24, 0 }
  0x38   : > { %s474_s13 = sshll.u32 %s5552_s6, 4  ;;  %p62_p10 = scmp.ne.s32.totalorder %s4124_s22, %s4120_s21  ;;  %s475_s13 = int_to_ptr.hbm [resolvable:$true] %s474_s13 }
  0x39   : > { %s488_s10 = sshll.u32 %s5553_s7, 4  ;;  %p5492_p11 = scmp.eq.s32.totalorder %s4271_s28, 1  ;;  %s489_s10 = int_to_ptr.hbm [resolvable:$true] %s488_s10 }
  0x3a   : > { %3412 = dma.hbm_to_vmem [thread:$0]  (!%p4289_p7), %s475_s13, 3072, %s477_s26, [#allocation16], %s4139_s9, %s4139_s9, %s4140_s29  }
  0x3b   : > { %3415 = dma.hbm_to_vmem [thread:$0]  (!%p4289_p7), %s489_s10, 3072, %s491_s17, [#allocation19], %s4139_s9, %s4139_s9, %s4140_s29  }
  0x3c   : > { %p4327_p12 = por %p5495_p9, %p56_p8  ;;  %p4333_p13 = scmp.eq.s32.totalorder %s5491_s25, 1 }
  0x3d   : > { %p4339_p0 = por %p5494_p1, %p62_p10  ;;  %p4345_p2 = por %p5492_p11, %p56_p8 }
  0x3e   : > { %p4351_p5 = por %p4333_p13, %p62_p10  ;;  %p5493_p7 = scmp.lt.s32.totalorder %s4132_s24, 2 }
  0x3f   : > { %s516_s27 = sand.u32 1, %s4128_s23   ;;  %s3242_s16 = sshll.u32 %s4132_s24, 5 }
  0x40   : > { %s5558_s29 = scalar_select %p4351_p5, 1, 0 }
  0x41   : > { %s2890_s13 = sshll.u32 %s516_s27, 5  ;;  %s5559_s0 = sld [smem:[#allocation92_spill]] }
  0x42   : > { %s520_s26 = scalar_lea.vmem [#allocation6], %s2890_s13  ;;  %p4365_p8 = pnand %p5493_p7, %p4327_p12 }
  0x43   : > { %s529_s30 = sshll.u32 %s520_s26, 4  ;;  %s517_s25 = scalar_lea.sflag [#allocation7], %s516_s27  ;;  %s530_s30 = int_to_ptr.vmem [resolvable:$true] %s529_s30 }
  0x44   : > { %p3870_p6 = pneg %p4365_p8 }
  0x47   : > { %s526_s10 = scalar_lea.hbm %s5559_s0, %s3242_s16  ;;  %s3873_s3 = scalar_lea.hbm %s5559_s0, 64 }
  0x48   : > { %s527_s11 = sshll.u32 %s526_s10, 4  ;;  %s528_s11 = int_to_ptr.hbm [resolvable:$true] %s527_s11 }
  0x49   : > { %s3866_s15 = sshra.s32 %s528_s11, 4  ;;  %s3867_s15 = int_to_ptr.hbm [resolvable:$true] %s3866_s15 }
  0x4a   : > { %s3868_s4 = scalar_lea.hbm %s3867_s15, 32  ;;  %p3874_p12 = scmp.lt.s32.totalorder %s3867_s15, %s5559_s0 }
  0x4b   : > { %p3869_p10 = scmp.ne.s32.totalorder %s3867_s15, %s3868_s4  ;;  %p3875_p7 = scmp.lt.s32.totalorder %s3873_s3, %s3868_s4 }
  0x4d   : > { %p3871_p3 = pnand %p3870_p6, %p3869_p10  ;;  %p3876_p1 = por %p3875_p7, %p3874_p12 }
  0x4f   : > { %p3872_p11 = pneg %p3871_p3 }
  0x51   : > { %p3877_p9 = pnand %p3876_p1, %p3872_p11 }
  0x53   : > { %3880 = shalt.err (!%p3877_p9)
}
  0x54   : > { %s5496_s27 = smov 64   ;;  %s5497_s15 = smov 4  }
  0x55   : > { %3419 = dma.hbm_to_vmem [thread:$0]  (!%p4365_p8), %s528_s11, 512, %s530_s30, %s517_s25, %s5496_s27, %s5496_s27, %s5497_s15  }
  0x56   : > { %s4383_s4 = sadd.s32 1, %s4132_s24   ;;  %s72_s10 = ssub.s32 1, %s4132_s24 }
  0x57   : > { %s46_s26 = ssub.s32 %s4132_s24, %s4383_s4  ;;  %s73_s16 = ssub.s32 1, %s4383_s4 }
  0x58   : > { %p47_p1 = scmp.eq.s32.totalorder %s46_s26, 0  ;;  %s74_s13 = ssub.s32 %s72_s10, %s73_s16 }
  0x59   : > { %p75_p3 = scmp.eq.s32.totalorder %s74_s13, 0  ;;  %s77_s3 = sadd.s32 1, %s4116_s20 }
  0x5a   : > { %s5561_s17 = sadd.s32 1, %s4128_s23  ;;  %p84_p6 = scmp.ne.s32.totalorder %s4116_s20, %s4112_s19 }
  0x5b   : > { %s4393_s12 = scalar_select %p47_p1, %s4128_s23, %s5561_s17  }
  0x5c   : > { %s4396_s8 = scalar_select %p75_p3, %s4116_s20, %s77_s3  }
  0x5d   : > { %5562 = sst [smem:[#allocation38_spill]] %s4393_s12  ;;  %p90_p9 = scmp.ne.s32.totalorder %s4112_s19, %s4108_s18 }
  0x5e   : > { %s539_s25 = sand.u32 1, %s4132_s24   ;;  %s541_s11 = sand.u32 1, %s4116_s20  }
  0x5f   : > { %p5563_p11 = scmp.eq.s32.totalorder %s4132_s24, 0  ;;  %p5564_p8 = scmp.eq.s32.totalorder %s4271_s28, 0 }
  0x60   : > { %p5566_p12 = scmp.eq.s32.totalorder %s4271_s28, 1  ;;  %p4420_p1 = por %p4333_p13, %p90_p9 }
  0x61   : > { %p86_p7 = por %p84_p6, %p5563_p11  ;;  %p4408_p10 = por %p90_p9, %p5564_p8 }
  0x62   : > { %p4414_p5 = por %p5566_p12, %p84_p6  ;;  %s2894_s18 = sshll.u32 %s541_s11, 5 }
  0x63   : > { %s5568_s16 = scalar_select %p4420_p1, 1, 0 }
  0x64   : > { %s3244_s13 = sshll.u32 %s72_s10, 5  ;;  %s5569_s1 = sld [smem:[#allocation93_spill]] }
  0x65   : > { %s543_s15 = scalar_lea.vmem [#allocation9], %s2894_s18  ;;  %p5570_p3 = scmp.lt.s32.totalorder %s4132_s24, 2 }
  0x66   : > { %s553_s0 = sshll.u32 %s543_s15, 4  ;;  %s540_s14 = scalar_lea.sflag [#allocation10], %s539_s25  ;;  %s554_s0 = int_to_ptr.vmem [resolvable:$true] %s553_s0 }
  0x67   : > { %p4429_p6 = pnand %p5570_p3, %p86_p7 }
  0x69   : > { %p3900_p9 = pneg %p4429_p6 }
  0x6a   : > { %s550_s27 = scalar_lea.hbm %s5569_s1, %s3244_s13 }
  0x6b   : > { %s551_s5 = sshll.u32 %s550_s27, 4  ;;  %s3903_s27 = scalar_lea.hbm %s5569_s1, 64  ;;  %s552_s5 = int_to_ptr.hbm [resolvable:$true] %s551_s5 }
  0x6c   : > { %s3896_s7 = sshra.s32 %s552_s5, 4  ;;  %s3897_s7 = int_to_ptr.hbm [resolvable:$true] %s3896_s7 }
  0x6d   : > { %s3898_s11 = scalar_lea.hbm %s3897_s7, 32  ;;  %p3904_p7 = scmp.lt.s32.totalorder %s3897_s7, %s5569_s1 }
  0x6e   : > { %p3899_p13 = scmp.ne.s32.totalorder %s3897_s7, %s3898_s11  ;;  %p3905_p12 = scmp.lt.s32.totalorder %s3903_s27, %s3898_s11 }
  0x70   : > { %p3901_p11 = pnand %p3900_p9, %p3899_p13  ;;  %p3906_p3 = por %p3905_p12, %p3904_p7 }
  0x72   : > { %p3902_p8 = pneg %p3901_p11 }
  0x74   : > { %p3907_p1 = pnand %p3906_p3, %p3902_p8 }
  0x76   : > { %3910 = shalt.err (!%p3907_p1)
}
  0x77   : > { %s5572_s25 = smov 4   ;;  %s5573_s3 = smov 64  }
  0x78   : > { %3422 = dma.hbm_to_vmem [thread:$0]  (!%p4429_p6), %s552_s5, 512, %s554_s0, %s540_s14, %s5573_s3, %s5573_s3, %s5572_s25  }
  0x79   : > { %565 = sbr.rel (%p4277_p4) target bundleno = 1095 (0x447), region = 68 }
  0x7e   : > { %s4449_s10 = sand.u32 1, %s4124_s22  }
  0x7f   : > { %s2899_s7 = sshll.u32 %s4449_s10, 5  ;;  %s568_s11 = scalar_lea.sflag [#allocation7], %s4449_s10 }
  0x80   : > { %s4453_s15 = scalar_lea.vmem [#allocation6], %s2899_s7 }
  0x81   : > { %4067 = dma.done.wait (%p4339_p0), %s568_s11, 512  }
  0x82   : > { %4069 = vsyncadd (%p4339_p0), %s568_s11, 4294966784  ;;  %s577_s0 = sand.u32 1, %s4271_s28   ;;  %s579_s5 = sand.u32 1, %s4112_s19  }
  0x83   : > { %s2900_s6 = sshll.u32 %s579_s5, 5  ;;  %s578_s14 = scalar_lea.sflag [#allocation10], %s577_s0 }
  0x84   : > { %s4463_s27 = scalar_lea.vmem [#allocation9], %s2900_s6 }
  0x85   : > { %4071 = dma.done.wait (%p4408_p10), %s578_s14, 512  }
  0x86   : > { %4073 = vsyncadd (%p4408_p10), %s578_s14, 4294966784  ;;  %p5575_p4 = scmp.eq.s32.totalorder %s4271_s28, 0 }
  0x88   : > { %4075 = dma.done.wait (%p5575_p4), [#allocation10], 256   ;;  %p5576_p0 = pmov %p5575_p4 }
  0x8a   : > { %4077 = vsyncadd (%p5576_p0), [#allocation10], 4294967040  ;;  %p5577_p1 = pmov %p5576_p0 }
  0x8b   : > { %p5578_p6 = pmov %p5576_p0 }
  0x8c   : > { %4079 = dma.done.wait (%p5577_p1), [#allocation13], 640  }
  0x8d   : > { %4081 = vsyncadd (%p5578_p6), [#allocation13], 4294966656  ;;  %p5579_p13 = pmov %p5576_p0 }
  0x8e   : > { %p5580_p9 = pmov %p5576_p0 }
  0x8f   : > { %4083 = dma.done.wait (%p5579_p13), [#allocation16], 3456  }
  0x90   : > { %4085 = vsyncadd (%p5580_p9), [#allocation16], 4294963840  ;;  %p5581_p10 = pmov %p5576_p0 }
  0x91   : > { %p5582_p11 = pmov %p5576_p0 }
  0x92   : > { %4087 = dma.done.wait (%p5581_p10), [#allocation19], 3072  }
  0x93   : > { %4089 = vsyncadd (%p5582_p11), [#allocation19], 4294964224  ;;  %s4485_s2 = scalar_lea.vmem [#allocation20], %s2899_s7  ;;  %s4487_s30 = scalar_lea.vmem [#allocation21], %s2900_s6 }
  0x94   : > { %p5583_p8 = scmp.ne.s32.totalorder %s4271_s28, 0 }
  0x96   : > { %679 = sbr.rel (%p5583_p8) target bundleno = 160 (0xa0), region = 104 }
  0x9b   : > { %v680_v0 = vld [vmem:[#allocation11] sm:$0xff]  ;;  %v681_v1 = vld [vmem:[#allocation11 + $0x8] sm:$0xff]  ;;  %v684_v2 = vld [vmem:[#allocation12] sm:$0xff] }
  0x9c   : > { %682 = vst [vmem:[#allocation2] sm:$0xff] %v680_v0  ;;  %v685_v3 = vld [vmem:[#allocation12 + $0x8] sm:$0xff] }
  0x9d   : > { %683 = vst [vmem:[#allocation2 + $0x8] sm:$0xff] %v681_v1 }
  0x9e   : > { %686 = vst [vmem:[#allocation3 + $0x8] sm:$0xff] %v684_v2 }
  0x9f   : > { %687 = vst [vmem:[#allocation3] sm:$0xff] %v685_v3 }
  0xa0 PF: > { %v2928_v4 = vld [vmem:[#allocation14] sm:$0xf]  ;;  %v3254_v5 = vld [vmem:[#allocation14 + $0x8] sm:$0xf0]  ;;  %v3253_v6 = vld [vmem:[#allocation14 + $0x4] sm:$0xf] }
  0xa1   : > { %v2929_v7 = vor.u32 %v3254_v5, %v2928_v4  ;;  %v2930_v8 = vld [vmem:[#allocation14 + $0xc] sm:$0xf0]  ;;  %v2936_v9 = vld [vmem:[#allocation14 + $0x8] sm:$0xf]  ;;  %v3255_v10 = vld [vmem:[#allocation14 + $0x10] sm:$0xf0] }
  0xa2   : > { %v2933_v11 = vor.u32 %v3253_v6, %v2930_v8  ;;  %v2937_v12 = vor.u32 %v3255_v10, %v2936_v9  ;;  %v2968_v13 = vld [vmem:[#allocation15] sm:$0xf]  ;;  %v3257_v14 = vld [vmem:[#allocation15 + $0x8] sm:$0xf0]  ;;  %vm752_vm0 = vcmask 130048   ;;  %v3246_v47 = vld [vmem:[%s4453_s15 + $0x8] sm:$0xff] }
  0xa3   : > { %v3245_v15 = vld [vmem:[%s4453_s15] sm:$0xff]  ;;  %772 = vmatpush.bf16.msra.mxu0 %v2929_v7  ;;  %v2969_v16 = vor.u32 %v3257_v14, %v2968_v13  ;;  %v3256_v17 = vld [vmem:[#allocation15 + $0x4] sm:$0xf]  ;;  %v2970_v18 = vld [vmem:[#allocation15 + $0xc] sm:$0xf0]  ;;  %s5604_s25 = sld [smem:[#allocation101_spill]] }
  0xa4   : > { %801 = vmatpush.bf16.msra.mxu1 %v2933_v11  ;;  %830 = vmatpush.bf16.msra.mxu2 %v2937_v12  ;;  %v4493_v19 = vld [vmem:[%s4463_s27] sm:$0xff]  ;;  %v2973_v20 = vor.u32 %v3256_v17, %v2970_v18  ;;  %v3258_v22 = vld [vmem:[#allocation15 + $0x10] sm:$0xf0]  ;;  %v3280_v24 = vld [vmem:[#allocation17 + $0xac] sm:$0xf]  ;;  %s5606_s7 = sld [smem:[#allocation100_spill]] }
  0xa5   : > { %v2976_v21 = vld [vmem:[#allocation15 + $0x8] sm:$0xf]  ;;  %943 = vmatpush.bf16.msra.mxu3 %v2969_v16  ;;  %v3078_v25 = vld [vmem:[#allocation17 + $0xb4] sm:$0xf0]  ;;  %v3277_v27 = vld [vmem:[#allocation17 + $0x94] sm:$0xf] }
  0xa6   : > { %v2977_v23 = vor.u32 %v3258_v22, %v2976_v21  ;;  %2938 = vmatmul.msk.bf16.vlgmr.msra.gmra.mxu0 %vm752_vm0, %v3245_v15  ;;  %v4496_v26 = vor.u32 %v3280_v24, %v3078_v25  ;;  %v3066_v28 = vld [vmem:[#allocation17 + $0x9c] sm:$0xf0]  ;;  %v3076_v29 = vld [vmem:[#allocation17 + $0xa8] sm:$0xf]  ;;  %v3281_v30 = vld [vmem:[#allocation17 + $0xb0] sm:$0xf0] }
  0xa7   : > { %2942 = vmatmul.msk.bf16.vlgmr.msra.gmra.mxu1 %vm752_vm0, %v3245_v15  ;;  %2946 = vmatmul.msk.bf16.vlgmr.msra.gmra.mxu2 %vm752_vm0, %v3245_v15  ;;  %v4503_v31 = vor.u32 %v3277_v27, %v3066_v28  ;;  %v4505_v32 = vor.u32 %v3281_v30, %v3076_v29  ;;  %v3064_v33 = vld [vmem:[#allocation17 + $0x90] sm:$0xf]  ;;  %v3278_v34 = vld [vmem:[#allocation17 + $0x98] sm:$0xf0]  ;;  %v3054_v36 = vld [vmem:[#allocation17 + $0x84] sm:$0xf0] }
  0xa8   : > { %2978 = vmatmul.msk.bf16.vlgmr.msra.gmra.mxu3 %vm752_vm0, %v4493_v19  ;;  %972 = vmatpush.bf16.msrb.mxu0 %v2973_v20  ;;  %v3274_v35 = vld [vmem:[#allocation17 + $0x7c] sm:$0xf]  ;;  %v4508_v37 = vor.u32 %v3278_v34, %v3064_v33  ;;  %v3052_v38 = vld [vmem:[#allocation17 + $0x78] sm:$0xf]  ;;  %v3275_v39 = vld [vmem:[#allocation17 + $0x80] sm:$0xf0] }
  0xa9   : > { %1001 = vmatpush.bf16.msrb.mxu1 %v2977_v23  ;;  %1272 = vmatpush.bf16.msrb.mxu3 %v4496_v26  ;;  %5584 = vst [vmem:[#allocation39_spill] sm:$0xff] %v4503_v31  ;;  %v4511_v40 = vor.u32 %v3274_v35, %v3054_v36  ;;  %v3271_v41 = vld [vmem:[#allocation17 + $0x64] sm:$0xf]  ;;  %v3042_v42 = vld [vmem:[#allocation17 + $0x6c] sm:$0xf0]  ;;  %v4514_v43 = vor.u32 %v3275_v39, %v3052_v38  ;;  %v4522_v50 = vld [vmem:[%s4463_s27 + $0x8] sm:$0xff] }
  0xaa   : > { %1258 = vmatpush.bf16.msrb.mxu2 %v4505_v32  ;;  %5585 = vst [vmem:[#allocation40_spill] sm:$0xff] %v4508_v37  ;;  %v4517_v44 = vor.u32 %v3271_v41, %v3042_v42  ;;  %v3040_v45 = vld [vmem:[#allocation17 + $0x60] sm:$0xf]  ;;  %v3272_v46 = vld [vmem:[#allocation17 + $0x68] sm:$0xf0]  ;;  %s5638_s5 = sld [smem:[#allocation102_spill]] }
  0xab   : > { %5586 = vst [vmem:[#allocation41_spill] sm:$0xff] %v4511_v40  ;;  %v3268_v48 = vld [vmem:[#allocation17 + $0x4c] sm:$0xf]  ;;  %v3030_v49 = vld [vmem:[#allocation17 + $0x54] sm:$0xf0]  ;;  %v4524_v51 = vor.u32 %v3272_v46, %v3040_v45  ;;  %v3247_v11 = vld [vmem:[%s4453_s15 + $0x10] sm:$0xff] }
  0xac   : > { %5587 = vst [vmem:[#allocation42_spill] sm:$0xff] %v4514_v43  ;;  %v4527_v52 = vor.u32 %v3268_v48, %v3030_v49  ;;  %v3028_v53 = vld [vmem:[#allocation17 + $0x48] sm:$0xf]  ;;  %v3269_v54 = vld [vmem:[#allocation17 + $0x50] sm:$0xf0]  ;;  %v4556_v17 = vld [vmem:[%s4463_s27 + $0x10] sm:$0xff] }
  0xad   : > { %1273 = vmatpush.bf16.msrb.mxu3 %v4503_v31  ;;  %5588 = vst [vmem:[#allocation43_spill] sm:$0xff] %v4517_v44  ;;  %v3265_v55 = vld [vmem:[#allocation17 + $0x34] sm:$0xf]  ;;  %v3018_v56 = vld [vmem:[#allocation17 + $0x3c] sm:$0xf0]  ;;  %v4535_v57 = vor.u32 %v3269_v54, %v3028_v53  ;;  %p3226_p7 = scmp.ne.s32.totalorder %s4271_s28, 1 }
  0xae   : > { %1259 = vmatpush.bf16.msrb.mxu2 %v4508_v37  ;;  %5589 = vst [vmem:[#allocation44_spill] sm:$0xff] %v4524_v51  ;;  %v4538_v58 = vor.u32 %v3265_v55, %v3018_v56  ;;  %v3016_v59 = vld [vmem:[#allocation17 + $0x30] sm:$0xf]  ;;  %v3266_v60 = vld [vmem:[#allocation17 + $0x38] sm:$0xf0] }
  0xaf   : > { %5590 = vst [vmem:[#allocation45_spill] sm:$0xff] %v4527_v52  ;;  %v3262_v61 = vld [vmem:[#allocation17 + $0x1c] sm:$0xf]  ;;  %v3006_v62 = vld [vmem:[#allocation17 + $0x24] sm:$0xf0]  ;;  %v4541_v63 = vor.u32 %v3266_v60, %v3016_v59 }
  0xb0   : > { %5591 = vst [vmem:[#allocation46_spill] sm:$0xff] %v4535_v57  ;;  %v4544_v0 = vor.u32 %v3262_v61, %v3006_v62  ;;  %v3004_v1 = vld [vmem:[#allocation17 + $0x18] sm:$0xf]  ;;  %v3263_v2 = vld [vmem:[#allocation17 + $0x20] sm:$0xf0]  ;;  %v3248_v60 = vld [vmem:[%s4453_s15 + $0x18] sm:$0xff] }
  0xb1   : > { %1274 = vmatpush.bf16.msrb.mxu3 %v4511_v40  ;;  %5592 = vst [vmem:[#allocation47_spill] sm:$0xff] %v4538_v58  ;;  %v3259_v3 = vld [vmem:[#allocation17 + $0x4] sm:$0xf]  ;;  %v2994_v4 = vld [vmem:[#allocation17 + $0xc] sm:$0xf0]  ;;  %v4547_v7 = vor.u32 %v3263_v2, %v3004_v1 }
  0xb2   : > { %1260 = vmatpush.bf16.msrb.mxu2 %v4514_v43  ;;  %5593 = vst [vmem:[#allocation48_spill] sm:$0xff] %v4541_v63  ;;  %v3176_v5 = vld [vmem:[#allocation18 + $0xa8] sm:$0xf]  ;;  %v3305_v6 = vld [vmem:[#allocation18 + $0xb0] sm:$0xf0]  ;;  %v4550_v8 = vor.u32 %v3259_v3, %v2994_v4 }
  0xb3   : > { %5594 = vst [vmem:[#allocation49_spill] sm:$0xff] %v4544_v0  ;;  %v2992_v9 = vld [vmem:[#allocation17] sm:$0xf]  ;;  %v3260_v10 = vld [vmem:[#allocation17 + $0x8] sm:$0xf0]  ;;  %v4553_v12 = vor.u32 %v3305_v6, %v3176_v5 }
  0xb4   : > { %5595 = vst [vmem:[#allocation50_spill] sm:$0xff] %v4547_v7  ;;  %v3084_v13 = vld [vmem:[#allocation17 + $0xb0] sm:$0xf]  ;;  %v3282_v14 = vld [vmem:[#allocation17 + $0xb8] sm:$0xf0]  ;;  %v4559_v18 = vor.u32 %v3260_v10, %v2992_v9  ;;  %v4602_v4 = vld [vmem:[%s4463_s27 + $0x18] sm:$0xff] }
  0xb5   : > { %1275 = vmatpush.bf16.msrb.mxu3 %v4517_v44  ;;  %5596 = vst [vmem:[#allocation51_spill] sm:$0xff] %v4550_v8  ;;  %v3164_v15 = vld [vmem:[#allocation18 + $0x90] sm:$0xf]  ;;  %v3302_v16 = vld [vmem:[#allocation18 + $0x98] sm:$0xf0]  ;;  %v4562_v20 = vor.u32 %v3282_v14, %v3084_v13  ;;  %s5642_s27 = sld [smem:[#allocation103_spill]] }
  0xb6   : > { %2939 = vmatmul.msk.bf16.gmra.mxu0 %vm752_vm0, %v3246_v47  ;;  %1261 = vmatpush.bf16.msrb.mxu2 %v4524_v51  ;;  %5597 = vst [vmem:[#allocation52_spill] sm:$0xff] %v4559_v18  ;;  %v4566_v21 = vor.u32 %v3302_v16, %v3164_v15  ;;  %v3072_v22 = vld [vmem:[#allocation17 + $0x98] sm:$0xf]  ;;  %v3279_v23 = vld [vmem:[#allocation17 + $0xa0] sm:$0xf0] }
  0xb7   : > { %2943 = vmatmul.msk.bf16.gmra.mxu1 %vm752_vm0, %v3246_v47  ;;  %2947 = vmatmul.msk.bf16.gmra.mxu2 %vm752_vm0, %v3246_v47  ;;  %v3152_v24 = vld [vmem:[#allocation18 + $0x78] sm:$0xf]  ;;  %v3299_v25 = vld [vmem:[#allocation18 + $0x80] sm:$0xf0]  ;;  %v3304_v27 = vld [vmem:[#allocation18 + $0xac] sm:$0xf]  ;;  %v4576_v30 = vor.u32 %v3279_v23, %v3072_v22 }
  0xb8   : > { %2979 = vmatmul.msk.bf16.gmra.mxu3 %vm752_vm0, %v4522_v50  ;;  %v3178_v28 = vld [vmem:[#allocation18 + $0xb4] sm:$0xf0]  ;;  %v3060_v33 = vld [vmem:[#allocation17 + $0x80] sm:$0xf]  ;;  %v4579_v34 = vor.u32 %v3299_v25, %v3152_v24  ;;  %v3276_v35 = vld [vmem:[#allocation17 + $0x88] sm:$0xf0] }
  0xb9   : > { %1276 = vmatpush.bf16.msrb.mxu3 %v4527_v52  ;;  %v4574_v29 = vor.u32 %v3304_v27, %v3178_v28  ;;  %v3301_v36 = vld [vmem:[#allocation18 + $0x94] sm:$0xf]  ;;  %v3166_v38 = vld [vmem:[#allocation18 + $0x9c] sm:$0xf0]  ;;  %v3296_v41 = vld [vmem:[#allocation18 + $0x68] sm:$0xf0]  ;;  %v4585_v45 = vor.u32 %v3276_v35, %v3060_v33 }
  0xba   : > { %1262 = vmatpush.bf16.msrb.mxu2 %v4535_v57  ;;  %v3140_v39 = vld [vmem:[#allocation18 + $0x60] sm:$0xf]  ;;  %v4582_v42 = vor.u32 %v3301_v36, %v3166_v38  ;;  %v3184_v46 = vld [vmem:[#allocation18 + $0xb0] sm:$0xf]  ;;  %v3306_v47 = vld [vmem:[#allocation18 + $0xb8] sm:$0xf0] }
  0xbb   : > { %1547 = vmatpush.bf16.msra.mxu0 %v4574_v29  ;;  %v4588_v48 = vor.u32 %v3296_v41, %v3140_v39  ;;  %v3048_v49 = vld [vmem:[#allocation17 + $0x68] sm:$0xf]  ;;  %v3273_v53 = vld [vmem:[#allocation17 + $0x70] sm:$0xf0]  ;;  %v4590_v54 = vor.u32 %v3306_v47, %v3184_v46  ;;  %v3036_v62 = vld [vmem:[#allocation17 + $0x50] sm:$0xf] }
  0xbc   : > { %v3128_v55 = vld [vmem:[#allocation18 + $0x48] sm:$0xf]  ;;  %v3293_v56 = vld [vmem:[#allocation18 + $0x50] sm:$0xf0]  ;;  %v4595_v59 = vor.u32 %v3273_v53, %v3048_v49  ;;  %v3270_v1 = vld [vmem:[#allocation17 + $0x58] sm:$0xf0] }
  0xbd   : > { %1277 = vmatpush.bf16.msrb.mxu3 %v4538_v58  ;;  %1561 = vmatpush.bf16.msra.mxu1 %v4590_v54  ;;  %v4599_v61 = vor.u32 %v3293_v56, %v3128_v55  ;;  %v3116_v2 = vld [vmem:[#allocation18 + $0x30] sm:$0xf]  ;;  %v3290_v3 = vld [vmem:[#allocation18 + $0x38] sm:$0xf0]  ;;  %v4605_v5 = vor.u32 %v3270_v1, %v3036_v62  ;;  %v3024_v9 = vld [vmem:[#allocation17 + $0x38] sm:$0xf] }
  0xbe   : > { %1263 = vmatpush.bf16.msrb.mxu2 %v4541_v63  ;;  %v4609_v6 = vor.u32 %v3290_v3, %v3116_v2  ;;  %v3267_v10 = vld [vmem:[#allocation17 + $0x40] sm:$0xf0]  ;;  %v3298_v14 = vld [vmem:[#allocation18 + $0x7c] sm:$0xf]  ;;  %v3154_v15 = vld [vmem:[#allocation18 + $0x84] sm:$0xf0] }
  0xbf   : > { %1548 = vmatpush.bf16.msra.mxu0 %v4582_v42  ;;  %v3287_v13 = vld [vmem:[#allocation18 + $0x20] sm:$0xf0]  ;;  %v3092_v16 = vld [vmem:[#allocation18] sm:$0xf]  ;;  %v4616_v22 = vor.u32 %v3298_v14, %v3154_v15  ;;  %v4618_v23 = vor.u32 %v3267_v10, %v3024_v9  ;;  %v3172_v25 = vld [vmem:[#allocation18 + $0x98] sm:$0xf] }
  0xc0   : > { %v3012_v24 = vld [vmem:[#allocation17 + $0x20] sm:$0xf]  ;;  %v3303_v27 = vld [vmem:[#allocation18 + $0xa0] sm:$0xf0]  ;;  %v3264_v33 = vld [vmem:[#allocation17 + $0x28] sm:$0xf0] }
  0xc1   : > { %1278 = vmatpush.bf16.msrb.mxu3 %v4544_v0  ;;  %v4623_v35 = vor.u32 %v3303_v27, %v3172_v25  ;;  %v3295_v36 = vld [vmem:[#allocation18 + $0x64] sm:$0xf]  ;;  %v3142_v38 = vld [vmem:[#allocation18 + $0x6c] sm:$0xf0]  ;;  %v3284_v39 = vld [vmem:[#allocation18 + $0x8] sm:$0xf0]  ;;  %v4632_v53 = vor.u32 %v3264_v33, %v3012_v24 }
  0xc2   : > { %1264 = vmatpush.bf16.msrb.mxu2 %v4547_v7  ;;  %v4626_v41 = vor.u32 %v3295_v36, %v3142_v38  ;;  %v3160_v46 = vld [vmem:[#allocation18 + $0x80] sm:$0xf]  ;;  %v3300_v47 = vld [vmem:[#allocation18 + $0x88] sm:$0xf0]  ;;  %v4635_v55 = vor.u32 %v3284_v39, %v3092_v16  ;;  %v3000_v56 = vld [vmem:[#allocation17 + $0x8] sm:$0xf] }
  0xc3   : > { %1549 = vmatpush.bf16.msra.mxu0 %v4616_v22  ;;  %1562 = vmatpush.bf16.msra.mxu1 %v4623_v35  ;;  %v4629_v49 = vor.u32 %v3300_v47, %v3160_v46  ;;  %v4638_v62 = vld [vmem:[#allocation2] sm:$0xff]  ;;  %v4640_v1 = vld [vmem:[#allocation2 + $0x8] sm:$0xff]  ;;  %v3292_v9 = vld [vmem:[#allocation18 + $0x4c] sm:$0xf] }
  0xc4   : > { %v1129_v3 = vpack.c.bf16 %v4640_v1, %v4638_v62  ;;  %v3130_v10 = vld [vmem:[#allocation18 + $0x54] sm:$0xf0]  ;;  %v3297_v14 = vld [vmem:[#allocation18 + $0x70] sm:$0xf0]  ;;  %v3118_v16 = vld [vmem:[#allocation18 + $0x3c] sm:$0xf0] }
  0xc5   : > { %1279 = vmatpush.bf16.msrb.mxu3 %v4550_v8  ;;  %5598 = vst [vmem:[#allocation53_spill] sm:$0xff] %v4629_v49  ;;  %v3289_v15 = vld [vmem:[#allocation18 + $0x34] sm:$0xf]  ;;  %v3136_v25 = vld [vmem:[#allocation18 + $0x50] sm:$0xf]  ;;  %v4671_v36 = vld [vmem:[#allocation3 + $0x8] sm:$0xff] }
  0xc6   : > { %2940 = vmatmul.msk.bf16.gmra.mxu0 %vm752_vm0, %v3247_v11  ;;  %1265 = vmatpush.bf16.msrb.mxu2 %v4559_v18  ;;  %v3294_v27 = vld [vmem:[#allocation18 + $0x58] sm:$0xf0]  ;;  %v4673_v38 = vld [vmem:[#allocation3] sm:$0xff]  ;;  %v3106_v47 = vld [vmem:[#allocation18 + $0x24] sm:$0xf0] }
  0xc7   : > { %2944 = vmatmul.msk.bf16.gmra.mxu1 %vm752_vm0, %v3247_v11  ;;  %2948 = vmatmul.msk.bf16.gmra.mxu2 %vm752_vm0, %v3247_v11  ;;  %v3104_v11 = vld [vmem:[#allocation18 + $0x18] sm:$0xf]  ;;  %v4664_v33 = vor.u32 %v3294_v27, %v3136_v25  ;;  %v4678_v39 = vpack.c.bf16 %v4673_v38, %v4671_v36  ;;  %v3286_v46 = vld [vmem:[#allocation18 + $0x1c] sm:$0xf]  ;;  %v3100_v25 = vld [vmem:[#allocation18 + $0x8] sm:$0xf] }
  0xc8   : > { %2980 = vmatmul.msk.bf16.gmra.mxu3 %vm752_vm0, %v4556_v17  ;;  %v4621_v28 = vor.u32 %v3287_v13, %v3104_v11  ;;  %1550 = vmatpush.bf16.msra.mxu0 %v4626_v41  ;;  %v3148_v11 = vld [vmem:[#allocation18 + $0x68] sm:$0xf]  ;;  %v4654_v13 = vor.u32 %v3292_v9, %v3130_v10  ;;  %v3291_v9 = vld [vmem:[#allocation18 + $0x40] sm:$0xf0]  ;;  %v3285_v27 = vld [vmem:[#allocation18 + $0x10] sm:$0xf0] }
  0xc9   : > { %1533 = vmatpush.bf16.msra.mxu3 %v4553_v12  ;;  %1563 = vmatpush.bf16.msra.mxu1 %v4629_v49  ;;  %v4657_v24 = vor.u32 %v3297_v14, %v3148_v11  ;;  %5600 = vst [vmem:[#allocation55_spill] sm:$0xff] %v4664_v33  ;;  %v3283_v10 = vld [vmem:[#allocation18 + $0x4] sm:$0xf]  ;;  %v3094_v11 = vld [vmem:[#allocation18 + $0xc] sm:$0xf0] }
  0xca   : > { %1286 = vmatpush.bf16.msra.mxu2 %v4562_v20 }
  0xcb   : > { %5599 = vst [vmem:[#allocation54_spill] sm:$0xff] %v4657_v24 }
  0xcc   : > { %1551 = vmatpush.bf16.msra.mxu0 %v4654_v13 }
  0xcd   : > { %1534 = vmatpush.bf16.msra.mxu3 %v4566_v21  ;;  %1564 = vmatpush.bf16.msra.mxu1 %v4657_v24 }
  0xce   : > { %1287 = vmatpush.bf16.msra.mxu2 %v4576_v30 }
  0xd1   : > { %1535 = vmatpush.bf16.msra.mxu3 %v4579_v34  ;;  %1565 = vmatpush.bf16.msra.mxu1 %v4664_v33 }
  0xd2   : > { %1288 = vmatpush.bf16.msra.mxu2 %v4585_v45 }
  0xd5   : > { %1536 = vmatpush.bf16.msra.mxu3 %v4588_v48 }
  0xd6   : > { %1289 = vmatpush.bf16.msra.mxu2 %v4595_v59  ;;  %2941 = vmatmul.msk.bf16.gmra.mxu0 %vm752_vm0, %v3248_v60 }
  0xd7   : > { %2945 = vmatmul.msk.bf16.gmra.mxu1 %vm752_vm0, %v3248_v60  ;;  %2949 = vmatmul.msk.bf16.gmra.mxu2 %vm752_vm0, %v3248_v60  ;;  %v3261_v60 = vld [vmem:[#allocation17 + $0x10] sm:$0xf0] }
  0xd8   : > { %2981 = vmatmul.msk.bf16.gmra.mxu3 %vm752_vm0, %v4602_v4  ;;  %v4644_v2 = vor.u32 %v3261_v60, %v3000_v56  ;;  %v3124_v56 = vld [vmem:[#allocation18 + $0x38] sm:$0xf]  ;;  %v4687_v60 = vor.u32 %v3286_v46, %v3106_v47  ;;  %v4706_v46 = vor.u32 %v3285_v27, %v3100_v25  ;;  %v4757_v47 = vld [vmem:[%s5604_s25] sm:$0x7] }
  0xd9   : > { %1537 = vmatpush.bf16.msra.mxu3 %v4599_v61  ;;  %v4690_v14 = vor.u32 %v3291_v9, %v3124_v56  ;;  %v4763_v56 = vperm.slane %v4757_v47, 0 }
  0xda   : > { %1290 = vmatpush.bf16.msra.mxu2 %v4605_v5  ;;  %5603 = vst [vmem:[#allocation58_spill] sm:$0xff] %v4706_v46 }
  0xdb   : > { %5601 = vst [vmem:[#allocation56_spill] sm:$0xff] %v4690_v14  ;;  %1566 = vmatpush.bf16.msra.mxu1 %v4690_v14 }
  0xdd   : > { %1538 = vmatpush.bf16.msra.mxu3 %v4609_v6 }
  0xde   : > { %1291 = vmatpush.bf16.msra.mxu2 %v4618_v23 }
  0xe1   : > { %1539 = vmatpush.bf16.msra.mxu3 %v4621_v28 }
  0xe2   : > { %1292 = vmatpush.bf16.msra.mxu2 %v4632_v53 }
  0xe5   : > { %1540 = vmatpush.bf16.msra.mxu3 %v4635_v55 }
  0xe6   : > { %1293 = vmatpush.bf16.msra.mxu2 %v4644_v2  ;;  %2982 = vmatmul.msk.bf16.vlgmr.msrb.gmra.mxu0 %vm752_vm0, %v4493_v19 }
  0xe7   : > { %2986 = vmatmul.msk.bf16.vlgmr.msrb.gmra.mxu1 %vm752_vm0, %v4493_v19  ;;  %1266 = vmatmul.bf16.vlgmr.msrb.gmra.mxu2 %v1129_v3  ;;  %v4661_v19 = vor.u32 %v3289_v15, %v3118_v16  ;;  %v3112_v15 = vld [vmem:[#allocation18 + $0x20] sm:$0xf]  ;;  %v3288_v16 = vld [vmem:[#allocation18 + $0x28] sm:$0xf0] }
  0xe8   : > { %1280 = vmatmul.bf16.vlgmr.msrb.gmra.mxu3 %v1129_v3 }
  0xe9   : > { %1700 = vmatpush.bf16.msrb.mxu3 %v4496_v26  ;;  %1552 = vmatpush.bf16.msra.mxu0 %v4661_v19 }
  0xea   : > { %1686 = vmatpush.bf16.msrb.mxu2 %v4505_v32 }
  0xed   : > { %1701 = vmatpush.bf16.msrb.mxu3 %v4503_v31  ;;  %1553 = vmatpush.bf16.msra.mxu0 %v4687_v60 }
  0xee   : > { %1687 = vmatpush.bf16.msrb.mxu2 %v4508_v37 }
  0xf1   : > { %1702 = vmatpush.bf16.msrb.mxu3 %v4511_v40 }
  0xf2   : > { %1688 = vmatpush.bf16.msrb.mxu2 %v4514_v43 }
  0xf5   : > { %1703 = vmatpush.bf16.msrb.mxu3 %v4517_v44 }
  0xf6   : > { %1689 = vmatpush.bf16.msrb.mxu2 %v4524_v51  ;;  %2983 = vmatmul.msk.bf16.gmra.mxu0 %vm752_vm0, %v4522_v50 }
  0xf7   : > { %2987 = vmatmul.msk.bf16.gmra.mxu1 %vm752_vm0, %v4522_v50  ;;  %1294 = vmatmul.bf16.vlgmr.msra.gmra.mxu2 %v1129_v3  ;;  %v4694_v50 = vor.u32 %v3283_v10, %v3094_v11  ;;  %v4697_v3 = vor.u32 %v3288_v16, %v3112_v15 }
  0xf8   : > { %1541 = vmatmul.bf16.vlgmr.msra.gmra.mxu3 %v4678_v39 }
  0xf9   : > { %1704 = vmatpush.bf16.msrb.mxu3 %v4527_v52  ;;  %5602 = vst [vmem:[#allocation57_spill] sm:$0xff] %v4697_v3  ;;  %1554 = vmatpush.bf16.msra.mxu0 %v4694_v50 }
  0xfa   : > { %1690 = vmatpush.bf16.msrb.mxu2 %v4535_v57  ;;  %1567 = vmatpush.bf16.msra.mxu1 %v4697_v3 }
  0xfd   : > { %1705 = vmatpush.bf16.msrb.mxu3 %v4538_v58  ;;  %1714 = vmatpush.bf16.msrb.mxu0 %v4562_v20 }
  0xfe   : > { %1691 = vmatpush.bf16.msrb.mxu2 %v4541_v63  ;;  %1568 = vmatpush.bf16.msra.mxu1 %v4706_v46 }
 0x101   : > { %1706 = vmatpush.bf16.msrb.mxu3 %v4544_v0  ;;  %1715 = vmatpush.bf16.msrb.mxu0 %v4576_v30 }
 0x102   : > { %1692 = vmatpush.bf16.msrb.mxu2 %v4547_v7  ;;  %1839 = vmatpush.bf16.msrb.mxu1 %v4553_v12 }
 0x105   : > { %1707 = vmatpush.bf16.msrb.mxu3 %v4550_v8  ;;  %1716 = vmatpush.bf16.msrb.mxu0 %v4585_v45 }
 0x106   : > { %1693 = vmatpush.bf16.msrb.mxu2 %v4559_v18  ;;  %2984 = vmatmul.msk.bf16.gmra.mxu0 %vm752_vm0, %v4556_v17 }
 0x107   : > { %2988 = vmatmul.msk.bf16.gmra.mxu1 %vm752_vm0, %v4556_v17 }
 0x108   : > { %1840 = vmatpush.bf16.msrb.mxu1 %v4566_v21 }
 0x109   : > { %1867 = vmatpush.bf16.msra.mxu3 %v4590_v54  ;;  %1717 = vmatpush.bf16.msrb.mxu0 %v4595_v59 }
 0x10a   : > { %1853 = vmatpush.bf16.msra.mxu2 %v4574_v29 }
 0x10c   : > { %1841 = vmatpush.bf16.msrb.mxu1 %v4579_v34 }
 0x10d   : > { %1868 = vmatpush.bf16.msra.mxu3 %v4623_v35  ;;  %1718 = vmatpush.bf16.msrb.mxu0 %v4605_v5 }
 0x10e   : > { %1854 = vmatpush.bf16.msra.mxu2 %v4582_v42 }
 0x110   : > { %1842 = vmatpush.bf16.msrb.mxu1 %v4588_v48 }
 0x111   : > { %1869 = vmatpush.bf16.msra.mxu3 %v4629_v49  ;;  %1719 = vmatpush.bf16.msrb.mxu0 %v4618_v23 }
 0x112   : > { %1855 = vmatpush.bf16.msra.mxu2 %v4616_v22 }
 0x114   : > { %1843 = vmatpush.bf16.msrb.mxu1 %v4599_v61 }
 0x115   : > { %1870 = vmatpush.bf16.msra.mxu3 %v4657_v24  ;;  %1720 = vmatpush.bf16.msrb.mxu0 %v4632_v53 }
 0x116   : > { %1856 = vmatpush.bf16.msra.mxu2 %v4626_v41  ;;  %2985 = vmatmul.msk.bf16.gmra.mxu0 %vm752_vm0, %v4602_v4 }
 0x117   : > { %2989 = vmatmul.msk.bf16.gmra.mxu1 %vm752_vm0, %v4602_v4 }
 0x118   : > { %1844 = vmatpush.bf16.msrb.mxu1 %v4609_v6 }
 0x119   : > { %1871 = vmatpush.bf16.msra.mxu3 %v4664_v33  ;;  %1721 = vmatpush.bf16.msrb.mxu0 %v4644_v2 }
 0x11a   : > { %1857 = vmatpush.bf16.msra.mxu2 %v4654_v13 }
 0x11c   : > { %1845 = vmatpush.bf16.msrb.mxu1 %v4621_v28 }
 0x11d   : > { %1872 = vmatpush.bf16.msra.mxu3 %v4690_v14 }
 0x11e   : > { %1858 = vmatpush.bf16.msra.mxu2 %v4661_v19 }
 0x120   : > { %1846 = vmatpush.bf16.msrb.mxu1 %v4635_v55 }
 0x121   : > { %1873 = vmatpush.bf16.msra.mxu3 %v4697_v3 }
 0x122   : > { %1859 = vmatpush.bf16.msra.mxu2 %v4687_v60 }
 0x123   : > { %v4748_v17 = vpop.f32.mrf.mxu0 }
 0x124   : > { %v4750_v4 = vpop.f32.mrf.mxu1 }
 0x125   : > { %1874 = vmatpush.bf16.msra.mxu3 %v4706_v46 }
 0x126   : > { %1860 = vmatpush.bf16.msra.mxu2 %v4694_v50  ;;  %1555 = vmatmul.bf16.vlgmr.msra.gmra.mxu0 %v4678_v39 }
 0x127   : > { %1569 = vmatmul.bf16.vlgmr.msra.gmra.mxu1 %v4678_v39  ;;  %1992 = vmatpush.bf16.msra.mxu0 %v4505_v32  ;;  %v708_v39 = vld [vmem:[%s5606_s7] sm:$0x7] }
 0x128   : > { %2006 = vmatpush.bf16.msra.mxu1 %v4496_v26  ;;  %v4782_v25 = vperm.slane %v708_v39, 0  ;;  %v4786_v46 = vperm.slane %v708_v39, 1 }
 0x12a   : > { %v4766_v9 = vpop.f32.mrf.mxu2 }
 0x12b   : > { %v945_v10 = vpop.f32.mrf.mxu3  ;;  %v4768_v11 = vpop.f32.mrf.mxu0  ;;  %1993 = vmatpush.bf16.msra.mxu0 %v4508_v37 }
 0x12c   : > { %v4772_v15 = vadd.f32 %v945_v10, %v4763_v56  ;;  %v4774_v16 = vpop.f32.mrf.mxu1  ;;  %2007 = vmatpush.bf16.msra.mxu1 %v4503_v31 }
 0x12e   : > { %5605 = vst [vmem:[#allocation59_spill] sm:$0xff] %v4772_v15 }
 0x12f   : > { %1994 = vmatpush.bf16.msra.mxu0 %v4514_v43 }
 0x130   : > { %2008 = vmatpush.bf16.msra.mxu1 %v4511_v40  ;;  %v4801_v40 = vperm.slane %v708_v39, 2 }
 0x132   : > { %v4784_v27 = vpop.f32.mrf.mxu2 }
 0x133   : > { %v947_v10 = vpop.f32.mrf.mxu3  ;;  %v779_v15 = vpop.f32.mrf.mxu0  ;;  %1995 = vmatpush.bf16.msra.mxu0 %v4524_v51 }
 0x134   : > { %v4790_v3 = vadd.f32 %v947_v10, %v4763_v56  ;;  %v4793_v14 = vadd.f32 %v779_v15, %v4782_v25  ;;  %v808_v33 = vpop.f32.mrf.mxu1  ;;  %2009 = vmatpush.bf16.msra.mxu1 %v4517_v44 }
 0x135   : > { %v4797_v24 = vadd.f32 %v808_v33, %v4786_v46 }
 0x136   : > { %5607 = vst [vmem:[#allocation60_spill] sm:$0xff] %v4790_v3 }
 0x137   : > { %5608 = vst [vmem:[#allocation61_spill] sm:$0xff] %v4793_v14  ;;  %1996 = vmatpush.bf16.msra.mxu0 %v4535_v57 }
 0x138   : > { %5609 = vst [vmem:[#allocation62_spill] sm:$0xff] %v4797_v24  ;;  %2010 = vmatpush.bf16.msra.mxu1 %v4527_v52 }
 0x13a   : > { %v837_v43 = vpop.f32.mrf.mxu2 }
 0x13b   : > { %v4804_v51 = vadd.f32 %v837_v43, %v4801_v40  ;;  %v950_v10 = vpop.f32.mrf.mxu3  ;;  %v781_v3 = vpop.f32.mrf.mxu0  ;;  %1997 = vmatpush.bf16.msra.mxu0 %v4541_v63 }
 0x13c   : > { %v4808_v15 = vadd.f32 %v950_v10, %v4763_v56  ;;  %v4811_v33 = vadd.f32 %v781_v3, %v4782_v25  ;;  %v810_v24 = vpop.f32.mrf.mxu1  ;;  %2011 = vmatpush.bf16.msra.mxu1 %v4538_v58 }
 0x13d   : > { %5610 = vst [vmem:[#allocation63_spill] sm:$0xff] %v4804_v51  ;;  %v4815_v39 = vadd.f32 %v810_v24, %v4786_v46 }
 0x13e   : > { %5611 = vst [vmem:[#allocation64_spill] sm:$0xff] %v4808_v15 }
 0x13f   : > { %5612 = vst [vmem:[#allocation65_spill] sm:$0xff] %v4811_v33  ;;  %1998 = vmatpush.bf16.msra.mxu0 %v4547_v7 }
 0x140   : > { %5613 = vst [vmem:[#allocation66_spill] sm:$0xff] %v4815_v39  ;;  %2012 = vmatpush.bf16.msra.mxu1 %v4544_v0 }
 0x142   : > { %v839_v43 = vpop.f32.mrf.mxu2 }
 0x143   : > { %v4820_v51 = vadd.f32 %v839_v43, %v4801_v40  ;;  %v952_v14 = vpop.f32.mrf.mxu3  ;;  %v784_v10 = vpop.f32.mrf.mxu0  ;;  %1999 = vmatpush.bf16.msra.mxu0 %v4559_v18 }
 0x144   : > { %v4824_v3 = vadd.f32 %v952_v14, %v4763_v56  ;;  %v4827_v15 = vadd.f32 %v784_v10, %v4782_v25  ;;  %v813_v24 = vpop.f32.mrf.mxu1  ;;  %2013 = vmatpush.bf16.msra.mxu1 %v4550_v8 }
 0x145   : > { %5614 = vst [vmem:[#allocation67_spill] sm:$0xff] %v4820_v51  ;;  %v4831_v39 = vadd.f32 %v813_v24, %v4786_v46 }
 0x146   : > { %5615 = vst [vmem:[#allocation68_spill] sm:$0xff] %v4824_v3 }
 0x147   : > { %5616 = vst [vmem:[#allocation69_spill] sm:$0xff] %v4827_v15 }
 0x148   : > { %5617 = vst [vmem:[#allocation70_spill] sm:$0xff] %v4831_v39 }
 0x14a   : > { %v842_v33 = vpop.f32.mrf.mxu2 }
 0x14b   : > { %v4834_v43 = vadd.f32 %v842_v33, %v4801_v40  ;;  %v955_v51 = vpop.f32.mrf.mxu3  ;;  %v786_v0 = vpop.f32.mrf.mxu0 }
 0x14c   : > { %v4837_v18 = vadd.f32 %v955_v51, %v4763_v56  ;;  %v4840_v14 = vadd.f32 %v786_v0, %v4782_v25  ;;  %v815_v10 = vpop.f32.mrf.mxu1 }
 0x14d   : > { %5618 = vst [vmem:[#allocation71_spill] sm:$0xff] %v4834_v43  ;;  %v4843_v3 = vadd.f32 %v815_v10, %v4786_v46 }
 0x14e   : > { %5619 = vst [vmem:[#allocation72_spill] sm:$0xff] %v4837_v18 }
 0x14f   : > { %5620 = vst [vmem:[#allocation73_spill] sm:$0xff] %v4840_v14 }
 0x150   : > { %5621 = vst [vmem:[#allocation74_spill] sm:$0xff] %v4843_v3 }
 0x152   : > { %v844_v15 = vpop.f32.mrf.mxu2 }
 0x153   : > { %v4846_v24 = vadd.f32 %v844_v15, %v4801_v40  ;;  %v957_v39 = vpop.f32.mrf.mxu3  ;;  %v789_v8 = vpop.f32.mrf.mxu0 }
 0x154   : > { %v4849_v33 = vadd.f32 %v957_v39, %v4763_v56  ;;  %v4852_v43 = vadd.f32 %v789_v8, %v4782_v25  ;;  %v818_v51 = vpop.f32.mrf.mxu1  ;;  %v4867_v8 = vperm.slane %v4757_v47, 1 }
 0x155   : > { %5622 = vst [vmem:[#allocation75_spill] sm:$0xff] %v4846_v24  ;;  %v4855_v0 = vadd.f32 %v818_v51, %v4786_v46 }
 0x156   : > { %5623 = vst [vmem:[#allocation76_spill] sm:$0xff] %v4849_v33 }
 0x157   : > { %5624 = vst [vmem:[#allocation77_spill] sm:$0xff] %v4852_v43  ;;  %v4870_v43 = vperm.slane %v4757_v47, 2  ;;  %v804_v47 = vadd.f32 %v4750_v4, %v4786_v46  ;;  %v806_v4 = vadd.f32 %v4774_v16, %v4786_v46 }
 0x158   : > { %5625 = vst [vmem:[#allocation78_spill] sm:$0xff] %v4855_v0 }
 0x15a   : > { %v847_v14 = vpop.f32.mrf.mxu2 }
 0x15b   : > { %v4858_v10 = vadd.f32 %v847_v14, %v4801_v40  ;;  %v960_v3 = vpop.f32.mrf.mxu3  ;;  %v791_v18 = vpop.f32.mrf.mxu0 }
 0x15c   : > { %v4861_v15 = vadd.f32 %v791_v18, %v4782_v25  ;;  %v820_v24 = vpop.f32.mrf.mxu1 }
 0x15d   : > { %5626 = vst [vmem:[#allocation79_spill] sm:$0xff] %v4858_v10  ;;  %v4864_v39 = vadd.f32 %v820_v24, %v4786_v46  ;;  %v775_v24 = vadd.f32 %v4748_v17, %v4782_v25  ;;  %v777_v17 = vadd.f32 %v4768_v11, %v4782_v25  ;;  %v961_v46 = vadd.f32 %v960_v3, %v4763_v56 }
 0x15e   : > { %5627 = vst [vmem:[#allocation80_spill] sm:$0xff] %v4861_v15 }
 0x15f   : > { %5628 = vst [vmem:[#allocation81_spill] sm:$0xff] %v4864_v39 }
 0x162   : > { %v849_v51 = vpop.f32.mrf.mxu2 }
 0x163   : > { %v4873_v0 = vadd.f32 %v849_v51, %v4801_v40  ;;  %v962_v14 = vpop.f32.mrf.mxu3  ;;  %v974_v10 = vpop.f32.mrf.mxu0 }
 0x164   : > { %v4876_v33 = vadd.f32 %v974_v10, %v4867_v8  ;;  %v1003_v18 = vpop.f32.mrf.mxu1 }
 0x165   : > { %5629 = vst [vmem:[#allocation82_spill] sm:$0xff] %v4873_v0  ;;  %v4879_v15 = vadd.f32 %v1003_v18, %v4870_v43 }
 0x166   : > { %5630 = vst [vmem:[#allocation83_spill] sm:$0xff] %v4876_v33 }
 0x167   : > { %5631 = vst [vmem:[#allocation84_spill] sm:$0xff] %v4879_v15 }
 0x16a   : > { %v1267_v39 = vpop.f32.mrf.mxu2 }
 0x16b   : > { %v1300_v7 = vadd.f32 %v1267_v39, %v775_v24  ;;  %v1281_v58 = vpop.f32.mrf.mxu3  ;;  %v976_v51 = vpop.f32.mrf.mxu0 }
 0x16c   : > { %v1340_v0 = vadd.f32 %v1281_v58, %v804_v47  ;;  %v4886_v63 = vadd.f32 %v976_v51, %v4867_v8  ;;  %v1005_v10 = vpop.f32.mrf.mxu1 }
 0x16d   : > { %v3086_v33 = vmul.f32 -1.442695, %v1300_v7  ;;  %v4889_v52 = vadd.f32 %v1005_v10, %v4870_v43 }
 0x16e   : > { %5632 = vst [vmem:[#allocation85_spill] sm:$0xff] %v4886_v63  ;;  %v3088_v18 = vmul.f32 -1.442695, %v1340_v0 }
 0x16f   : > { %5633 = vst [vmem:[#allocation86_spill] sm:$0xff] %v4889_v52  ;;  %3524 = vpow2.f32 %v3086_v33 }
 0x170   : > { %3526 = vpow2.f32 %v3088_v18 }
 0x172   : > { %v1269_v39 = vpop.f32.mrf.mxu2 }
 0x173   : > { %v1301_v24 = vadd.f32 %v1269_v39, %v777_v17  ;;  %v1283_v58 = vpop.f32.mrf.mxu3  ;;  %v979_v47 = vpop.f32.mrf.mxu0 }
 0x174   : > { %v1341_v51 = vadd.f32 %v1283_v58, %v806_v4  ;;  %v4896_v15 = vadd.f32 %v979_v47, %v4867_v8  ;;  %v1008_v7 = vpop.f32.mrf.mxu1 }
 0x175   : > { %v3525_v10 = vpop.eup %3524  ;;  %v3087_v52 = vmul.f32 -1.442695, %v1301_v24  ;;  %v4899_v33 = vadd.f32 %v1008_v7, %v4870_v43 }
 0x176   : > { %5634 = vst [vmem:[#allocation87_spill] sm:$0xff] %v4896_v15  ;;  %v3527_v0 = vpop.eup %3526  ;;  %v1308_v18 = vadd.f32 1.0, %v3525_v10  ;;  %v3089_v11 = vmul.f32 -1.442695, %v1341_v51 }
 0x177   : > { %5635 = vst [vmem:[#allocation88_spill] sm:$0xff] %v4899_v33  ;;  %v4901_v25 = vadd.f32 1.0, %v3527_v0  ;;  %3528 = vpow2.f32 %v3087_v52 }
 0x178   : > { %3530 = vrcp.f32 %v1308_v18  ;;  %v1321_v33 = vand.u32 2147483648, %v1308_v18  ;;  %vm1315_vm2 = vweird.f32 %v1308_v18 }
 0x179   : > { %3532 = vrcp.f32 %v4901_v25  ;;  %vm1355_vm10 = vweird.f32 %v4901_v25 }
 0x17a   : > { %3534 = vpow2.f32 %v3089_v11  ;;  %v1295_v3 = vpop.f32.mrf.mxu2  ;;  %v1322_v31 = vor.u32 1.1754944e-38, %v1321_v33 }
 0x17b   : > { %v1542_v16 = vpop.f32.mrf.mxu3  ;;  %v981_v17 = vpop.f32.mrf.mxu0 }
 0x17c   : > { %v4906_v4 = vadd.f32 %v981_v17, %v4867_v8  ;;  %v1010_v39 = vpop.f32.mrf.mxu1  ;;  %v1575_v52 = vadd.f32 %v1542_v16, %v961_v46 }
 0x17d   : > { %v3529_v24 = vpop.eup %3528  ;;  %v4909_v58 = vadd.f32 %v1010_v39, %v4870_v43  ;;  %v4921_v39 = vld [vmem:[%s5638_s5] ss:$0 sm:$0xff] }
 0x17e   : > { %5636 = vst [vmem:[#allocation89_spill] sm:$0xff] %v4906_v4  ;;  %v3531_v47 = vpop.eup %3530  ;;  %v4911_v51 = vadd.f32 1.0, %v3529_v24  ;;  %v3186_v63 = vmul.f32 -1.442695, %v1575_v52  ;;  %v963_v24 = vadd.f32 %v962_v14, %v4763_v56  ;;  %v1319_v4 = vand.u32 2147483647, %v1308_v18 }
 0x17f   : > { %5637 = vst [vmem:[#allocation90_spill] sm:$0xff] %v4909_v58  ;;  %v4913_v7 = vpop.eup %3532  ;;  %v1311_v10 = vmul.f32 %v3531_v47, %v1308_v18  ;;  %vm1316_vm1 = vweird.f32 %v3531_v47  ;;  %v1380_v44 = vadd.f32 %v4921_v39, %v1295_v3 }
 0x180   : > { %v3535_v0 = vpop.eup %3534  ;;  %3536 = vrcp.f32 %v4911_v51  ;;  %v1351_v46 = vmul.f32 %v4913_v7, %v4901_v25  ;;  %vm1317_vm3 = vmor %vm1315_vm2, %vm1316_vm1  ;;  %vm1320_vm4 = vcmp.eq.f32.partialorder %v1319_v4, 8.507059e+37  ;;  %v1334_v4 = vand.u32 2147483647, %v4911_v51 }
 0x181   : > { %v4916_v11 = vadd.f32 1.0, %v3535_v0  ;;  %v1312_v17 = vsub.f32 1.0, %v1311_v10  ;;  %vm1330_vm6 = vweird.f32 %v4911_v51  ;;  %vm1356_vm7 = vweird.f32 %v4913_v7 }
 0x182   : > { %v1352_v49 = vsub.f32 1.0, %v1351_v46  ;;  %v1297_v3 = vpop.f32.mrf.mxu2  ;;  %v1336_v46 = vand.u32 2147483648, %v4911_v51  ;;  %vm1335_vm9 = vcmp.eq.f32.partialorder %v1334_v4, 8.507059e+37  ;;  %vm4963_vm11 = vmor %vm1355_vm10, %vm1356_vm7 }
 0x183   : > { %3538 = vrcp.f32 %v4916_v11  ;;  %v1544_v16 = vpop.f32.mrf.mxu3  ;;  %v984_v58 = vpop.f32.mrf.mxu0  ;;  %v1313_v52 = vmul.f32 %v3531_v47, %v1312_v17  ;;  %vm1370_vm14 = vweird.f32 %v4916_v11 }
 0x184   : > { %v4928_v0 = vadd.f32 %v984_v58, %v4867_v8  ;;  %v1013_v10 = vpop.f32.mrf.mxu1  ;;  %v1576_v15 = vadd.f32 %v1544_v16, %v963_v24  ;;  %3540 = vpow2.f32 %v3186_v63  ;;  %v1353_v33 = vmul.f32 %v4913_v7, %v1352_v49 }
 0x185   : > { %v4931_v57 = vadd.f32 %v1013_v10, %v4870_v43  ;;  %v1314_v14 = vadd.f32 %v3531_v47, %v1313_v52  ;;  %v833_v10 = vadd.f32 %v4766_v9, %v4801_v40  ;;  %v1381_v49 = vadd.f32 %v4921_v39, %v1297_v3 }
 0x186   : > { %5639 = vst [vmem:[#allocation91_spill] sm:$0xff] %v4928_v0  ;;  %v3537_v56 = vpop.eup %3536  ;;  %v3187_v37 = vmul.f32 -1.442695, %v1576_v15  ;;  %v1359_v3 = vand.u32 2147483647, %v4901_v25 }
 0x187   : > { %v1326_v58 = vmul.f32 %v3537_v56, %v4911_v51  ;;  %v1318_v0 = vsel %vm1317_vm3, %v3531_v47, %v1314_v14  ;;  %vm1331_vm5 = vweird.f32 %v3537_v56 }
 0x188   : > { %v1323_v24 = vsel %vm1320_vm4, %v1322_v31, %v1318_v0  ;;  %3542 = vpow2.f32 %v3187_v37  ;;  %vm1332_vm8 = vmor %vm1330_vm6, %vm1331_vm5  ;;  %v1361_v37 = vand.u32 2147483648, %v4901_v25  ;;  %vm1360_vm12 = vcmp.eq.f32.partialorder %v1359_v3, 8.507059e+37 }
 0x189   : > { %v4935_v17 = vpop.eup %3538  ;;  %v1327_v16 = vsub.f32 1.0, %v1326_v58  ;;  %v1382_v18 = vmul.f32 %v1380_v44, %v1323_v24  ;;  %v1337_v24 = vor.u32 1.1754944e-38, %v1336_v46 }
 0x18a   : > { %v1366_v63 = vmul.f32 %v4935_v17, %v4916_v11  ;;  %v3541_v15 = vpop.eup %3540  ;;  %v1362_v25 = vor.u32 1.1754944e-38, %v1361_v37  ;;  %vm1371_vm13 = vweird.f32 %v4935_v17 }
 0x18b   : > { %v986_v52 = vpop.f32.mrf.mxu0  ;;  %v1328_v47 = vmul.f32 %v3537_v56, %v1327_v16  ;;  %v1384_v31 = vadd.f32 %v1382_v18, %v833_v10  ;;  %v1354_v16 = vadd.f32 %v4913_v7, %v1353_v33  ;;  %v4954_v10 = vadd.f32 1.0, %v3541_v15  ;;  %vm1372_vm15 = vmor %vm1370_vm14, %vm1371_vm13 }
 0x18c   : > { %v4945_v0 = vadd.f32 %v986_v52, %v4867_v8  ;;  %v1015_v9 = vpop.f32.mrf.mxu1  ;;  %v1367_v58 = vsub.f32 1.0, %v1366_v63  ;;  %v835_v52 = vadd.f32 %v4784_v27, %v4801_v40 }
 0x18d   : > { %v4949_v44 = vadd.f32 %v1015_v9, %v4870_v43  ;;  %v1329_v14 = vadd.f32 %v3537_v56, %v1328_v47  ;;  %3544 = vtanh.f32 %v1384_v31  ;;  %v1358_v40 = vsel %vm4963_vm11, %v4913_v7, %v1354_v16 }
 0x18e   : > { %v3543_v33 = vpop.eup %3542  ;;  %3546 = vrcp.f32 %v4954_v10  ;;  %vm1590_vm2 = vweird.f32 %v4954_v10 }
 0x18f   : > { %v1333_v18 = vsel %vm1332_vm8, %v3537_v56, %v1329_v14  ;;  %v1368_v56 = vmul.f32 %v4935_v17, %v1367_v58  ;;  %v4977_v14 = vadd.f32 1.0, %v3543_v33  ;;  %v1376_v58 = vand.u32 2147483648, %v4916_v11 }
 0x190   : > { %v1338_v51 = vsel %vm1335_vm9, %v1337_v24, %v1333_v18  ;;  %v1374_v24 = vand.u32 2147483647, %v4916_v11 }
 0x191   : > { %v1383_v63 = vmul.f32 %v1381_v49, %v1338_v51  ;;  %v1369_v9 = vadd.f32 %v4935_v17, %v1368_v56  ;;  %v1363_v49 = vsel %vm1360_vm12, %v1362_v25, %v1358_v40  ;;  %v1377_v51 = vor.u32 1.1754944e-38, %v1376_v58 }
 0x192   : > { %vm1375_vm0 = vcmp.eq.f32.partialorder %v1374_v24, 8.507059e+37  ;;  %vm1605_vm6 = vweird.f32 %v4977_v14 }
 0x193   : > { %v1385_v27 = vadd.f32 %v1383_v63, %v835_v52  ;;  %v989_v47 = vpop.f32.mrf.mxu0  ;;  %v3545_v4 = vpop.eup %3544 }
 0x194   : > { %v4972_v15 = vpop.f32.mrf.mxu1  ;;  %v1388_v31 = vsub.f32 %v4638_v62, %v3545_v4  ;;  %v3547_v16 = vpop.eup %3546  ;;  %v1373_v62 = vsel %vm1372_vm15, %v4935_v17, %v1369_v9  ;;  %v990_v25 = vadd.f32 %v989_v47, %v4867_v8  ;;  %v5007_v47 = vld [vmem:[%s5642_s27] ss:$0 sm:$0xff] }
 0x195   : > { %3548 = vtanh.f32 %v1385_v27  ;;  %v1586_v46 = vmul.f32 %v3547_v16, %v4954_v10  ;;  %v1378_v11 = vsel %vm1375_vm0, %v1377_v51, %v1373_v62  ;;  %vm1591_vm1 = vweird.f32 %v3547_v16 }
 0x196   : > { %v1390_v7 = vmul.f32 %v1388_v31, %v1363_v49  ;;  %3550 = vrcp.f32 %v4977_v14  ;;  %vm1592_vm3 = vmor %vm1590_vm2, %vm1591_vm1 }
 0x197   : > { %v1587_v27 = vsub.f32 1.0, %v1586_v46 }
 0x198   : > { %v4982_v18 = vadd.f32 %v3545_v4, %v1390_v7 }
 0x199   : > { %v1588_v58 = vmul.f32 %v3547_v16, %v1587_v27  ;;  %v1594_v27 = vand.u32 2147483647, %v4954_v10 }
 0x19a   : > { %v1394_v17 = vpack.c.bf16 %v4982_v18, %v4982_v18 }
 0x19b   : > { %v3549_v37 = vpop.eup %3548  ;;  %v991_v52 = vpop.f32.mrf.mxu0  ;;  %v1589_v46 = vadd.f32 %v3547_v16, %v1588_v58  ;;  %vm1595_vm4 = vcmp.eq.f32.partialorder %v1594_v27, 8.507059e+37 }
 0x19c   : > { %v1389_v3 = vsub.f32 %v4640_v1, %v3549_v37  ;;  %v4987_v63 = vpop.f32.mrf.mxu1  ;;  %v4990_v33 = vpop.eup %3550  ;;  %v1682_v7 = vunpack.c.l.b16 %v1394_v17 }
 0x19d   : > { %v1601_v9 = vmul.f32 %v4990_v33, %v4977_v14  ;;  %vm1606_vm5 = vweird.f32 %v4990_v33 }
 0x19e   : > { %v1391_v56 = vmul.f32 %v1389_v3, %v1378_v11  ;;  %v1596_v11 = vand.u32 2147483648, %v4954_v10  ;;  %vm1607_vm7 = vmor %vm1605_vm6, %vm1606_vm5 }
 0x19f   : > { %v1602_v3 = vsub.f32 1.0, %v1601_v9 }
 0x1a0   : > { %v4992_v40 = vadd.f32 %v3549_v37, %v1391_v56  ;;  %v992_v56 = vadd.f32 %v991_v52, %v4867_v8  ;;  %v1597_v9 = vor.u32 1.1754944e-38, %v1596_v11 }
 0x1a2   : > { %v3314_v4 = vpack.c.bf16 %v4992_v40, %v4982_v18  ;;  %v1395_v1 = vpack.c.bf16 %v4992_v40, %v4992_v40 }
 0x1a3   : > { %v1556_v31 = vpop.f32.mrf.mxu0 }
 0x1a4   : > { %3315 = vst [vmem:[%s4485_s2] sm:$0xff] %v3314_v4   ;;  %v1615_v49 = vadd.f32 %v1556_v31, %v990_v25  ;;  %v1683_v24 = vunpack.c.l.b16 %v1395_v1  ;;  %v1570_v37 = vpop.f32.mrf.mxu1  ;;  %v1603_v4 = vmul.f32 %v4990_v33, %v1602_v3  ;;  %v1593_v25 = vsel %vm1592_vm3, %v3547_v16, %v1589_v46 }
 0x1a5   : > { %v1655_v1 = vadd.f32 %v5007_v47, %v1570_v37  ;;  %v1019_v37 = vadd.f32 %v4972_v15, %v4870_v43 }
 0x1a6   : > { %v3188_v62 = vmul.f32 -1.442695, %v1615_v49  ;;  %v1684_v51 = vpack.c.b16 %v1683_v24, %v1682_v7  ;;  %v1598_v49 = vsel %vm1595_vm4, %v1597_v9, %v1593_v25  ;;  %v1604_v58 = vadd.f32 %v4990_v33, %v1603_v4 }
 0x1a7   : > { %v1657_v16 = vmul.f32 %v1655_v1, %v1598_v49  ;;  %v1611_v24 = vand.u32 2147483648, %v4977_v14 }
 0x1a8   : > { %3552 = vpow2.f32 %v3188_v62  ;;  %1694 = vmatmul.bf16.vlgmr.msrb.gmra.mxu2 %v1684_v51  ;;  %1708 = vmatmul.bf16.vlgmr.msrb.gmra.mxu3 %v1684_v51  ;;  %v1609_v62 = vand.u32 2147483647, %v4977_v14 }
 0x1a9   : > { %1722 = vmatmul.bf16.vlgmr.msrb.gmra.mxu0 %v1684_v51  ;;  %2020 = vmatpush.bf16.msrb.mxu2 %v4562_v20  ;;  %v1608_v51 = vsel %vm1607_vm7, %v4990_v33, %v1604_v58  ;;  %v1659_v46 = vadd.f32 %v1657_v16, %v1019_v37  ;;  %v1612_v11 = vor.u32 1.1754944e-38, %v1611_v24  ;;  %v1021_v33 = vadd.f32 %v4987_v63, %v4870_v43 }
 0x1aa   : > { %2145 = vmatpush.bf16.msrb.mxu3 %v4553_v12  ;;  %2159 = vmatpush.bf16.msrb.mxu0 %v4574_v29  ;;  %vm1610_vm8 = vcmp.eq.f32.partialorder %v1609_v62, 8.507059e+37 }
 0x1ab   : > { %v1558_v17 = vpop.f32.mrf.mxu0 }
 0x1ac   : > { %v1616_v31 = vadd.f32 %v1558_v17, %v992_v56  ;;  %v1572_v7 = vpop.f32.mrf.mxu1  ;;  %v1613_v56 = vsel %vm1610_vm8, %v1612_v11, %v1608_v51 }
 0x1ad   : > { %2021 = vmatpush.bf16.msrb.mxu2 %v4576_v30  ;;  %v1656_v3 = vadd.f32 %v5007_v47, %v1572_v7 }
 0x1ae   : > { %v3553_v8 = vpop.eup %3552  ;;  %v3189_v52 = vmul.f32 -1.442695, %v1616_v31  ;;  %2146 = vmatpush.bf16.msrb.mxu3 %v4566_v21  ;;  %2160 = vmatpush.bf16.msrb.mxu0 %v4582_v42 }
 0x1af   : > { %v1623_v10 = vadd.f32 1.0, %v3553_v8  ;;  %v1658_v17 = vmul.f32 %v1656_v3, %v1613_v56 }
 0x1b0   : > { %3554 = vpow2.f32 %v3189_v52 }
 0x1b1   : > { %3556 = vrcp.f32 %v1623_v10  ;;  %2022 = vmatpush.bf16.msrb.mxu2 %v4585_v45  ;;  %v1636_v1 = vand.u32 2147483648, %v1623_v10  ;;  %v1660_v31 = vadd.f32 %v1658_v17, %v1021_v33  ;;  %v1634_v8 = vand.u32 2147483647, %v1623_v10 }
 0x1b2   : > { %2147 = vmatpush.bf16.msrb.mxu3 %v4579_v34  ;;  %2161 = vmatpush.bf16.msrb.mxu0 %v4616_v22  ;;  %3558 = vtanh.f32 %v1659_v46  ;;  %vm1630_vm10 = vweird.f32 %v1623_v10 }
 0x1b3   : > { %v1637_v63 = vor.u32 1.1754944e-38, %v1636_v1  ;;  %vm1635_vm12 = vcmp.eq.f32.partialorder %v1634_v8, 8.507059e+37 }
 0x1b5   : > { %2023 = vmatpush.bf16.msrb.mxu2 %v4595_v59 }
 0x1b6   : > { %v3555_v14 = vpop.eup %3554  ;;  %2148 = vmatpush.bf16.msrb.mxu3 %v4588_v48  ;;  %2162 = vmatpush.bf16.msrb.mxu0 %v4626_v41 }
 0x1b7   : > { %v3557_v15 = vpop.eup %3556  ;;  %v1624_v27 = vadd.f32 1.0, %v3555_v14 }
 0x1b8   : > { %v1626_v4 = vmul.f32 %v3557_v15, %v1623_v10  ;;  %vm1631_vm9 = vweird.f32 %v3557_v15  ;;  %v3559_v52 = vpop.eup %3558 }
 0x1b9   : > { %3560 = vrcp.f32 %v1624_v27  ;;  %2024 = vmatpush.bf16.msrb.mxu2 %v4605_v5  ;;  %vm1632_vm11 = vmor %vm1630_vm10, %vm1631_vm9  ;;  %v1663_v24 = vsub.f32 %v4671_v36, %v3559_v52  ;;  %v1651_v10 = vand.u32 2147483648, %v1624_v27  ;;  %v1649_v3 = vand.u32 2147483647, %v1624_v27 }
 0x1ba   : > { %v1627_v25 = vsub.f32 1.0, %v1626_v4  ;;  %2149 = vmatpush.bf16.msrb.mxu3 %v4599_v61  ;;  %2163 = vmatpush.bf16.msrb.mxu0 %v4654_v13  ;;  %3562 = vtanh.f32 %v1660_v31  ;;  %vm1645_vm14 = vweird.f32 %v1624_v27 }
 0x1bb   : > { %v1652_v36 = vor.u32 1.1754944e-38, %v1651_v10  ;;  %vm1650_vm0 = vcmp.eq.f32.partialorder %v1649_v3, 8.507059e+37  ;;  %v5655_v10 = vld [vmem:[#allocation48_spill] sm:$0xff]  ;;  %v5658_v3 = vld [vmem:[#allocation50_spill] sm:$0xff] }
 0x1bc   : > { %v1628_v9 = vmul.f32 %v3557_v15, %v1627_v25 }
 0x1bd   : > { %2025 = vmatpush.bf16.msrb.mxu2 %v4618_v23 }
 0x1be   : > { %v1629_v49 = vadd.f32 %v3557_v15, %v1628_v9  ;;  %2150 = vmatpush.bf16.msrb.mxu3 %v4609_v6  ;;  %2164 = vmatpush.bf16.msrb.mxu0 %v4661_v19 }
 0x1bf   : > { %v3561_v43 = vpop.eup %3560 }
 0x1c0   : > { %v1633_v58 = vsel %vm1632_vm11, %v3557_v15, %v1629_v49  ;;  %v1641_v16 = vmul.f32 %v3561_v43, %v1624_v27  ;;  %vm1646_vm13 = vweird.f32 %v3561_v43  ;;  %v3563_v46 = vpop.eup %3562  ;;  %v5645_v49 = vld [vmem:[#allocation53_spill] sm:$0xff] }
 0x1c1   : > { %v1638_v7 = vsel %vm1635_vm12, %v1637_v63, %v1633_v58  ;;  %2026 = vmatpush.bf16.msrb.mxu2 %v4632_v53  ;;  %vm1647_vm15 = vmor %vm1645_vm14, %vm1646_vm13  ;;  %v1664_v15 = vsub.f32 %v4673_v38, %v3563_v46  ;;  %v5643_v38 = vld [vmem:[#allocation40_spill] sm:$0xff]  ;;  %v5647_v63 = vld [vmem:[#allocation41_spill] sm:$0xff] }
 0x1c2   : > { %v1642_v62 = vsub.f32 1.0, %v1641_v16  ;;  %2151 = vmatpush.bf16.msrb.mxu3 %v4621_v28  ;;  %2165 = vmatpush.bf16.msrb.mxu0 %v4687_v60  ;;  %v1665_v37 = vmul.f32 %v1663_v24, %v1638_v7  ;;  %v5648_v58 = vld [vmem:[#allocation54_spill] sm:$0xff]  ;;  %v5649_v16 = vld [vmem:[#allocation44_spill] sm:$0xff]  ;;  %v5650_v7 = vld [vmem:[#allocation43_spill] sm:$0xff] }
 0x1c3   : > { %v5653_v24 = vld [vmem:[#allocation45_spill] sm:$0xff] }
 0x1c4   : > { %v1643_v51 = vmul.f32 %v3561_v43, %v1642_v62  ;;  %v5051_v14 = vadd.f32 %v3559_v52, %v1665_v37  ;;  %v5644_v52 = vld [vmem:[#allocation39_spill] sm:$0xff]  ;;  %v5654_v62 = vld [vmem:[#allocation56_spill] sm:$0xff] }
 0x1c5   : > { %2027 = vmatpush.bf16.msrb.mxu2 %v4644_v2  ;;  %v5656_v37 = vld [vmem:[#allocation47_spill] sm:$0xff] }
 0x1c6   : > { %v1644_v11 = vadd.f32 %v3561_v43, %v1643_v51  ;;  %2152 = vmatpush.bf16.msrb.mxu3 %v4635_v55  ;;  %2166 = vmatpush.bf16.msrb.mxu0 %v4694_v50  ;;  %v1669_v25 = vpack.c.bf16 %v5051_v14, %v5051_v14  ;;  %v5657_v51 = vld [vmem:[#allocation57_spill] sm:$0xff] }
 0x1c8   : > { %v1648_v56 = vsel %vm1647_vm15, %v3561_v43, %v1644_v11  ;;  %v1835_v31 = vunpack.c.l.b16 %v1669_v25  ;;  %v5646_v43 = vld [vmem:[#allocation42_spill] sm:$0xff] }
 0x1c9   : > { %v1653_v17 = vsel %vm1650_vm0, %v1652_v36, %v1648_v56  ;;  %v5660_v11 = vld [vmem:[#allocation58_spill] sm:$0xff]  ;;  %v5661_v36 = vld [vmem:[#allocation52_spill] sm:$0xff]  ;;  %v5662_v56 = vld [vmem:[#allocation51_spill] sm:$0xff] }
 0x1ca   : > { %v1666_v4 = vmul.f32 %v1664_v15, %v1653_v17 }
 0x1cc   : > { %v5054_v33 = vadd.f32 %v3563_v46, %v1666_v4  ;;  %v5659_v46 = vld [vmem:[#allocation49_spill] sm:$0xff] }
 0x1cd   : > { %v5663_v4 = vld [vmem:[#allocation61_spill] sm:$0xff] }
 0x1ce   : > { %v3319_v27 = vpack.c.bf16 %v5054_v33, %v5051_v14  ;;  %v1670_v1 = vpack.c.bf16 %v5054_v33, %v5054_v33 }
 0x1d0   : > { %3351 = vst [vmem:[%s4487_s30 + $0x18] sm:$0xff] %v3319_v27   ;;  %v1836_v9 = vunpack.c.l.b16 %v1670_v1  ;;  %v5664_v27 = vld [vmem:[#allocation62_spill] sm:$0xff] }
 0x1d2   : > { %v1837_v8 = vpack.c.b16 %v1836_v9, %v1835_v31 }
 0x1d4   : > { %1847 = vmatmul.bf16.vlgmr.msrb.gmra.mxu1 %v1837_v8  ;;  %1861 = vmatmul.bf16.vlgmr.msra.gmra.mxu2 %v1837_v8 }
 0x1d5   : > { %1875 = vmatmul.bf16.vlgmr.msra.gmra.mxu3 %v1837_v8  ;;  %2173 = vmatpush.bf16.msrb.mxu1 %v4590_v54 }
 0x1d6   : > { %2298 = vmatpush.bf16.msra.mxu2 %v4505_v32  ;;  %2312 = vmatpush.bf16.msra.mxu3 %v4496_v26  ;;  %v5651_v32 = vld [vmem:[#allocation55_spill] sm:$0xff]  ;;  %v5652_v26 = vld [vmem:[#allocation46_spill] sm:$0xff] }
 0x1d9   : > { %2174 = vmatpush.bf16.msrb.mxu1 %v4623_v35 }
 0x1da   : > { %2299 = vmatpush.bf16.msra.mxu2 %v5643_v38  ;;  %2313 = vmatpush.bf16.msra.mxu3 %v5644_v52  ;;  %v5665_v52 = vld [vmem:[#allocation65_spill] sm:$0xff] }
 0x1dd   : > { %2175 = vmatpush.bf16.msrb.mxu1 %v5645_v49 }
 0x1de   : > { %2300 = vmatpush.bf16.msra.mxu2 %v5646_v43  ;;  %2314 = vmatpush.bf16.msra.mxu3 %v5647_v63  ;;  %v5666_v63 = vld [vmem:[#allocation66_spill] sm:$0xff] }
 0x1e1   : > { %2176 = vmatpush.bf16.msrb.mxu1 %v5648_v58 }
 0x1e2   : > { %2301 = vmatpush.bf16.msra.mxu2 %v5649_v16  ;;  %2315 = vmatpush.bf16.msra.mxu3 %v5650_v7 }
 0x1e5   : > { %2177 = vmatpush.bf16.msrb.mxu1 %v5651_v32 }
 0x1e6   : > { %2302 = vmatpush.bf16.msra.mxu2 %v5652_v26  ;;  %2316 = vmatpush.bf16.msra.mxu3 %v5653_v24 }
 0x1e9   : > { %2178 = vmatpush.bf16.msrb.mxu1 %v5654_v62 }
 0x1ea   : > { %2303 = vmatpush.bf16.msra.mxu2 %v5655_v10  ;;  %2317 = vmatpush.bf16.msra.mxu3 %v5656_v37 }
 0x1ed   : > { %2179 = vmatpush.bf16.msrb.mxu1 %v5657_v51 }
 0x1ee   : > { %2304 = vmatpush.bf16.msra.mxu2 %v5658_v3  ;;  %2318 = vmatpush.bf16.msra.mxu3 %v5659_v46 }
 0x1f1   : > { %2180 = vmatpush.bf16.msrb.mxu1 %v5660_v11 }
 0x1f2   : > { %2305 = vmatpush.bf16.msra.mxu2 %v5661_v36  ;;  %2319 = vmatpush.bf16.msra.mxu3 %v5662_v56 }
 0x22b   : > { %v1695_v15 = vpop.f32.mrf.mxu2  ;;  %v1709_v17 = vpop.f32.mrf.mxu3 }
 0x22c   : > { %v1728_v25 = vadd.f32 %v1695_v15, %v5663_v4  ;;  %v1768_v1 = vadd.f32 %v1709_v17, %v5664_v27 }
 0x22e   : > { %v3192_v31 = vmul.f32 -1.442695, %v1728_v25  ;;  %v3194_v9 = vmul.f32 -1.442695, %v1768_v1  ;;  %v1723_v25 = vpop.f32.mrf.mxu0 }
 0x230   : > { %3564 = vpow2.f32 %v3192_v31 }
 0x231   : > { %3566 = vpow2.f32 %v3194_v9 }
 0x233   : > { %v1697_v8 = vpop.f32.mrf.mxu2  ;;  %v1711_v38 = vpop.f32.mrf.mxu3 }
 0x234   : > { %v1729_v43 = vadd.f32 %v1697_v8, %v5665_v52  ;;  %v1769_v16 = vadd.f32 %v1711_v38, %v5666_v63 }
 0x236   : > { %v3565_v7 = vpop.eup %3564  ;;  %v3193_v26 = vmul.f32 -1.442695, %v1729_v43  ;;  %v3195_v37 = vmul.f32 -1.442695, %v1769_v16  ;;  %v1725_v62 = vpop.f32.mrf.mxu0 }
 0x237   : > { %v3567_v24 = vpop.eup %3566  ;;  %v1736_v10 = vadd.f32 1.0, %v3565_v7  ;;  %v1808_v7 = vadd.f32 %v4921_v39, %v1723_v25 }
 0x238   : > { %v5091_v3 = vadd.f32 1.0, %v3567_v24  ;;  %3568 = vpow2.f32 %v3193_v26 }
 0x239   : > { %3570 = vrcp.f32 %v1736_v10  ;;  %v1749_v31 = vand.u32 2147483648, %v1736_v10  ;;  %v1747_v38 = vand.u32 2147483647, %v1736_v10  ;;  %vm1743_vm2 = vweird.f32 %v1736_v10 }
 0x23a   : > { %3572 = vrcp.f32 %v5091_v3  ;;  %vm1783_vm10 = vweird.f32 %v5091_v3 }
 0x23b   : > { %3574 = vpow2.f32 %v3195_v37  ;;  %v1750_v63 = vor.u32 1.1754944e-38, %v1749_v31  ;;  %vm1748_vm4 = vcmp.eq.f32.partialorder %v1747_v38, 8.507059e+37 }
 0x23e   : > { %v3569_v46 = vpop.eup %3568 }
 0x23f   : > { %v3571_v36 = vpop.eup %3570  ;;  %v1737_v56 = vadd.f32 1.0, %v3569_v46 }
 0x240   : > { %v5094_v15 = vpop.eup %3572  ;;  %v1739_v17 = vmul.f32 %v3571_v36, %v1736_v10  ;;  %vm1744_vm1 = vweird.f32 %v3571_v36 }
 0x241   : > { %v3575_v4 = vpop.eup %3574  ;;  %3576 = vrcp.f32 %v1737_v56  ;;  %v1779_v9 = vmul.f32 %v5094_v15, %v5091_v3  ;;  %vm1745_vm3 = vmor %vm1743_vm2, %vm1744_vm1  ;;  %v1762_v11 = vand.u32 2147483647, %v1737_v56  ;;  %v1764_v51 = vand.u32 2147483648, %v1737_v56 }
 0x242   : > { %v1740_v27 = vsub.f32 1.0, %v1739_v17  ;;  %v5096_v1 = vadd.f32 1.0, %v3575_v4  ;;  %vm1758_vm6 = vweird.f32 %v1737_v56  ;;  %vm1784_vm7 = vweird.f32 %v5094_v15 }
 0x243   : > { %v1780_v16 = vsub.f32 1.0, %v1779_v9  ;;  %v1809_v9 = vadd.f32 %v4921_v39, %v1725_v62  ;;  %v1765_v38 = vor.u32 1.1754944e-38, %v1764_v51  ;;  %vm1763_vm9 = vcmp.eq.f32.partialorder %v1762_v11, 8.507059e+37  ;;  %vm1785_vm11 = vmor %vm1783_vm10, %vm1784_vm7  ;;  %v5669_v51 = vld [vmem:[#allocation67_spill] sm:$0xff] }
 0x244   : > { %v1741_v8 = vmul.f32 %v3571_v36, %v1740_v27  ;;  %3578 = vrcp.f32 %v5096_v1  ;;  %vm1798_vm14 = vweird.f32 %v5096_v1 }
 0x245   : > { %v1781_v27 = vmul.f32 %v5094_v15, %v1780_v16 }
 0x246   : > { %v1742_v52 = vadd.f32 %v3571_v36, %v1741_v8  ;;  %v5667_v8 = vld [vmem:[#allocation63_spill] sm:$0xff] }
 0x247   : > { %v3577_v43 = vpop.eup %3576  ;;  %v1782_v31 = vadd.f32 %v5094_v15, %v1781_v27 }
 0x248   : > { %v1746_v26 = vsel %vm1745_vm3, %v3571_v36, %v1742_v52  ;;  %v1754_v24 = vmul.f32 %v3577_v43, %v1737_v56  ;;  %vm1759_vm5 = vweird.f32 %v3577_v43  ;;  %v1789_v52 = vand.u32 2147483648, %v5091_v3 }
 0x249   : > { %v1751_v37 = vsel %vm1748_vm4, %v1750_v63, %v1746_v26  ;;  %vm1760_vm8 = vmor %vm1758_vm6, %vm1759_vm5 }
 0x24a   : > { %v5102_v46 = vpop.eup %3578  ;;  %v1810_v17 = vmul.f32 %v1808_v7, %v1751_v37  ;;  %v1755_v4 = vsub.f32 1.0, %v1754_v24  ;;  %v1787_v7 = vand.u32 2147483647, %v5091_v3  ;;  %v5668_v24 = vld [vmem:[#allocation72_spill] sm:$0xff]  ;;  %v1790_v62 = vor.u32 1.1754944e-38, %v1789_v52 }
 0x24b   : > { %v1794_v25 = vmul.f32 %v5102_v46, %v5096_v1  ;;  %vm1799_vm13 = vweird.f32 %v5102_v46 }
 0x24c   : > { %v1812_v10 = vadd.f32 %v1810_v17, %v5667_v8  ;;  %v1756_v32 = vmul.f32 %v3577_v43, %v1755_v4  ;;  %v1786_v17 = vsel %vm1785_vm11, %v5094_v15, %v1782_v31  ;;  %vm1788_vm12 = vcmp.eq.f32.partialorder %v1787_v7, 8.507059e+37  ;;  %v5670_v15 = vld [vmem:[#allocation91_spill] sm:$0xff]  ;;  %vm1800_vm15 = vmor %vm1798_vm14, %vm1799_vm13 }
 0x24d   : > { %v1795_v16 = vsub.f32 1.0, %v1794_v25  ;;  %v1791_v3 = vsel %vm1788_vm12, %v1790_v62, %v1786_v17  ;;  %v1804_v31 = vand.u32 2147483648, %v5096_v1 }
 0x24e   : > { %v1757_v36 = vadd.f32 %v3577_v43, %v1756_v32  ;;  %3580 = vtanh.f32 %v1812_v10 }
 0x250   : > { %v1761_v63 = vsel %vm1760_vm8, %v3577_v43, %v1757_v36  ;;  %v1796_v43 = vmul.f32 %v5102_v46, %v1795_v16 }
 0x251   : > { %v1766_v32 = vsel %vm1763_vm9, %v1765_v38, %v1761_v63  ;;  %v1848_v56 = vpop.f32.mrf.mxu1  ;;  %v5671_v63 = vld [vmem:[#allocation76_spill] sm:$0xff] }
 0x252   : > { %v1811_v26 = vmul.f32 %v1809_v9, %v1766_v32  ;;  %v1881_v37 = vadd.f32 %v1848_v56, %v5668_v24  ;;  %v1797_v25 = vadd.f32 %v5102_v46, %v1796_v43  ;;  %v1805_v24 = vor.u32 1.1754944e-38, %v1804_v31 }
 0x254   : > { %v3581_v39 = vpop.eup %3580  ;;  %v1813_v4 = vadd.f32 %v1811_v26, %v5669_v51  ;;  %v3198_v11 = vmul.f32 -1.442695, %v1881_v37  ;;  %v1801_v32 = vsel %vm1800_vm15, %v5102_v46, %v1797_v25 }
 0x255   : > { %v1816_v27 = vsub.f32 %v4982_v18, %v3581_v39  ;;  %v1802_v18 = vand.u32 2147483647, %v5096_v1 }
 0x256   : > { %3582 = vpow2.f32 %v3198_v11 }
 0x257   : > { %v1862_v8 = vpop.f32.mrf.mxu2  ;;  %3584 = vtanh.f32 %v1813_v4  ;;  %v1818_v10 = vmul.f32 %v1816_v27, %v1791_v3  ;;  %vm1803_vm0 = vcmp.eq.f32.partialorder %v1802_v18, 8.507059e+37 }
 0x258   : > { %v1921_v36 = vadd.f32 %v1862_v8, %v5670_v15  ;;  %v1806_v62 = vsel %vm1803_vm0, %v1805_v24, %v1801_v32 }
 0x259   : > { %v1850_v9 = vpop.f32.mrf.mxu1  ;;  %v5123_v38 = vadd.f32 %v3581_v39, %v1818_v10 }
 0x25a   : > { %v3200_v52 = vmul.f32 -1.442695, %v1921_v36  ;;  %v1882_v16 = vadd.f32 %v1850_v9, %v5671_v63  ;;  %v1876_v9 = vpop.f32.mrf.mxu3 }
 0x25b   : > { %v1822_v27 = vpack.c.bf16 %v5123_v38, %v5123_v38 }
 0x25c   : > { %v3583_v7 = vpop.eup %3582  ;;  %3586 = vpow2.f32 %v3200_v52  ;;  %v3199_v56 = vmul.f32 -1.442695, %v1882_v16 }
 0x25d   : > { %v3585_v26 = vpop.eup %3584  ;;  %v1889_v37 = vadd.f32 1.0, %v3583_v7  ;;  %v1988_v36 = vunpack.c.l.b16 %v1822_v27 }
 0x25e   : > { %3588 = vpow2.f32 %v3199_v56  ;;  %v1817_v17 = vsub.f32 %v4992_v40, %v3585_v26 }
 0x25f   : > { %3590 = vrcp.f32 %v1889_v37  ;;  %v1864_v39 = vpop.f32.mrf.mxu2  ;;  %v1902_v18 = vand.u32 2147483648, %v1889_v37  ;;  %v1900_v7 = vand.u32 2147483647, %v1889_v37  ;;  %vm1896_vm2 = vweird.f32 %v1889_v37 }
 0x260   : > { %v1922_v1 = vadd.f32 %v1864_v39, %v4945_v0  ;;  %v1819_v51 = vmul.f32 %v1817_v17, %v1806_v62 }
 0x261   : > { %v1903_v17 = vor.u32 1.1754944e-38, %v1902_v18  ;;  %vm1901_vm4 = vcmp.eq.f32.partialorder %v1900_v7, 8.507059e+37 }
 0x262   : > { %v3587_v4 = vpop.eup %3586  ;;  %v3201_v43 = vmul.f32 -1.442695, %v1922_v1  ;;  %v5131_v11 = vadd.f32 %v3585_v26, %v1819_v51  ;;  %v1961_v51 = vadd.f32 %v5007_v47, %v1876_v9 }
 0x263   : > { %v5133_v46 = vadd.f32 1.0, %v3587_v4 }
 0x264   : > { %v3589_v3 = vpop.eup %3588  ;;  %3592 = vpow2.f32 %v3201_v43  ;;  %v1823_v40 = vpack.c.bf16 %v5131_v11, %v5131_v11  ;;  %v3324_v8 = vpack.c.bf16 %v5131_v11, %v5123_v38 }
 0x265   : > { %v3591_v10 = vpop.eup %3590  ;;  %3594 = vrcp.f32 %v5133_v46  ;;  %v5142_v25 = vadd.f32 1.0, %v3589_v3  ;;  %vm1936_vm9 = vweird.f32 %v5133_v46 }
 0x266   : > { %v1892_v0 = vmul.f32 %v3591_v10, %v1889_v37  ;;  %3352 = vst [vmem:[%s4485_s2 + $0x8] sm:$0xff] %v3324_v8   ;;  %v1989_v15 = vunpack.c.l.b16 %v1823_v40  ;;  %vm1897_vm1 = vweird.f32 %v3591_v10  ;;  %v1878_v40 = vpop.f32.mrf.mxu3 }
 0x267   : > { %3596 = vrcp.f32 %v5142_v25  ;;  %vm1898_vm3 = vmor %vm1896_vm2, %vm1897_vm1  ;;  %vm1911_vm7 = vweird.f32 %v5142_v25 }
 0x268   : > { %v1893_v31 = vsub.f32 1.0, %v1892_v0  ;;  %v1990_v52 = vpack.c.b16 %v1989_v15, %v1988_v36  ;;  %v1962_v36 = vadd.f32 %v5007_v47, %v1878_v40 }
 0x26a   : > { %v3593_v63 = vpop.eup %3592  ;;  %v1894_v16 = vmul.f32 %v3591_v10, %v1893_v31  ;;  %2000 = vmatmul.bf16.vlgmr.msra.gmra.mxu0 %v1990_v52  ;;  %2014 = vmatmul.bf16.vlgmr.msra.gmra.mxu1 %v1990_v52 }
 0x26b   : > { %v5146_v32 = vpop.eup %3594  ;;  %v5148_v56 = vadd.f32 1.0, %v3593_v63  ;;  %2028 = vmatmul.bf16.vlgmr.msrb.gmra.mxu2 %v1990_v52  ;;  %2326 = vmatpush.bf16.msra.mxu0 %v4562_v20 }
 0x26c   : > { %v1932_v26 = vmul.f32 %v5146_v32, %v5133_v46  ;;  %v1895_v24 = vadd.f32 %v3591_v10, %v1894_v16  ;;  %2451 = vmatpush.bf16.msra.mxu1 %v4553_v12  ;;  %2465 = vmatpush.bf16.msrb.mxu2 %v4574_v29  ;;  %v1917_v29 = vand.u32 2147483648, %v5142_v25  ;;  %vm1937_vm6 = vweird.f32 %v5146_v32 }
 0x26d   : > { %3598 = vrcp.f32 %v5148_v56  ;;  %v3597_v39 = vpop.eup %3596  ;;  %vm1938_vm11 = vmor %vm1936_vm9, %vm1937_vm6  ;;  %vm1951_vm14 = vweird.f32 %v5148_v56 }
 0x26e   : > { %v1933_v62 = vsub.f32 1.0, %v1932_v26  ;;  %v1899_v1 = vsel %vm1898_vm3, %v3591_v10, %v1895_v24  ;;  %v1907_v37 = vmul.f32 %v3597_v39, %v5142_v25  ;;  %vm1912_vm5 = vweird.f32 %v3597_v39 }
 0x26f   : > { %v1904_v4 = vsel %vm1901_vm4, %v1903_v17, %v1899_v1  ;;  %2327 = vmatpush.bf16.msra.mxu0 %v4576_v30  ;;  %v1915_v10 = vand.u32 2147483647, %v5142_v25  ;;  %vm1913_vm8 = vmor %vm1911_vm7, %vm1912_vm5  ;;  %v1918_v15 = vor.u32 1.1754944e-38, %v1917_v29  ;;  %v5676_v17 = vld [vmem:[#allocation69_spill] sm:$0xff] }
 0x270   : > { %v1963_v43 = vmul.f32 %v1961_v51, %v1904_v4  ;;  %v1934_v20 = vmul.f32 %v5146_v32, %v1933_v62  ;;  %v1908_v27 = vsub.f32 1.0, %v1907_v37  ;;  %2452 = vmatpush.bf16.msra.mxu1 %v4566_v21  ;;  %2466 = vmatpush.bf16.msrb.mxu2 %v4582_v42  ;;  %v5677_v62 = vld [vmem:[#allocation70_spill] sm:$0xff]  ;;  %v5678_v51 = vld [vmem:[#allocation73_spill] sm:$0xff] }
 0x271   : > { %vm1916_vm10 = vcmp.eq.f32.partialorder %v1915_v10, 8.507059e+37  ;;  %v5679_v37 = vld [vmem:[#allocation74_spill] sm:$0xff] }
 0x272   : > { %v1965_v12 = vadd.f32 %v1963_v43, %v4931_v57  ;;  %v1909_v8 = vmul.f32 %v3597_v39, %v1908_v27  ;;  %v1935_v0 = vadd.f32 %v5146_v32, %v1934_v20  ;;  %v1942_v57 = vand.u32 2147483648, %v5133_v46 }
 0x273   : > { %v3599_v3 = vpop.eup %3598  ;;  %2328 = vmatpush.bf16.msra.mxu0 %v4585_v45  ;;  %v1940_v45 = vand.u32 2147483647, %v5133_v46 }
 0x274   : > { %3600 = vtanh.f32 %v1965_v12  ;;  %v1947_v30 = vmul.f32 %v3599_v3, %v5148_v56  ;;  %v1910_v21 = vadd.f32 %v3597_v39, %v1909_v8  ;;  %2453 = vmatpush.bf16.msra.mxu1 %v4579_v34  ;;  %2467 = vmatpush.bf16.msrb.mxu2 %v4616_v22  ;;  %v1939_v34 = vsel %vm1938_vm11, %v5146_v32, %v1935_v0 }
 0x275   : > { %v1943_v18 = vor.u32 1.1754944e-38, %v1942_v57  ;;  %vm1941_vm12 = vcmp.eq.f32.partialorder %v1940_v45, 8.507059e+37  ;;  %vm1952_vm13 = vweird.f32 %v3599_v3 }
 0x276   : > { %v1948_v42 = vsub.f32 1.0, %v1947_v30  ;;  %v1914_v31 = vsel %vm1913_vm8, %v3597_v39, %v1910_v21  ;;  %vm1953_vm15 = vmor %vm1951_vm14, %vm1952_vm13 }
 0x277   : > { %v1919_v9 = vsel %vm1916_vm10, %v1918_v15, %v1914_v31  ;;  %2329 = vmatpush.bf16.msra.mxu0 %v4595_v59  ;;  %v1944_v63 = vsel %vm1941_vm12, %v1943_v18, %v1939_v34 }
 0x278   : > { %v1964_v22 = vmul.f32 %v1962_v36, %v1919_v9  ;;  %2454 = vmatpush.bf16.msra.mxu1 %v4588_v48  ;;  %2468 = vmatpush.bf16.msrb.mxu2 %v4626_v41  ;;  %v1949_v47 = vmul.f32 %v3599_v3, %v1948_v42  ;;  %v1957_v41 = vand.u32 2147483648, %v5148_v56 }
 0x27a   : > { %v3601_v25 = vpop.eup %3600  ;;  %v1966_v46 = vadd.f32 %v1964_v22, %v4949_v44  ;;  %v1950_v48 = vadd.f32 %v3599_v3, %v1949_v47 }
 0x27b   : > { %v1969_v52 = vsub.f32 %v5051_v14, %v3601_v25  ;;  %2330 = vmatpush.bf16.msra.mxu0 %v4605_v5  ;;  %v1955_v14 = vand.u32 2147483647, %v5148_v56  ;;  %v5675_v56 = vld [vmem:[#allocation58_spill] sm:$0xff] }
 0x27c   : > { %3602 = vtanh.f32 %v1966_v46  ;;  %2455 = vmatpush.bf16.msra.mxu1 %v4599_v61  ;;  %2469 = vmatpush.bf16.msrb.mxu2 %v4654_v13  ;;  %v1954_v61 = vsel %vm1953_vm15, %v3599_v3, %v1950_v48  ;;  %v1958_v13 = vor.u32 1.1754944e-38, %v1957_v41  ;;  %v5234_v46 = vld [vmem:[%s5638_s5] ss:$0 sm:$0xff] }
 0x27d   : > { %v1971_v16 = vmul.f32 %v1969_v52, %v1944_v63  ;;  %vm1956_vm0 = vcmp.eq.f32.partialorder %v1955_v14, 8.507059e+37 }
 0x27e   : > { %v1959_v7 = vsel %vm1956_vm0, %v1958_v13, %v1954_v61 }
 0x27f   : > { %v5185_v59 = vadd.f32 %v3601_v25, %v1971_v16  ;;  %2331 = vmatpush.bf16.msra.mxu0 %v4618_v23 }
 0x280   : > { %2456 = vmatpush.bf16.msra.mxu1 %v4609_v6  ;;  %2470 = vmatpush.bf16.msrb.mxu2 %v4661_v19 }
 0x281   : > { %v1975_v6 = vpack.c.bf16 %v5185_v59, %v5185_v59 }
 0x282   : > { %v3603_v5 = vpop.eup %3602 }
 0x283   : > { %v1970_v44 = vsub.f32 %v5054_v33, %v3603_v5  ;;  %2332 = vmatpush.bf16.msra.mxu0 %v4632_v53  ;;  %v2141_v19 = vunpack.c.l.b16 %v1975_v6 }
 0x284   : > { %2457 = vmatpush.bf16.msra.mxu1 %v4621_v28  ;;  %2471 = vmatpush.bf16.msrb.mxu2 %v4687_v60 }
 0x285   : > { %v1972_v23 = vmul.f32 %v1970_v44, %v1959_v7  ;;  %v5680_v7 = vld [vmem:[#allocation71_spill] sm:$0xff] }
 0x287   : > { %v5197_v32 = vadd.f32 %v3603_v5, %v1972_v23  ;;  %2333 = vmatpush.bf16.msra.mxu0 %v4644_v2  ;;  %v5673_v2 = vld [vmem:[#allocation56_spill] sm:$0xff] }
 0x288   : > { %2458 = vmatpush.bf16.msra.mxu1 %v4635_v55  ;;  %2472 = vmatpush.bf16.msrb.mxu2 %v4694_v50  ;;  %v5672_v55 = vld [vmem:[#allocation55_spill] sm:$0xff]  ;;  %v5674_v50 = vld [vmem:[#allocation57_spill] sm:$0xff] }
 0x289   : > { %v3329_v53 = vpack.c.bf16 %v5197_v32, %v5185_v59  ;;  %v1976_v28 = vpack.c.bf16 %v5197_v32, %v5197_v32 }
 0x28b   : > { %3353 = vst [vmem:[%s4487_s30 + $0x10] sm:$0xff] %v3329_v53   ;;  %v2142_v60 = vunpack.c.l.b16 %v1976_v28 }
 0x28d   : > { %v2143_v33 = vpack.c.b16 %v2142_v60, %v2141_v19 }
 0x28f   : > { %2153 = vmatmul.bf16.vlgmr.msrb.gmra.mxu3 %v2143_v33  ;;  %2167 = vmatmul.bf16.vlgmr.msrb.gmra.mxu0 %v2143_v33 }
 0x290   : > { %2181 = vmatmul.bf16.vlgmr.msrb.gmra.mxu1 %v2143_v33  ;;  %2479 = vmatpush.bf16.msrb.mxu3 %v4590_v54 }
 0x294   : > { %2480 = vmatpush.bf16.msrb.mxu3 %v4623_v35 }
 0x298   : > { %2481 = vmatpush.bf16.msrb.mxu3 %v5645_v49 }
 0x29c   : > { %2482 = vmatpush.bf16.msrb.mxu3 %v5648_v58 }
 0x2a0   : > { %2483 = vmatpush.bf16.msrb.mxu3 %v5672_v55 }
 0x2a4   : > { %2484 = vmatpush.bf16.msrb.mxu3 %v5673_v2 }
 0x2a8   : > { %2485 = vmatpush.bf16.msrb.mxu3 %v5674_v50 }
 0x2ac   : > { %2486 = vmatpush.bf16.msrb.mxu3 %v5675_v56 }
 0x2e7   : > { %v2001_v26 = vpop.f32.mrf.mxu0  ;;  %v2015_v24 = vpop.f32.mrf.mxu1 }
 0x2e8   : > { %v2034_v39 = vadd.f32 %v2001_v26, %v5676_v17  ;;  %v2074_v54 = vadd.f32 %v2015_v24, %v5677_v62 }
 0x2ea   : > { %v3204_v1 = vmul.f32 -1.442695, %v2034_v39  ;;  %v3206_v35 = vmul.f32 -1.442695, %v2074_v54  ;;  %v5681_v39 = vld [vmem:[#allocation87_spill] sm:$0xff] }
 0x2ec   : > { %3604 = vpow2.f32 %v3204_v1 }
 0x2ed   : > { %3606 = vpow2.f32 %v3206_v35 }
 0x2ee   : > { %v2029_v45 = vpop.f32.mrf.mxu2 }
 0x2ef   : > { %v2003_v49 = vpop.f32.mrf.mxu0  ;;  %v2017_v58 = vpop.f32.mrf.mxu1  ;;  %v2114_v63 = vadd.f32 %v5234_v46, %v2029_v45 }
 0x2f0   : > { %v2035_v4 = vadd.f32 %v2003_v49, %v5678_v51  ;;  %v2075_v43 = vadd.f32 %v2017_v58, %v5679_v37  ;;  %v5682_v51 = vld [vmem:[#allocation75_spill] sm:$0xff] }
 0x2f2   : > { %v3605_v20 = vpop.eup %3604  ;;  %v3205_v27 = vmul.f32 -1.442695, %v2035_v4  ;;  %v3207_v3 = vmul.f32 -1.442695, %v2075_v43 }
 0x2f3   : > { %v3607_v12 = vpop.eup %3606  ;;  %v2042_v29 = vadd.f32 1.0, %v3605_v20 }
 0x2f4   : > { %v5221_v40 = vadd.f32 1.0, %v3607_v12  ;;  %3608 = vpow2.f32 %v3205_v27 }
 0x2f5   : > { %3610 = vrcp.f32 %v2042_v29  ;;  %v2055_v31 = vand.u32 2147483648, %v2042_v29  ;;  %v2053_v34 = vand.u32 2147483647, %v2042_v29  ;;  %vm2049_vm2 = vweird.f32 %v2042_v29 }
 0x2f6   : > { %3612 = vrcp.f32 %v5221_v40  ;;  %v2031_v28 = vpop.f32.mrf.mxu2  ;;  %v2095_v2 = vand.u32 2147483648, %v5221_v40  ;;  %vm2089_vm10 = vweird.f32 %v5221_v40  ;;  %v2093_v24 = vand.u32 2147483647, %v5221_v40 }
 0x2f7   : > { %3614 = vpow2.f32 %v3207_v3  ;;  %v2056_v47 = vor.u32 1.1754944e-38, %v2055_v31  ;;  %vm2054_vm4 = vcmp.eq.f32.partialorder %v2053_v34, 8.507059e+37  ;;  %v2115_v56 = vadd.f32 %v5234_v46, %v2031_v28  ;;  %v5683_v3 = vld [vmem:[#allocation64_spill] sm:$0xff] }
 0x2f8   : > { %v2096_v58 = vor.u32 1.1754944e-38, %v2095_v2  ;;  %vm2094_vm12 = vcmp.eq.f32.partialorder %v2093_v24, 8.507059e+37 }
 0x2fa   : > { %v3609_v8 = vpop.eup %3608 }
 0x2fb   : > { %v3611_v10 = vpop.eup %3610  ;;  %v2043_v30 = vadd.f32 1.0, %v3609_v8 }
 0x2fc   : > { %v5224_v0 = vpop.eup %3612  ;;  %v2045_v21 = vmul.f32 %v3611_v10, %v2042_v29  ;;  %vm2050_vm1 = vweird.f32 %v3611_v10 }
 0x2fd   : > { %v3615_v57 = vpop.eup %3614  ;;  %3616 = vrcp.f32 %v2043_v30  ;;  %v2085_v36 = vmul.f32 %v5224_v0, %v5221_v40  ;;  %vm2051_vm3 = vmor %vm2049_vm2, %vm2050_vm1  ;;  %v2070_v44 = vand.u32 2147483648, %v2043_v30  ;;  %v2068_v53 = vand.u32 2147483647, %v2043_v30 }
 0x2fe   : > { %v2046_v42 = vsub.f32 1.0, %v2045_v21  ;;  %v5226_v15 = vadd.f32 1.0, %v3615_v57  ;;  %vm2064_vm6 = vweird.f32 %v2043_v30  ;;  %vm2090_vm7 = vweird.f32 %v5224_v0  ;;  %v5684_v21 = vld [vmem:[#allocation89_spill] sm:$0xff] }
 0x2ff   : > { %v2086_v18 = vsub.f32 1.0, %v2085_v36  ;;  %v2071_v55 = vor.u32 1.1754944e-38, %v2070_v44  ;;  %vm2069_vm9 = vcmp.eq.f32.partialorder %v2068_v53, 8.507059e+37  ;;  %vm2091_vm11 = vmor %vm2089_vm10, %vm2090_vm7 }
 0x300   : > { %v2047_v9 = vmul.f32 %v3611_v10, %v2046_v42  ;;  %3618 = vrcp.f32 %v5226_v15  ;;  %vm2104_vm14 = vweird.f32 %v5226_v15  ;;  %v2110_v8 = vand.u32 2147483648, %v5226_v15 }
 0x301   : > { %v2087_v5 = vmul.f32 %v5224_v0, %v2086_v18 }
 0x302   : > { %v2048_v22 = vadd.f32 %v3611_v10, %v2047_v9  ;;  %v2111_v45 = vor.u32 1.1754944e-38, %v2110_v8 }
 0x303   : > { %v3617_v25 = vpop.eup %3616  ;;  %v2088_v60 = vadd.f32 %v5224_v0, %v2087_v5 }
 0x304   : > { %v2052_v52 = vsel %vm2051_vm3, %v3611_v10, %v2048_v22  ;;  %v2060_v16 = vmul.f32 %v3617_v25, %v2043_v30  ;;  %vm2065_vm5 = vweird.f32 %v3617_v25 }
 0x305   : > { %v2057_v48 = vsel %vm2054_vm4, %v2056_v47, %v2052_v52  ;;  %vm2066_vm8 = vmor %vm2064_vm6, %vm2065_vm5  ;;  %v2092_v1 = vsel %vm2091_vm11, %v5224_v0, %v2088_v60  ;;  %v5685_v47 = vld [vmem:[#allocation68_spill] sm:$0xff] }
 0x306   : > { %v5237_v41 = vpop.eup %3618  ;;  %v2116_v14 = vmul.f32 %v2114_v63, %v2057_v48  ;;  %v2061_v61 = vsub.f32 1.0, %v2060_v16  ;;  %v2097_v20 = vsel %vm2094_vm12, %v2096_v58, %v2092_v1  ;;  %v5285_v1 = vld [vmem:[%s5642_s27] ss:$0 sm:$0xff] }
 0x307   : > { %v2100_v13 = vmul.f32 %v5237_v41, %v5226_v15  ;;  %vm2105_vm13 = vweird.f32 %v5237_v41 }
 0x308   : > { %v2118_v23 = vadd.f32 %v2116_v14, %v5680_v7  ;;  %v2062_v6 = vmul.f32 %v3617_v25, %v2061_v61  ;;  %vm2106_vm15 = vmor %vm2104_vm14, %vm2105_vm13 }
 0x309   : > { %v2101_v33 = vsub.f32 1.0, %v2100_v13 }
 0x30a   : > { %3620 = vtanh.f32 %v2118_v23  ;;  %v2063_v19 = vadd.f32 %v3617_v25, %v2062_v6 }
 0x30b   : > { %v2102_v35 = vmul.f32 %v5237_v41, %v2101_v33 }
 0x30c   : > { %v2067_v50 = vsel %vm2066_vm8, %v3617_v25, %v2063_v19  ;;  %v2168_v26 = vpop.f32.mrf.mxu0 }
 0x30d   : > { %v2072_v17 = vsel %vm2069_vm9, %v2071_v55, %v2067_v50  ;;  %v2227_v62 = vadd.f32 %v2168_v26, %v5681_v39  ;;  %v2103_v29 = vadd.f32 %v5237_v41, %v2102_v35  ;;  %v2182_v2 = vpop.f32.mrf.mxu1 }
 0x30e   : > { %v2117_v54 = vmul.f32 %v2115_v56, %v2072_v17  ;;  %v2267_v35 = vadd.f32 %v5285_v1, %v2182_v2 }
 0x30f   : > { %v3212_v37 = vmul.f32 -1.442695, %v2227_v62  ;;  %v2107_v42 = vsel %vm2106_vm15, %v5237_v41, %v2103_v29 }
 0x310   : > { %v3621_v49 = vpop.eup %3620  ;;  %v2119_v4 = vadd.f32 %v2117_v54, %v5682_v51 }
 0x311   : > { %v2122_v43 = vsub.f32 %v5123_v38, %v3621_v49  ;;  %v2108_v38 = vand.u32 2147483647, %v5226_v15 }
 0x312   : > { %3622 = vtanh.f32 %v2119_v4  ;;  %v2154_v27 = vpop.f32.mrf.mxu3 }
 0x313   : > { %v2124_v12 = vmul.f32 %v2122_v43, %v2097_v20  ;;  %v2187_v40 = vadd.f32 %v2154_v27, %v5683_v3  ;;  %3624 = vpow2.f32 %v3212_v37  ;;  %vm2109_vm0 = vcmp.eq.f32.partialorder %v2108_v38, 8.507059e+37 }
 0x314   : > { %v2170_v10 = vpop.f32.mrf.mxu0  ;;  %v2112_v22 = vsel %vm2109_vm0, %v2111_v45, %v2107_v42 }
 0x315   : > { %v5259_v30 = vadd.f32 %v3621_v49, %v2124_v12  ;;  %v3210_v0 = vmul.f32 -1.442695, %v2187_v40  ;;  %v2228_v57 = vadd.f32 %v2170_v10, %v5684_v21  ;;  %v5686_v12 = vld [vmem:[#allocation88_spill] sm:$0xff]  ;;  %v2184_v8 = vpop.f32.mrf.mxu1 }
 0x316   : > { %v2268_v42 = vadd.f32 %v5285_v1, %v2184_v8 }
 0x317   : > { %3626 = vpow2.f32 %v3210_v0  ;;  %v3213_v31 = vmul.f32 -1.442695, %v2228_v57  ;;  %v2128_v14 = vpack.c.bf16 %v5259_v30, %v5259_v30 }
 0x318   : > { %v3623_v36 = vpop.eup %3622 }
 0x319   : > { %v2123_v9 = vsub.f32 %v5131_v11, %v3623_v36  ;;  %v3625_v34 = vpop.eup %3624  ;;  %3628 = vpow2.f32 %v3213_v31  ;;  %v2294_v44 = vunpack.c.l.b16 %v2128_v14 }
 0x31a   : > { %v2156_v25 = vpop.f32.mrf.mxu3  ;;  %v5268_v16 = vadd.f32 1.0, %v3625_v34 }
 0x31b   : > { %v2125_v18 = vmul.f32 %v2123_v9, %v2112_v22  ;;  %v2188_v15 = vadd.f32 %v2156_v25, %v5685_v47  ;;  %v5687_v47 = vld [vmem:[#allocation90_spill] sm:$0xff] }
 0x31c   : > { %v2248_v57 = vand.u32 2147483648, %v5268_v16  ;;  %vm2242_vm10 = vweird.f32 %v5268_v16  ;;  %v2246_v45 = vand.u32 2147483647, %v5268_v16 }
 0x31d   : > { %v3627_v52 = vpop.eup %3626  ;;  %v5266_v63 = vadd.f32 %v3623_v36, %v2125_v18  ;;  %v3211_v48 = vmul.f32 -1.442695, %v2188_v15 }
 0x31e   : > { %v2195_v41 = vadd.f32 1.0, %v3627_v52  ;;  %v2249_v18 = vor.u32 1.1754944e-38, %v2248_v57  ;;  %vm2247_vm12 = vcmp.eq.f32.partialorder %v2246_v45, 8.507059e+37 }
 0x31f   : > { %v3334_v11 = vpack.c.bf16 %v5266_v63, %v5259_v30  ;;  %3630 = vpow2.f32 %v3211_v48  ;;  %v2129_v61 = vpack.c.bf16 %v5266_v63, %v5266_v63  ;;  %v3629_v13 = vpop.eup %3628 }
 0x320   : > { %3632 = vrcp.f32 %v2195_v41  ;;  %v5278_v6 = vadd.f32 1.0, %v3629_v13  ;;  %v2208_v50 = vand.u32 2147483648, %v2195_v41  ;;  %v2206_v26 = vand.u32 2147483647, %v2195_v41 }
 0x321   : > { %3354 = vst [vmem:[%s4485_s2 + $0x10] sm:$0xff] %v3334_v11   ;;  %3634 = vrcp.f32 %v5268_v16  ;;  %v2295_v5 = vunpack.c.l.b16 %v2129_v61  ;;  %vm2202_vm2 = vweird.f32 %v2195_v41 }
 0x322   : > { %v2209_v62 = vor.u32 1.1754944e-38, %v2208_v50  ;;  %vm2207_vm4 = vcmp.eq.f32.partialorder %v2206_v26, 8.507059e+37  ;;  %v2263_v11 = vand.u32 2147483648, %v5278_v6  ;;  %vm2257_vm14 = vweird.f32 %v5278_v6  ;;  %v5688_v50 = vld [vmem:[#allocation77_spill] sm:$0xff]  ;;  %v5689_v26 = vld [vmem:[#allocation78_spill] sm:$0xff] }
 0x323   : > { %v2296_v7 = vpack.c.b16 %v2295_v5, %v2294_v44 }
 0x324   : > { %v2264_v44 = vor.u32 1.1754944e-38, %v2263_v11 }
 0x325   : > { %v3631_v23 = vpop.eup %3630  ;;  %2306 = vmatmul.bf16.vlgmr.msra.gmra.mxu2 %v2296_v7  ;;  %2320 = vmatmul.bf16.vlgmr.msra.gmra.mxu3 %v2296_v7 }
 0x326   : > { %v3633_v53 = vpop.eup %3632  ;;  %v2196_v28 = vadd.f32 1.0, %v3631_v23  ;;  %2334 = vmatmul.bf16.vlgmr.msra.gmra.mxu0 %v2296_v7 }
 0x327   : > { %v3635_v19 = vpop.eup %3634  ;;  %v2198_v60 = vmul.f32 %v3633_v53, %v2195_v41  ;;  %vm2203_vm1 = vweird.f32 %v3633_v53 }
 0x328   : > { %3636 = vrcp.f32 %v2196_v28  ;;  %v2238_v55 = vmul.f32 %v3635_v19, %v5268_v16  ;;  %vm2204_vm3 = vmor %vm2202_vm2, %vm2203_vm1  ;;  %v2223_v27 = vand.u32 2147483648, %v2196_v28  ;;  %v2221_v40 = vand.u32 2147483647, %v2196_v28 }
 0x329   : > { %v2199_v33 = vsub.f32 1.0, %v2198_v60  ;;  %3638 = vrcp.f32 %v5278_v6  ;;  %vm2217_vm6 = vweird.f32 %v2196_v28  ;;  %vm2243_vm7 = vweird.f32 %v3635_v19 }
 0x32a   : > { %v2239_v39 = vsub.f32 1.0, %v2238_v55  ;;  %v2224_v21 = vor.u32 1.1754944e-38, %v2223_v27  ;;  %vm2222_vm9 = vcmp.eq.f32.partialorder %v2221_v40, 8.507059e+37  ;;  %vm2244_vm11 = vmor %vm2242_vm10, %vm2243_vm7  ;;  %v2261_v16 = vand.u32 2147483647, %v5278_v6 }
 0x32b   : > { %v2200_v56 = vmul.f32 %v3633_v53, %v2199_v33 }
 0x32c   : > { %v2240_v43 = vmul.f32 %v3635_v19, %v2239_v39  ;;  %vm2262_vm0 = vcmp.eq.f32.partialorder %v2261_v16, 8.507059e+37 }
 0x32d   : > { %v2201_v24 = vadd.f32 %v3633_v53, %v2200_v56 }
 0x32e   : > { %v3637_v17 = vpop.eup %3636  ;;  %v2241_v38 = vadd.f32 %v3635_v19, %v2240_v43 }
 0x32f   : > { %v3639_v54 = vpop.eup %3638  ;;  %v2205_v49 = vsel %vm2204_vm3, %v3633_v53, %v2201_v24  ;;  %v2213_v58 = vmul.f32 %v3637_v17, %v2196_v28  ;;  %vm2218_vm5 = vweird.f32 %v3637_v17 }
 0x330   : > { %v2210_v51 = vsel %vm2207_vm4, %v2209_v62, %v2205_v49  ;;  %v2253_v20 = vmul.f32 %v3639_v54, %v5278_v6  ;;  %vm2219_vm8 = vmor %vm2217_vm6, %vm2218_vm5  ;;  %v2245_v34 = vsel %vm2244_vm11, %v3635_v19, %v2241_v38  ;;  %vm2258_vm13 = vweird.f32 %v3639_v54 }
 0x331   : > { %v2269_v4 = vmul.f32 %v2267_v35, %v2210_v51  ;;  %v2214_v37 = vsub.f32 1.0, %v2213_v58  ;;  %v2250_v48 = vsel %vm2247_vm12, %v2249_v18, %v2245_v34  ;;  %vm2259_vm15 = vmor %vm2257_vm14, %vm2258_vm13  ;;  %v5690_v35 = vld [vmem:[#allocation80_spill] sm:$0xff]  ;;  %v5691_v58 = vld [vmem:[#allocation81_spill] sm:$0xff] }
 0x332   : > { %v2254_v0 = vsub.f32 1.0, %v2253_v20 }
 0x333   : > { %v2271_v29 = vadd.f32 %v2269_v4, %v5686_v12  ;;  %v2215_v3 = vmul.f32 %v3637_v17, %v2214_v37 }
 0x334   : > { %v2255_v22 = vmul.f32 %v3639_v54, %v2254_v0 }
 0x335   : > { %3640 = vtanh.f32 %v2271_v29  ;;  %v2216_v10 = vadd.f32 %v3637_v17, %v2215_v3 }
 0x336   : > { %v2256_v41 = vadd.f32 %v3639_v54, %v2255_v22 }
 0x337   : > { %v2220_v36 = vsel %vm2219_vm8, %v3637_v17, %v2216_v10 }
 0x338   : > { %v2225_v31 = vsel %vm2222_vm9, %v2224_v21, %v2220_v36  ;;  %v2260_v5 = vsel %vm2259_vm15, %v3639_v54, %v2256_v41 }
 0x339   : > { %v2270_v9 = vmul.f32 %v2268_v42, %v2225_v31  ;;  %v2265_v7 = vsel %vm2262_vm0, %v2264_v44, %v2260_v5  ;;  %v5692_v44 = vld [vmem:[#allocation79_spill] sm:$0xff] }
 0x33b   : > { %v3641_v25 = vpop.eup %3640  ;;  %v2272_v15 = vadd.f32 %v2270_v9, %v5687_v47 }
 0x33c   : > { %v2275_v52 = vsub.f32 %v5185_v59, %v3641_v25 }
 0x33d   : > { %3642 = vtanh.f32 %v2272_v15 }
 0x33e   : > { %v2277_v14 = vmul.f32 %v2275_v52, %v2250_v48 }
 0x340   : > { %v5299_v61 = vadd.f32 %v3641_v25, %v2277_v14 }
 0x342   : > { %v2281_v28 = vpack.c.bf16 %v5299_v61, %v5299_v61 }
 0x343   : > { %v3643_v13 = vpop.eup %3642 }
 0x344   : > { %v2276_v59 = vsub.f32 %v5197_v32, %v3643_v13  ;;  %v2447_v60 = vunpack.c.l.b16 %v2281_v28 }
 0x346   : > { %v2278_v23 = vmul.f32 %v2276_v59, %v2265_v7 }
 0x348   : > { %v5302_v53 = vadd.f32 %v3643_v13, %v2278_v23 }
 0x34a   : > { %v2282_v19 = vpack.c.bf16 %v5302_v53, %v5302_v53  ;;  %v3339_v6 = vpack.c.bf16 %v5302_v53, %v5299_v61 }
 0x34c   : > { %3355 = vst [vmem:[%s4487_s30 + $0x8] sm:$0xff] %v3339_v6   ;;  %v2448_v33 = vunpack.c.l.b16 %v2282_v19 }
 0x34e   : > { %v2449_v55 = vpack.c.b16 %v2448_v33, %v2447_v60 }
 0x350   : > { %2459 = vmatmul.bf16.vlgmr.msra.gmra.mxu1 %v2449_v55  ;;  %2473 = vmatmul.bf16.vlgmr.msrb.gmra.mxu2 %v2449_v55 }
 0x351   : > { %2487 = vmatmul.bf16.vlgmr.msrb.gmra.mxu3 %v2449_v55 }
 0x3a3   : > { %v2335_v0 = vpop.f32.mrf.mxu0 }
 0x3a4   : > { %v2420_v18 = vadd.f32 %v5234_v46, %v2335_v0 }
 0x3a8   : > { %v2307_v32 = vpop.f32.mrf.mxu2  ;;  %v2321_v2 = vpop.f32.mrf.mxu3 }
 0x3a9   : > { %v2340_v56 = vadd.f32 %v2307_v32, %v5688_v50  ;;  %v2380_v24 = vadd.f32 %v2321_v2, %v5689_v26  ;;  %v5693_v50 = vld [vmem:[#allocation59_spill] sm:$0xff] }
 0x3ab   : > { %v3216_v17 = vmul.f32 -1.442695, %v2340_v56  ;;  %v3218_v39 = vmul.f32 -1.442695, %v2380_v24  ;;  %v2337_v16 = vpop.f32.mrf.mxu0 }
 0x3ac   : > { %v2421_v28 = vadd.f32 %v5234_v46, %v2337_v16 }
 0x3ad   : > { %3644 = vpow2.f32 %v3216_v17 }
 0x3ae   : > { %3646 = vpow2.f32 %v3218_v39 }
 0x3b0   : > { %v2309_v62 = vpop.f32.mrf.mxu2  ;;  %v2323_v54 = vpop.f32.mrf.mxu3 }
 0x3b1   : > { %v2341_v49 = vadd.f32 %v2309_v62, %v5690_v35  ;;  %v2381_v51 = vadd.f32 %v2323_v54, %v5691_v58 }
 0x3b3   : > { %v3645_v4 = vpop.eup %3644  ;;  %v3217_v37 = vmul.f32 -1.442695, %v2341_v49  ;;  %v3219_v27 = vmul.f32 -1.442695, %v2381_v51  ;;  %v5694_v49 = vld [vmem:[#allocation82_spill] sm:$0xff] }
 0x3b4   : > { %v3647_v43 = vpop.eup %3646  ;;  %v2348_v20 = vadd.f32 1.0, %v3645_v4 }
 0x3b5   : > { %v5315_v12 = vadd.f32 1.0, %v3647_v43  ;;  %3648 = vpow2.f32 %v3217_v37  ;;  %v5695_v43 = vld [vmem:[#allocation83_spill] sm:$0xff] }
 0x3b6   : > { %3650 = vrcp.f32 %v2348_v20  ;;  %v2361_v42 = vand.u32 2147483648, %v2348_v20  ;;  %v2359_v31 = vand.u32 2147483647, %v2348_v20  ;;  %vm2355_vm2 = vweird.f32 %v2348_v20 }
 0x3b7   : > { %3652 = vrcp.f32 %v5315_v12  ;;  %v2401_v32 = vand.u32 2147483648, %v5315_v12  ;;  %vm2395_vm10 = vweird.f32 %v5315_v12  ;;  %v2399_v46 = vand.u32 2147483647, %v5315_v12 }
 0x3b8   : > { %3654 = vpow2.f32 %v3219_v27  ;;  %v2362_v22 = vor.u32 1.1754944e-38, %v2361_v42  ;;  %vm2360_vm4 = vcmp.eq.f32.partialorder %v2359_v31, 8.507059e+37 }
 0x3b9   : > { %v2402_v35 = vor.u32 1.1754944e-38, %v2401_v32  ;;  %vm2400_vm12 = vcmp.eq.f32.partialorder %v2399_v46, 8.507059e+37 }
 0x3bb   : > { %v3649_v29 = vpop.eup %3648 }
 0x3bc   : > { %v3651_v3 = vpop.eup %3650  ;;  %v2349_v40 = vadd.f32 1.0, %v3649_v29 }
 0x3bd   : > { %v5318_v8 = vpop.eup %3652  ;;  %v2351_v10 = vmul.f32 %v3651_v3, %v2348_v20  ;;  %vm2356_vm1 = vweird.f32 %v3651_v3 }
 0x3be   : > { %v3655_v38 = vpop.eup %3654  ;;  %3656 = vrcp.f32 %v2349_v40  ;;  %v2391_v36 = vmul.f32 %v5318_v8, %v5315_v12  ;;  %vm2357_vm3 = vmor %vm2355_vm2, %vm2356_vm1  ;;  %v2376_v5 = vand.u32 2147483648, %v2349_v40  ;;  %v2374_v23 = vand.u32 2147483647, %v2349_v40 }
 0x3bf   : > { %v2352_v21 = vsub.f32 1.0, %v2351_v10  ;;  %v5320_v57 = vadd.f32 1.0, %v3655_v38  ;;  %vm2370_vm6 = vweird.f32 %v2349_v40  ;;  %vm2396_vm7 = vweird.f32 %v5318_v8 }
 0x3c0   : > { %v2392_v25 = vsub.f32 1.0, %v2391_v36  ;;  %v2377_v60 = vor.u32 1.1754944e-38, %v2376_v5  ;;  %vm2375_vm9 = vcmp.eq.f32.partialorder %v2374_v23, 8.507059e+37  ;;  %vm2397_vm11 = vmor %vm2395_vm10, %vm2396_vm7 }
 0x3c1   : > { %v2353_v45 = vmul.f32 %v3651_v3, %v2352_v21  ;;  %3658 = vrcp.f32 %v5320_v57  ;;  %vm2410_vm14 = vweird.f32 %v5320_v57 }
 0x3c2   : > { %v2393_v11 = vmul.f32 %v5318_v8, %v2392_v25 }
 0x3c3   : > { %v2354_v9 = vadd.f32 %v3651_v3, %v2353_v45 }
 0x3c4   : > { %v3657_v34 = vpop.eup %3656  ;;  %v2394_v6 = vadd.f32 %v5318_v8, %v2393_v11 }
 0x3c5   : > { %v2358_v47 = vsel %vm2357_vm3, %v3651_v3, %v2354_v9  ;;  %v2366_v15 = vmul.f32 %v3657_v34, %v2349_v40  ;;  %vm2371_vm5 = vweird.f32 %v3657_v34  ;;  %v2416_v3 = vand.u32 2147483648, %v5320_v57 }
 0x3c6   : > { %v2363_v52 = vsel %vm2360_vm4, %v2362_v22, %v2358_v47  ;;  %vm2372_vm8 = vmor %vm2370_vm6, %vm2371_vm5  ;;  %v2398_v39 = vsel %vm2397_vm11, %v5318_v8, %v2394_v6  ;;  %v5696_v8 = vld [vmem:[#allocation60_spill] sm:$0xff] }
 0x3c7   : > { %v5326_v48 = vpop.eup %3658  ;;  %v2422_v41 = vmul.f32 %v2420_v18, %v2363_v52  ;;  %v2367_v14 = vsub.f32 1.0, %v2366_v15  ;;  %v2403_v37 = vsel %vm2400_vm12, %v2402_v35, %v2398_v39  ;;  %v2417_v31 = vor.u32 1.1754944e-38, %v2416_v3  ;;  %v5698_v39 = vld [vmem:[#allocation84_spill] sm:$0xff] }
 0x3c8   : > { %v2406_v13 = vmul.f32 %v5326_v48, %v5320_v57  ;;  %vm2411_vm13 = vweird.f32 %v5326_v48 }
 0x3c9   : > { %v2424_v59 = vadd.f32 %v2422_v41, %v5692_v44  ;;  %v2368_v7 = vmul.f32 %v3657_v34, %v2367_v14  ;;  %vm2412_vm15 = vmor %vm2410_vm14, %vm2411_vm13 }
 0x3ca   : > { %v2407_v33 = vsub.f32 1.0, %v2406_v13 }
 0x3cb   : > { %3660 = vtanh.f32 %v2424_v59  ;;  %v2369_v19 = vadd.f32 %v3657_v34, %v2368_v7 }
 0x3cc   : > { %v2408_v62 = vmul.f32 %v5326_v48, %v2407_v33 }
 0x3cd   : > { %v2460_v55 = vpop.f32.mrf.mxu1  ;;  %v2373_v2 = vsel %vm2372_vm8, %v3657_v34, %v2369_v19 }
 0x3ce   : > { %v2493_v56 = vadd.f32 %v2460_v55, %v5693_v50  ;;  %v2378_v26 = vsel %vm2375_vm9, %v2377_v60, %v2373_v2  ;;  %v2409_v12 = vadd.f32 %v5326_v48, %v2408_v62 }
 0x3cf   : > { %v2423_v24 = vmul.f32 %v2421_v28, %v2378_v26 }
 0x3d0   : > { %v3222_v17 = vmul.f32 -1.442695, %v2493_v56  ;;  %v2413_v42 = vsel %vm2412_vm15, %v5326_v48, %v2409_v12 }
 0x3d1   : > { %v3661_v54 = vpop.eup %3660  ;;  %v2425_v58 = vadd.f32 %v2423_v24, %v5694_v49 }
 0x3d2   : > { %3662 = vpow2.f32 %v3222_v17  ;;  %v2428_v51 = vsub.f32 %v5259_v30, %v3661_v54  ;;  %v2414_v30 = vand.u32 2147483647, %v5320_v57  ;;  %v5697_v57 = vld [vmem:[#allocation85_spill] sm:$0xff] }
 0x3d3   : > { %v2474_v4 = vpop.f32.mrf.mxu2  ;;  %3664 = vtanh.f32 %v2425_v58 }
 0x3d4   : > { %v2533_v20 = vadd.f32 %v2474_v4, %v5695_v43  ;;  %v2430_v27 = vmul.f32 %v2428_v51, %v2403_v37  ;;  %vm2415_vm0 = vcmp.eq.f32.partialorder %v2414_v30, 8.507059e+37  ;;  %v2488_v13 = vpop.f32.mrf.mxu3 }
 0x3d5   : > { %v2462_v29 = vpop.f32.mrf.mxu1  ;;  %v2418_v22 = vsel %vm2415_vm0, %v2417_v31, %v2413_v42  ;;  %v2573_v50 = vadd.f32 %v5285_v1, %v2488_v13 }
 0x3d6   : > { %v3224_v40 = vmul.f32 -1.442695, %v2533_v20  ;;  %v2494_v10 = vadd.f32 %v2462_v29, %v5696_v8  ;;  %v5348_v38 = vadd.f32 %v3661_v54, %v2430_v27 }
 0x3d8   : > { %v3663_v0 = vpop.eup %3662  ;;  %3666 = vpow2.f32 %v3224_v40  ;;  %v3223_v21 = vmul.f32 -1.442695, %v2494_v10  ;;  %2591 = vst [vmem:[#allocation2] sm:$0xff] %v5348_v38 }
 0x3d9   : > { %v2501_v36 = vadd.f32 1.0, %v3663_v0  ;;  %v3665_v45 = vpop.eup %3664 }
 0x3da   : > { %3668 = vpow2.f32 %v3223_v21  ;;  %v2429_v9 = vsub.f32 %v5266_v63, %v3665_v45 }
 0x3db   : > { %3670 = vrcp.f32 %v2501_v36  ;;  %v2476_v34 = vpop.f32.mrf.mxu2  ;;  %v2514_v44 = vand.u32 2147483648, %v2501_v36  ;;  %v2512_v23 = vand.u32 2147483647, %v2501_v36  ;;  %vm2508_vm2 = vweird.f32 %v2501_v36 }
 0x3dc   : > { %v2534_v25 = vadd.f32 %v2476_v34, %v5697_v57  ;;  %v2431_v18 = vmul.f32 %v2429_v9, %v2418_v22  ;;  %v2490_v49 = vpop.f32.mrf.mxu3 }
 0x3dd   : > { %v2515_v33 = vor.u32 1.1754944e-38, %v2514_v44  ;;  %vm2513_vm4 = vcmp.eq.f32.partialorder %v2512_v23, 8.507059e+37  ;;  %v2574_v29 = vadd.f32 %v5285_v1, %v2490_v49 }
 0x3de   : > { %v3667_v47 = vpop.eup %3666  ;;  %v3225_v15 = vmul.f32 -1.442695, %v2534_v25  ;;  %v5356_v52 = vadd.f32 %v3665_v45, %v2431_v18  ;;  %v5699_v45 = vld [vmem:[#allocation86_spill] sm:$0xff] }
 0x3df   : > { %v5358_v41 = vadd.f32 1.0, %v3667_v47 }
 0x3e0   : > { %v3669_v48 = vpop.eup %3668  ;;  %3672 = vpow2.f32 %v3225_v15  ;;  %v3344_v11 = vpack.c.bf16 %v5356_v52, %v5348_v38  ;;  %2592 = vst [vmem:[#allocation2 + $0x8] sm:$0xff] %v5356_v52 }
 0x3e1   : > { %v3671_v14 = vpop.eup %3670  ;;  %3674 = vrcp.f32 %v5358_v41  ;;  %v2502_v16 = vadd.f32 1.0, %v3669_v48  ;;  %v2554_v20 = vand.u32 2147483648, %v5358_v41  ;;  %vm2548_vm9 = vweird.f32 %v5358_v41 }
 0x3e2   : > { %v2504_v63 = vmul.f32 %v3671_v14, %v2501_v36  ;;  %3356 = vst [vmem:[%s4485_s2 + $0x18] sm:$0xff] %v3344_v11   ;;  %vm2509_vm1 = vweird.f32 %v3671_v14  ;;  %v2552_v3 = vand.u32 2147483647, %v5358_v41 }
 0x3e3   : > { %3676 = vrcp.f32 %v2502_v16  ;;  %vm2510_vm3 = vmor %vm2508_vm2, %vm2509_vm1  ;;  %v2529_v54 = vand.u32 2147483648, %v2502_v16  ;;  %v2527_v51 = vand.u32 2147483647, %v2502_v16  ;;  %vm2523_vm7 = vweird.f32 %v2502_v16 }
 0x3e4   : > { %v2505_v5 = vsub.f32 1.0, %v2504_v63  ;;  %v2555_v21 = vor.u32 1.1754944e-38, %v2554_v20  ;;  %vm2553_vm12 = vcmp.eq.f32.partialorder %v2552_v3, 8.507059e+37 }
 0x3e5   : > { %v2530_v12 = vor.u32 1.1754944e-38, %v2529_v54  ;;  %vm2528_vm10 = vcmp.eq.f32.partialorder %v2527_v51, 8.507059e+37 }
 0x3e6   : > { %v3673_v59 = vpop.eup %3672  ;;  %v2506_v7 = vmul.f32 %v3671_v14, %v2505_v5 }
 0x3e7   : > { %v3675_v28 = vpop.eup %3674  ;;  %v5365_v19 = vadd.f32 1.0, %v3673_v59 }
 0x3e8   : > { %v2544_v6 = vmul.f32 %v3675_v28, %v5358_v41  ;;  %v2507_v60 = vadd.f32 %v3671_v14, %v2506_v7  ;;  %vm2549_vm6 = vweird.f32 %v3675_v28 }
 0x3e9   : > { %3678 = vrcp.f32 %v5365_v19  ;;  %v3677_v55 = vpop.eup %3676  ;;  %vm2550_vm11 = vmor %vm2548_vm9, %vm2549_vm6  ;;  %v2569_v57 = vand.u32 2147483648, %v5365_v19  ;;  %vm2563_vm14 = vweird.f32 %v5365_v19  ;;  %v2567_v25 = vand.u32 2147483647, %v5365_v19 }
 0x3ea   : > { %v2545_v32 = vsub.f32 1.0, %v2544_v6  ;;  %v2511_v2 = vsel %vm2510_vm3, %v3671_v14, %v2507_v60  ;;  %v2519_v46 = vmul.f32 %v3677_v55, %v2502_v16  ;;  %vm2524_vm5 = vweird.f32 %v3677_v55 }
 0x3eb   : > { %v2516_v56 = vsel %vm2513_vm4, %v2515_v33, %v2511_v2  ;;  %vm2525_vm8 = vmor %vm2523_vm7, %vm2524_vm5  ;;  %vm2568_vm0 = vcmp.eq.f32.partialorder %v2567_v25, 8.507059e+37 }
 0x3ec   : > { %v2575_v26 = vmul.f32 %v2573_v50, %v2516_v56  ;;  %v2546_v24 = vmul.f32 %v3675_v28, %v2545_v32  ;;  %v2520_v17 = vsub.f32 1.0, %v2519_v46 }
 0x3ee   : > { %v2577_v62 = vadd.f32 %v2575_v26, %v5698_v39  ;;  %v2521_v58 = vmul.f32 %v3677_v55, %v2520_v17  ;;  %v2547_v37 = vadd.f32 %v3675_v28, %v2546_v24 }
 0x3ef   : > { %v3679_v35 = vpop.eup %3678 }
 0x3f0   : > { %3680 = vtanh.f32 %v2577_v62  ;;  %v2559_v4 = vmul.f32 %v3679_v35, %v5365_v19  ;;  %v2522_v43 = vadd.f32 %v3677_v55, %v2521_v58  ;;  %v2551_v10 = vsel %vm2550_vm11, %v3675_v28, %v2547_v37 }
 0x3f1   : > { %v2556_v9 = vsel %vm2553_vm12, %v2555_v21, %v2551_v10  ;;  %vm2564_vm13 = vweird.f32 %v3679_v35 }
 0x3f2   : > { %v2560_v27 = vsub.f32 1.0, %v2559_v4  ;;  %v2526_v40 = vsel %vm2525_vm8, %v3677_v55, %v2522_v43  ;;  %vm2565_vm15 = vmor %vm2563_vm14, %vm2564_vm13 }
 0x3f3   : > { %v2531_v8 = vsel %vm2528_vm10, %v2530_v12, %v2526_v40 }
 0x3f4   : > { %v2576_v30 = vmul.f32 %v2574_v29, %v2531_v8  ;;  %v2561_v42 = vmul.f32 %v3679_v35, %v2560_v27 }
 0x3f6   : > { %v3681_v0 = vpop.eup %3680  ;;  %v2578_v31 = vadd.f32 %v2576_v30, %v5699_v45  ;;  %v2562_v34 = vadd.f32 %v3679_v35, %v2561_v42 }
 0x3f7   : > { %v2581_v36 = vsub.f32 %v5299_v61, %v3681_v0  ;;  %v2570_v61 = vor.u32 1.1754944e-38, %v2569_v57 }
 0x3f8   : > { %3682 = vtanh.f32 %v2578_v31  ;;  %v2566_v18 = vsel %vm2565_vm15, %v3679_v35, %v2562_v34 }
 0x3f9   : > { %v2583_v1 = vmul.f32 %v2581_v36, %v2556_v9  ;;  %v2571_v41 = vsel %vm2568_vm0, %v2570_v61, %v2566_v18 }
 0x3fb   : > { %v2585_v22 = vadd.f32 %v3681_v0, %v2583_v1 }
 0x3fd   : > { %2593 = vst [vmem:[#allocation3 + $0x8] sm:$0xff] %v2585_v22 }
 0x3fe   : > { %v3683_v47 = vpop.eup %3682 }
 0x3ff   : > { %v2582_v15 = vsub.f32 %v5302_v53, %v3683_v47 }
 0x401   : > { %v2584_v48 = vmul.f32 %v2582_v15, %v2571_v41 }
 0x403   : > { %v2586_v14 = vadd.f32 %v3683_v47, %v2584_v48  ;;  %2598 = sbr.rel (%p3226_p7) target bundleno = 1036 (0x40c), region = 108 }
 0x405   : > { %v3349_v11 = vpack.c.bf16 %v2586_v14, %v2585_v22  ;;  %2594 = vst [vmem:[#allocation3] sm:$0xff] %v2586_v14 }
 0x407   : > { %3350 = vst [vmem:[%s4487_s30] sm:$0xff] %v3349_v11  }
 0x408   : > { %2599 = vst [vmem:[#allocation23] sm:$0xff] %v5348_v38 }
 0x409   : > { %2600 = vst [vmem:[#allocation23 + $0x8] sm:$0xff] %v5356_v52 }
 0x40a   : > { %2601 = vst [vmem:[#allocation24] sm:$0xff] %v2585_v22 }
 0x40b   : > { %2602 = vst [vmem:[#allocation24 + $0x8] sm:$0xff] %v2586_v14 }
 0x40c PF: > { %s2634_s17 = ssub.s32 1, %s4271_s28  ;;  %s2641_s11 = sshll.u32 %s4487_s30, 4  ;;  %s2642_s11 = int_to_ptr.vmem [resolvable:$true] %s2641_s11 }
 0x40d   : > { %s3310_s7 = sshll.u32 %s2634_s17, 5  ;;  %s5700_s14 = sld [smem:[#allocation105_spill]] }
 0x40e   : > { %s3308_s25 = sshll.u32 %s4271_s28, 5  ;;  %s2609_s3 = scalar_lea.sflag [#allocation22], %s577_s0 }
 0x413   : > { %s2640_s18 = scalar_lea.hbm %s5700_s14, %s3310_s7  ;;  %s3946_s30 = scalar_lea.hbm %s5700_s14, 64 }
 0x414   : > { %s2643_s13 = sshll.u32 %s2640_s18, 4  ;;  %s2644_s13 = int_to_ptr.hbm [resolvable:$true] %s2643_s13 }
 0x415   : > { %s3940_s1 = sshra.s32 %s2644_s13, 4  ;;  %s3941_s1 = int_to_ptr.hbm [resolvable:$true] %s3940_s1 }
 0x416   : > { %s3942_s5 = scalar_lea.hbm %s3941_s1, 32  ;;  %p3947_p0 = scmp.lt.s32.totalorder %s3941_s1, %s5700_s14 }
 0x417   : > { %p3943_p12 = scmp.ne.s32.totalorder %s3941_s1, %s3942_s5  ;;  %p3948_p1 = scmp.lt.s32.totalorder %s3946_s30, %s3942_s5 }
 0x419   : > { %p3944_p3 = pnand %p3943_p12, %p4414_p5  ;;  %p3949_p6 = por %p3948_p1, %p3947_p0 }
 0x41b   : > { %p3945_p4 = pneg %p3944_p3 }
 0x41d   : > { %p3950_p13 = pnand %p3949_p6, %p3945_p4 }
 0x41f   : > { %3953 = shalt.err (!%p3950_p13)
}
 0x420   : > { %s4146_s0 = smov 64   ;;  %s4147_s7 = smov 4  }
 0x421   : > { %3386 = dma.vmem_to_hbm [thread:$0]  (%p4414_p5), %s2642_s11, 512, %s2644_s13, %s2609_s3, %s4146_s0, %s4146_s0, %s4147_s7  }
 0x422   : > { %s5701_s27 = sld [smem:[#allocation104_spill]]  ;;  %s2622_s23 = sshll.u32 %s4485_s2, 4  ;;  %s2623_s23 = int_to_ptr.vmem [resolvable:$true] %s2622_s23 }
 0x423   : > { %s2604_s1 = scalar_lea.sflag [#allocation8], %s4449_s10 }
 0x428   : > { %s2621_s17 = scalar_lea.hbm %s5701_s27, %s3308_s25  ;;  %s3974_s26 = scalar_lea.hbm %s5701_s27, 64 }
 0x429   : > { %s2624_s12 = sshll.u32 %s2621_s17, 4  ;;  %s2625_s12 = int_to_ptr.hbm [resolvable:$true] %s2624_s12 }
 0x42a   : > { %s3968_s5 = sshra.s32 %s2625_s12, 4  ;;  %s3969_s5 = int_to_ptr.hbm [resolvable:$true] %s3968_s5 }
 0x42b   : > { %s3970_s30 = scalar_lea.hbm %s3969_s5, 32  ;;  %p3975_p5 = scmp.lt.s32.totalorder %s3969_s5, %s5701_s27 }
 0x42c   : > { %p3971_p9 = scmp.ne.s32.totalorder %s3969_s5, %s3970_s30  ;;  %p3976_p8 = scmp.lt.s32.totalorder %s3974_s26, %s3970_s30 }
 0x42e   : > { %p3972_p10 = pnand %p3971_p9, %p4345_p2  ;;  %p3977_p7 = por %p3976_p8, %p3975_p5 }
 0x430   : > { %p3973_p11 = pneg %p3972_p10 }
 0x432   : > { %p3978_p12 = pnand %p3977_p7, %p3973_p11 }
 0x434   : > { %3981 = shalt.err (!%p3978_p12)
}
 0x435   : > { %3385 = dma.vmem_to_hbm [thread:$0]  (%p4345_p2), %s2623_s23, 512, %s2625_s12, %s2604_s1, %s4146_s0, %s4146_s0, %s4147_s7  }
 0x436   : > { %s4148_s10 = smov [#allocation23]   ;;  %s5702_s14 = sld [smem:[#allocation106_spill]] }
 0x437   : > { %s2655_s2 = sshll.u32 %s4148_s10, 4  ;;  %s4149_s18 = smov 128   ;;  %s2656_s2 = int_to_ptr.vmem [resolvable:$true] %s2655_s2 }
 0x438   : > { %s4150_s17 = smov 8   ;;  %p5703_p3 = scmp.eq.s32.totalorder %s4271_s28, 1 }
 0x439   : > { %s5704_s15 = sld [smem:[#allocation107_spill]]  ;;  %s4151_s26 = smov [#allocation24]  }
 0x43a   : > { %s2669_s11 = sshll.u32 %s4151_s26, 4  ;;  %p5705_p2 = pmov %p5703_p3  ;;  %s2670_s11 = int_to_ptr.vmem [resolvable:$true] %s2669_s11 }
 0x43c   : > { %s2657_s6 = sshll.u32 %s5702_s14, 4  ;;  %p5706_p4 = pmov %p5705_p2  ;;  %s2658_s6 = int_to_ptr.hbm [resolvable:$true] %s2657_s6 }
 0x43d   : > { %3388 = dma.vmem_to_hbm [thread:$0]  (%p5703_p3), %s2656_s2, 256, %s2658_s6, [#allocation22], %s4149_s18, %s4149_s18, %s4150_s17  }
 0x43f   : > { %s2671_s9 = sshll.u32 %s5704_s15, 4  ;;  %s2672_s9 = int_to_ptr.hbm [resolvable:$true] %s2671_s9 }
 0x440   : > { %3390 = dma.vmem_to_hbm [thread:$0]  (%p5705_p2), %s2670_s11, 256, %s2672_s9, [#allocation25], %s4149_s18, %s4149_s18, %s4150_s17  }
 0x441   : > { %4091 = dma.done.wait (%p5706_p4), [#allocation22], 256   ;;  %p5707_p0 = pmov %p5705_p2 }
 0x443   : > { %4093 = vsyncadd (%p5707_p0), [#allocation22], 4294967040  ;;  %p5708_p1 = pmov %p5707_p0 }
 0x444   : > { %p5709_p6 = pmov %p5707_p0 }
 0x445   : > { %4095 = dma.done.wait (%p5708_p1), [#allocation25], 256  }
 0x446   : > { %4097 = vsyncadd (%p5709_p6), [#allocation25], 4294967040 }
 0x447 PF: > { %s2696_s23 = sand.u32 1, %s4120_s21   ;;  %p5710_p13 = scmp.ne.s32.totalorder %s5558_s29, 0 }
 0x448   : > { %p5711_p9 = scmp.ge.s32.totalorder %s4132_s24, 2  ;;  %s2697_s0 = scalar_lea.sflag [#allocation8], %s2696_s23 }
 0x44a   : > { %p3424_p10 = pnand %p5711_p9, %p5710_p13 }
 0x44c   : > { %p3425_p11 = pneg %p3424_p10 }
 0x44e   : > { %4099 = dma.done.wait (%p3425_p11), %s2697_s0, 512  }
 0x44f   : > { %4101 = vsyncadd (%p3425_p11), %s2697_s0, 4294966784  ;;  %s5712_s7 = sadd.s32 4294967294, %s4132_s24   ;;  %p5713_p5 = scmp.ne.s32.totalorder %s5568_s16, 0 }
 0x450   : > { %s2706_s12 = sand.u32 1, %s5712_s7   ;;  %p5714_p8 = pmov %p5711_p9 }
 0x451   : > { %s2707_s28 = scalar_lea.sflag [#allocation22], %s2706_s12 }
 0x452   : > { %p3427_p7 = pnand %p5714_p8, %p5713_p5 }
 0x454   : > { %p3428_p12 = pneg %p3427_p7 }
 0x456   : > { %4103 = dma.done.wait (%p3428_p12), %s2707_s28, 512  }
 0x457   : > { %4105 = vsyncadd (%p3428_p12), %s2707_s28, 4294966784  ;;  %s5715_s29 = sld [smem:[#allocation36_spill]]  ;;  %p39_p3 = scmp.ge.s32.totalorder %s4383_s4, 4  }
 0x458   : > { %s5716_s23 = sld [smem:[#allocation38_spill]]  ;;  %s5717_s18 = smov %s4112_s19 }
 0x459   : > { %s5718_s19 = smov %s4116_s20  ;;  %s5719_s20 = smov %s4396_s8 }
 0x45a   : > { %s5720_s21 = smov %s4124_s22  ;;  %s5722_s24 = smov %s4383_s4 }
 0x45b   :  { %41 = sbr.rel (!%p39_p3) target bundleno = 32 (0x20), region = 197 }
 0x45d   : > { %s5721_s22 = smov %s5715_s29 }
 0x460   :  { %2713 = vsyncpa [#allocation7], 1 }
 0x461   :  { %2715 = vsyncpa [#allocation7 + $0x1], 1 }
 0x462   :  { %2716 = vsyncpa [#allocation10], 1 }
 0x463   :  { %2718 = vsyncpa [#allocation10 + $0x1], 1 }
 0x464   :  { %2719 = vsyncpa [#allocation13], 1 }
 0x465   :  { %2720 = vsyncpa [#allocation16], 1 }
 0x466   :  { %2721 = vsyncpa [#allocation19], 1 }
 0x467   :  { %2722 = vsyncpa [#allocation8], 1 }
 0x468   :  { %2724 = vsyncpa [#allocation8 + $0x1], 1 }
 0x469   :  { %2725 = vsyncpa [#allocation22], 1 }
 0x46a   :  { %2727 = vsyncpa [#allocation22 + $0x1], 1 }
 0x46b   :  { %2728 = vsyncpa [#allocation25], 1 }

</bundles_post_ra>
